<compile_context>
chip_gen: v7x
topology: tpu7x:2x2x1
jax: 0.10.0
libtpu: 0.0.40
codegen_flags: <defaults>
</compile_context>

<pallas_src>
import functools

import jax
import jax.numpy as jnp
import numpy as np
from jax.experimental import pallas as pl
from jax.experimental.pallas import tpu as pltpu

# ----------------------------- model dimensions ------------------------------
VOCAB = 64          # vocab_size
EMB = 64            # embedding_dim  (== 2*HID)
HID = 32            # hidden_dim
OUT = 8             # output_dim
PAD_IDX = 0         # padding_idx
NLAYERS = 2         # num_layers (bidirectional)
B, T = 2, 8         # batch, sequence length

assert EMB == 2 * HID


# --------------------------------- kernel ------------------------------------
def _classifier_kernel(tok_ref, emb_ref, w_ih_ref, w_hh_ref, b_ref,
                       wq_ref, bq_ref, wu_ref, bu_ref, v_ref,
                       fcw_ref, fcb_ref, out_ref,
                       xs0_f, xs0_b, xs1_f, xs1_b, *, batch, seq):
    f32 = jnp.float32
    V, E = emb_ref.shape
    H8 = w_hh_ref.shape[-1]          # 8 * hidden
    H = H8 // 8
    H2 = 2 * H
    TB = batch * seq

    # Lane mask selecting forward-direction gate columns.
    # Fused gate column layout: [i_f|i_b | f_f|f_b | g_f|g_b | o_f|o_b].
    lane = jax.lax.broadcasted_iota(jnp.int32, (batch, H8), 1)
    fwd_mask = (lane % H2) < H                                     # (B, 8H) bool

    # ---- embedding lookup: one (T*B, V) one-hot matmul on the MXU ----
    tok = tok_ref[...]                                             # (TB, 1) int32
    iota_v = jax.lax.broadcasted_iota(jnp.int32, (TB, V), 1)
    onehot = (iota_v == tok).astype(f32)                           # (TB, V)
    x_flat = jnp.dot(onehot, emb_ref[...],
                     preferred_element_type=f32)                   # (TB, E)

    # ---- one fused bidirectional LSTM layer ----
    def lstm_layer(xg_all, w_hh, out_f_ref, out_b_ref):
        # xg_all : (TB, 8H) hoisted input gates (+bias); rows t-major, b-minor.
        # w_hh   : (2H, 8H) block-diagonal fused recurrent weights.
        h = jnp.zeros((batch, H2), f32)          # [h_fwd | h_bwd]
        c = jnp.zeros((batch, H2), f32)          # [c_fwd | c_bwd]
        for s in range(seq):
            rf = s * batch                       # fwd direction processes time s
            rb = (seq - 1 - s) * batch           # bwd direction processes time T-1-s
            xg = jnp.where(fwd_mask,
                           xg_all[rf:rf + batch, :],
                           xg_all[rb:rb + batch, :])               # (B, 8H)
            gates = xg + jnp.dot(h, w_hh, preferred_element_type=f32)
            sig = jax.nn.sigmoid(gates)          # full 256-lane EUP pass
            tnh = jnp.tanh(gates)                # full 256-lane EUP pass
            i_g = sig[:, 0 * H2:1 * H2]          # PyTorch gate order: i, f, g, o
            f_g = sig[:, 1 * H2:2 * H2]
            g_g = tnh[:, 2 * H2:3 * H2]
            o_g = sig[:, 3 * H2:4 * H2]
            c = f_g * c + i_g * g_g
            h = o_g * jnp.tanh(c)
            out_f_ref[rf:rf + batch, :] = h[:, 0:H]     # fwd output at time s
            out_b_ref[rb:rb + batch, :] = h[:, H:H2]    # bwd output at time T-1-s
        return h    # == [h_fwd_final | h_bwd_final] = hidden_cat of this layer

    # layer 0 (input: embeddings); hoisted x-gates for both directions at once
    xg0 = jnp.dot(x_flat, w_ih_ref[0], preferred_element_type=f32) + b_ref[0]
    lstm_layer(xg0, w_hh_ref[0], xs0_f, xs0_b)

    # layer 1 (input: [h_f | h_b] of layer 0) via split weights -> no lane concat
    w1 = w_ih_ref[1]                                               # (2H, 8H)
    xg1 = (jnp.dot(xs0_f[...], w1[0:H, :], preferred_element_type=f32)
           + jnp.dot(xs0_b[...], w1[H:H2, :], preferred_element_type=f32)
           + b_ref[1])
    hidden_cat = lstm_layer(xg1, w_hh_ref[1], xs1_f, xs1_b)        # (B, 2H)

    # ---- attention (matmuls + tanh batched over the whole (T*B, .) slab) ----
    xsf = xs1_f[...]                                               # (TB, H)
    xsb = xs1_b[...]                                               # (TB, H)
    q = jnp.dot(hidden_cat, wq_ref[...], preferred_element_type=f32) + bq_ref[...]
    wu = wu_ref[...]
    u_all = (jnp.dot(xsf, wu[0:H, :], preferred_element_type=f32)
             + jnp.dot(xsb, wu[H:H2, :], preferred_element_type=f32)
             + bu_ref[...])                                        # (TB, 2H)
    q_rep = jnp.concatenate([q] * seq, axis=0)                     # (TB, 2H)
    s_all = jnp.tanh(q_rep + u_all)                                # one EUP pass
    logit_col = jnp.sum(s_all * v_ref[...], axis=1, keepdims=True)  # (TB, 1)
    logits = jnp.concatenate(
        [logit_col[t * batch:(t + 1) * batch, :] for t in range(seq)],
        axis=1)                                                    # (B, T)

    m = jnp.max(logits, axis=1, keepdims=True)
    e = jnp.exp(logits - m)
    attn = e * pl.reciprocal(jnp.sum(e, axis=1, keepdims=True), approx=True)

    ctx_f = jnp.zeros((batch, H), f32)
    ctx_b = jnp.zeros((batch, H), f32)
    for t in range(seq):
        a_t = attn[:, t:t + 1]
        ctx_f = ctx_f + a_t * xsf[t * batch:(t + 1) * batch, :]
        ctx_b = ctx_b + a_t * xsb[t * batch:(t + 1) * batch, :]

    fcw = fcw_ref[...]                                             # (2H, OUT)
    out = (jnp.dot(ctx_f, fcw[0:H, :], preferred_element_type=f32)
           + jnp.dot(ctx_b, fcw[H:H2, :], preferred_element_type=f32)
           + fcb_ref[...])
    out_ref[...] = out.astype(out_ref.dtype)


# --------------------------- weight fusion (wrapper) --------------------------
def _fuse_input_weights(w_ih):
    # (L, 2, 4H, E) -> (L, E, 8H); columns [i_f|i_b|f_f|f_b|g_f|g_b|o_f|o_b]
    L, D, H4, E = w_ih.shape
    H = H4 // 4
    out = jnp.zeros((L, E, 8 * H), w_ih.dtype)
    for l in range(L):
        for d in range(D):
            for k in range(4):
                c0 = 2 * k * H + d * H
                out = out.at[l, :, c0:c0 + H].set(
                    w_ih[l, d, k * H:(k + 1) * H, :].T)
    return out


def _fuse_recurrent_weights(w_hh):
    # (L, 2, 4H, H) -> (L, 2H, 8H), block-diagonal over directions
    L, D, H4, H = w_hh.shape
    out = jnp.zeros((L, 2 * H, 8 * H), w_hh.dtype)
    for l in range(L):
        for d in range(D):
            for k in range(4):
                c0 = 2 * k * H + d * H
                out = out.at[l, d * H:(d + 1) * H, c0:c0 + H].set(
                    w_hh[l, d, k * H:(k + 1) * H, :].T)
    return out


def _fuse_bias(b):
    # (L, 2, 4H) -> (L, 1, 8H)
    L, D, H4 = b.shape
    H = H4 // 4
    out = jnp.zeros((L, 1, 8 * H), b.dtype)
    for l in range(L):
        for d in range(D):
            for k in range(4):
                c0 = 2 * k * H + d * H
                out = out.at[l, 0, c0:c0 + H].set(b[l, d, k * H:(k + 1) * H])
    return out


# --------------------------------- wrapper -----------------------------------
@jax.jit
def attn_bilstm_classifier(text, params):
    Bx, Tx = text.shape
    if Tx == 0:  # mirrors `if text.size(1) == 0` (static on TPU)
        return jnp.zeros((Bx, OUT), jnp.float32)

    tok = text.T.reshape(Tx * Bx, 1).astype(jnp.int32)     # t-major, b-minor
    emb = params["emb"]
    w_ih_f = _fuse_input_weights(params["w_ih"])           # (L, 64, 256)
    w_hh_f = _fuse_recurrent_weights(params["w_hh"])       # (L, 64, 256)
    b_f = _fuse_bias(params["b"])                          # (L, 1, 256)
    wq_t = params["wq"].T
    bq = params["bq"].reshape(1, -1)
    wu_t = params["wu"].T
    bu = params["bu"].reshape(1, -1)
    v = params["v"].reshape(1, -1)
    fcw_t = params["fcw"].T                                # (2H, OUT)
    fcb = params["fcb"].reshape(1, -1)

    vmem = pl.BlockSpec(memory_space=pltpu.MemorySpace.VMEM)
    slab = pltpu.VMEM((Tx * Bx, HID), jnp.float32)
    kernel = functools.partial(_classifier_kernel, batch=Bx, seq=Tx)
    # TODO(synk): for realistic vocab sizes move `emb` to memory_space=pl.ANY and
    # gather rows via pltpu.make_async_copy instead of the one-hot matmul.
    return pl.pallas_call(
        kernel,
        out_shape=jax.ShapeDtypeStruct((Bx, OUT), jnp.float32),
        in_specs=[vmem] * 12,
        out_specs=vmem,
        scratch_shapes=[slab, slab, slab, slab],   # per-layer fwd/bwd output slabs
    )(tok, emb, w_ih_f, w_hh_f, b_f, wq_t, bq, wu_t, bu, v, fcw_t, fcb)


# ---------------------------- pure-JAX reference -----------------------------
def reference_forward(text, p):
    Bx, Tx = text.shape
    xs = p["emb"][text]                                    # (B, T, E)
    H = HID
    finals = None
    for l in range(NLAYERS):
        outs, finals = [], []
        for d in range(2):
            w_ih, w_hh, bb = p["w_ih"][l, d], p["w_hh"][l, d], p["b"][l, d]
            h = jnp.zeros((Bx, H), jnp.float32)
            c = jnp.zeros((Bx, H), jnp.float32)
            seq = [None] * Tx
            order = range(Tx) if d == 0 else range(Tx - 1, -1, -1)
            for t in order:
                g = xs[:, t, :] @ w_ih.T + h @ w_hh.T + bb
                i = jax.nn.sigmoid(g[:, :H])
                f = jax.nn.sigmoid(g[:, H:2 * H])
                gg = jnp.tanh(g[:, 2 * H:3 * H])
                o = jax.nn.sigmoid(g[:, 3 * H:])
                c = f * c + i * gg
                h = o * jnp.tanh(c)
                seq[t] = h
            outs.append(jnp.stack(seq, axis=1))
            finals.append(h)
        xs = jnp.concatenate(outs, axis=-1)                # (B, T, 2H)
    hidden_cat = jnp.concatenate(finals, axis=-1)          # (B, 2H)

    q = hidden_cat @ p["wq"].T + p["bq"]
    u = xs @ p["wu"].T + p["bu"]
    score = jnp.tanh(q[:, None, :] + u)
    logits = score @ p["v"]
    attn = jax.nn.softmax(logits, axis=1)
    context = jnp.sum(attn[..., None] * xs, axis=1)
    return context @ p["fcw"].T + p["fcb"]


# ------------------------------------ main ------------------------------------
if __name__ == "__main__":
    key = jax.random.PRNGKey(0)
    ks = jax.random.split(key, 12)

    def nrm(k, shape, scale=0.1):
        return scale * jax.random.normal(k, shape, jnp.float32)

    emb = nrm(ks[0], (VOCAB, EMB), 1.0)
    emb = emb.at[PAD_IDX].set(0.0)                         # padding_idx row zeroed
    params = {
        "emb": emb,
        "w_ih": nrm(ks[1], (NLAYERS, 2, 4 * HID, EMB)),    # EMB == 2*HID
        "w_hh": nrm(ks[2], (NLAYERS, 2, 4 * HID, HID)),
        "b":    nrm(ks[3], (NLAYERS, 2, 4 * HID)),         # b_ih + b_hh pre-summed
        "wq":   nrm(ks[4], (2 * HID, 2 * HID)),
        "bq":   nrm(ks[5], (2 * HID,)),
        "wu":   nrm(ks[6], (2 * HID, 2 * HID)),
        "bu":   nrm(ks[7], (2 * HID,)),
        "v":    nrm(ks[8], (2 * HID,), 1.0),
        "fcw":  nrm(ks[9], (OUT, 2 * HID)),
        "fcb":  nrm(ks[10], (OUT,)),
    }

    text = jax.random.randint(ks[11], (B, T), 0, VOCAB, dtype=jnp.int32)

    out = attn_bilstm_classifier(text, params)
    out = jax.block_until_ready(out)

    ref = jax.block_until_ready(reference_forward(text, params))
    np.testing.assert_allclose(np.asarray(out), np.asarray(ref),
                               rtol=2e-2, atol=2e-2)

    print("KERNEL_OK")
</pallas_src>

<mosaic_0001>
module attributes {stable_mosaic.version = 11 : i64} {
  func.func @_classifier_kernel(%arg0: memref<16x1xi32, #tpu.memory_space<vmem>>, %arg1: memref<64x64xf32, #tpu.memory_space<vmem>>, %arg2: memref<2x64x256xf32, #tpu.memory_space<vmem>>, %arg3: memref<2x64x256xf32, #tpu.memory_space<vmem>>, %arg4: memref<2x1x256xf32, #tpu.memory_space<vmem>>, %arg5: memref<64x64xf32, #tpu.memory_space<vmem>>, %arg6: memref<1x64xf32, #tpu.memory_space<vmem>>, %arg7: memref<64x64xf32, #tpu.memory_space<vmem>>, %arg8: memref<1x64xf32, #tpu.memory_space<vmem>>, %arg9: memref<1x64xf32, #tpu.memory_space<vmem>>, %arg10: memref<64x8xf32, #tpu.memory_space<vmem>>, %arg11: memref<1x8xf32, #tpu.memory_space<vmem>>, %arg12: memref<2x8xf32, #tpu.memory_space<vmem>>, %arg13: memref<16x32xf32, #tpu.memory_space<vmem>>, %arg14: memref<16x32xf32, #tpu.memory_space<vmem>>, %arg15: memref<16x32xf32, #tpu.memory_space<vmem>>, %arg16: memref<16x32xf32, #tpu.memory_space<vmem>>) attributes {dimension_semantics = [], scalar_prefetch = 0 : i64, scratch_operands = 4 : i64, tpu.core_type = #tpu.core_type<tc>} {
    %0 = tpu.iota {dimensions = array<i32: 1>} : vector<2x256xi32>
    %c64_i32 = arith.constant 64 : i32
    %c0_i32 = arith.constant 0 : i32
    %1 = arith.cmpi eq, %c64_i32, %c0_i32 : i32
    %c1_i32 = arith.constant 1 : i32
    %2 = arith.select %1, %c1_i32, %c64_i32 : i32
    %3 = vector.broadcast %2 : i32 to vector<2x256xi32>
    %4 = arith.remsi %0, %3 : vector<2x256xi32>
    %c0_i32_0 = arith.constant 0 : i32
    %5 = vector.broadcast %c0_i32_0 : i32 to vector<2x256xi32>
    %6 = arith.cmpi ne, %4, %5 : vector<2x256xi32>
    %c0_i32_1 = arith.constant 0 : i32
    %7 = vector.broadcast %c0_i32_1 : i32 to vector<2x256xi32>
    %8 = arith.cmpi slt, %4, %7 : vector<2x256xi32>
    %c0_i32_2 = arith.constant 0 : i32
    %9 = arith.cmpi slt, %2, %c0_i32_2 : i32
    %10 = vector.broadcast %9 : i1 to vector<2x256xi1>
    %11 = vector.broadcast %10 : vector<2x256xi1> to vector<2x256xi1>
    %12 = arith.xori %8, %11 : vector<2x256xi1>
    %13 = arith.andi %12, %6 : vector<2x256xi1>
    %14 = vector.broadcast %2 : i32 to vector<2x256xi32>
    %15 = arith.addi %4, %14 : vector<2x256xi32>
    %16 = arith.select %13, %15, %4 : vector<2x256xi1>, vector<2x256xi32>
    %c32_i32 = arith.constant 32 : i32
    %17 = vector.broadcast %c32_i32 : i32 to vector<2x256xi32>
    %18 = arith.cmpi slt, %16, %17 : vector<2x256xi32>
    %c0 = arith.constant 0 : index
    %c0_3 = arith.constant 0 : index
    %19 = vector.load %arg0[%c0, %c0_3] : memref<16x1xi32, #tpu.memory_space<vmem>>, vector<16x1xi32>
    %20 = tpu.iota {dimensions = array<i32: 1>} : vector<16x64xi32>
    %21 = vector.broadcast %19 : vector<16x1xi32> to vector<16x64xi32>
    %22 = arith.cmpi eq, %20, %21 : vector<16x64xi32>
    %23 = arith.extui %22 : vector<16x64xi1> to vector<16x64xi32>
    %24 = arith.sitofp %23 : vector<16x64xi32> to vector<16x64xf32>
    %c0_4 = arith.constant 0 : index
    %c0_5 = arith.constant 0 : index
    %25 = vector.load %arg1[%c0_4, %c0_5] : memref<64x64xf32, #tpu.memory_space<vmem>>, vector<64x64xf32>
    %cst = arith.constant dense<0.000000e+00> : vector<16x64xf32>
    %26 = tpu.matmul %24, %25, %cst {dimension_numbers = #tpu.dot_dimension_numbers<[1], [0], [0], [1], [0, 0, 1, 1], [], []>} : vector<16x64xf32>, vector<64x64xf32>, vector<16x64xf32> -> vector<16x64xf32>
    %c0_6 = arith.constant 0 : index
    %c0_7 = arith.constant 0 : index
    %c0_8 = arith.constant 0 : index
    %27 = vector.load %arg2[%c0_6, %c0_7, %c0_8] : memref<2x64x256xf32, #tpu.memory_space<vmem>>, vector<1x64x256xf32>
    %28 = vector.shape_cast %27 : vector<1x64x256xf32> to vector<64x256xf32>
    %cst_9 = arith.constant dense<0.000000e+00> : vector<16x256xf32>
    %29 = tpu.matmul %26, %28, %cst_9 {dimension_numbers = #tpu.dot_dimension_numbers<[1], [0], [0], [1], [0, 0, 1, 1], [], []>} : vector<16x64xf32>, vector<64x256xf32>, vector<16x256xf32> -> vector<16x256xf32>
    %c0_10 = arith.constant 0 : index
    %c0_11 = arith.constant 0 : index
    %c0_12 = arith.constant 0 : index
    %30 = vector.load %arg4[%c0_10, %c0_11, %c0_12] : memref<2x1x256xf32, #tpu.memory_space<vmem>>, vector<1x1x256xf32>
    %31 = vector.shape_cast %30 : vector<1x1x256xf32> to vector<1x256xf32>
    %32 = vector.broadcast %31 : vector<1x256xf32> to vector<16x256xf32>
    %33 = arith.addf %29, %32 : vector<16x256xf32>
    %c0_13 = arith.constant 0 : index
    %c0_14 = arith.constant 0 : index
    %c0_15 = arith.constant 0 : index
    %34 = vector.load %arg3[%c0_13, %c0_14, %c0_15] : memref<2x64x256xf32, #tpu.memory_space<vmem>>, vector<1x64x256xf32>
    %35 = vector.shape_cast %34 : vector<1x64x256xf32> to vector<64x256xf32>
    %cst_16 = arith.constant 0.000000e+00 : f32
    %36 = vector.broadcast %cst_16 : f32 to vector<2x64xf32>
    %cst_17 = arith.constant 0.000000e+00 : f32
    %37 = vector.broadcast %cst_17 : f32 to vector<2x64xf32>
    %38 = vector.extract_strided_slice %33 {offsets = [0, 0], sizes = [2, 256], strides = [1, 1]} : vector<16x256xf32> to vector<2x256xf32>
    %39 = vector.extract_strided_slice %33 {offsets = [14, 0], sizes = [2, 256], strides = [1, 1]} : vector<16x256xf32> to vector<2x256xf32>
    %40 = arith.select %18, %38, %39 : vector<2x256xi1>, vector<2x256xf32>
    %cst_18 = arith.constant dense<0.000000e+00> : vector<2x256xf32>
    %41 = tpu.matmul %36, %35, %cst_18 {dimension_numbers = #tpu.dot_dimension_numbers<[1], [0], [0], [1], [0, 0, 1, 1], [], []>} : vector<2x64xf32>, vector<64x256xf32>, vector<2x256xf32> -> vector<2x256xf32>
    %42 = arith.addf %40, %41 : vector<2x256xf32>
    %43 = arith.negf %42 : vector<2x256xf32>
    %44 = math.exp %43 : vector<2x256xf32>
    %cst_19 = arith.constant 1.000000e+00 : f32
    %45 = vector.broadcast %cst_19 : f32 to vector<2x256xf32>
    %46 = arith.addf %45, %44 : vector<2x256xf32>
    %47 = arith.divf %45, %46 : vector<2x256xf32>
    %48 = math.tanh %42 : vector<2x256xf32>
    %49 = vector.extract_strided_slice %47 {offsets = [0, 0], sizes = [2, 64], strides = [1, 1]} : vector<2x256xf32> to vector<2x64xf32>
    %50 = vector.extract_strided_slice %47 {offsets = [0, 64], sizes = [2, 64], strides = [1, 1]} : vector<2x256xf32> to vector<2x64xf32>
    %51 = vector.extract_strided_slice %48 {offsets = [0, 128], sizes = [2, 64], strides = [1, 1]} : vector<2x256xf32> to vector<2x64xf32>
    %52 = vector.extract_strided_slice %47 {offsets = [0, 192], sizes = [2, 64], strides = [1, 1]} : vector<2x256xf32> to vector<2x64xf32>
    %53 = arith.mulf %50, %37 : vector<2x64xf32>
    %54 = arith.mulf %49, %51 : vector<2x64xf32>
    %55 = arith.addf %53, %54 : vector<2x64xf32>
    %56 = math.tanh %55 : vector<2x64xf32>
    %57 = arith.mulf %52, %56 : vector<2x64xf32>
    %58 = vector.extract_strided_slice %57 {offsets = [0, 0], sizes = [2, 32], strides = [1, 1]} : vector<2x64xf32> to vector<2x32xf32>
    %c0_20 = arith.constant 0 : index
    %c0_21 = arith.constant 0 : index
    %59 = vector.load %arg13[%c0_20, %c0_21] : memref<16x32xf32, #tpu.memory_space<vmem>>, vector<2x32xf32>
    tpu.vector_store %arg13[%c0_20, %c0_21], %58 {strides = array<i32>} : memref<16x32xf32, #tpu.memory_space<vmem>>, vector<2x32xf32>,
    %60 = vector.extract_strided_slice %57 {offsets = [0, 32], sizes = [2, 32], strides = [1, 1]} : vector<2x64xf32> to vector<2x32xf32>
    %c14 = arith.constant 14 : index
    %c0_22 = arith.constant 0 : index
    %61 = vector.load %arg14[%c14, %c0_22] : memref<16x32xf32, #tpu.memory_space<vmem>>, vector<2x32xf32>
    tpu.vector_store %arg14[%c14, %c0_22], %60 {strides = array<i32>} : memref<16x32xf32, #tpu.memory_space<vmem>>, vector<2x32xf32>,
    %62 = vector.extract_strided_slice %33 {offsets = [2, 0], sizes = [2, 256], strides = [1, 1]} : vector<16x256xf32> to vector<2x256xf32>
    %63 = vector.extract_strided_slice %33 {offsets = [12, 0], sizes = [2, 256], strides = [1, 1]} : vector<16x256xf32> to vector<2x256xf32>
    %64 = arith.select %18, %62, %63 : vector<2x256xi1>, vector<2x256xf32>
    %cst_23 = arith.constant dense<0.000000e+00> : vector<2x256xf32>
    %65 = tpu.matmul %57, %35, %cst_23 {dimension_numbers = #tpu.dot_dimension_numbers<[1], [0], [0], [1], [0, 0, 1, 1], [], []>} : vector<2x64xf32>, vector<64x256xf32>, vector<2x256xf32> -> vector<2x256xf32>
    %66 = arith.addf %64, %65 : vector<2x256xf32>
    %67 = arith.negf %66 : vector<2x256xf32>
    %68 = math.exp %67 : vector<2x256xf32>
    %cst_24 = arith.constant 1.000000e+00 : f32
    %69 = vector.broadcast %cst_24 : f32 to vector<2x256xf32>
    %70 = arith.addf %69, %68 : vector<2x256xf32>
    %71 = arith.divf %69, %70 : vector<2x256xf32>
    %72 = math.tanh %66 : vector<2x256xf32>
    %73 = vector.extract_strided_slice %71 {offsets = [0, 0], sizes = [2, 64], strides = [1, 1]} : vector<2x256xf32> to vector<2x64xf32>
    %74 = vector.extract_strided_slice %71 {offsets = [0, 64], sizes = [2, 64], strides = [1, 1]} : vector<2x256xf32> to vector<2x64xf32>
    %75 = vector.extract_strided_slice %72 {offsets = [0, 128], sizes = [2, 64], strides = [1, 1]} : vector<2x256xf32> to vector<2x64xf32>
    %76 = vector.extract_strided_slice %71 {offsets = [0, 192], sizes = [2, 64], strides = [1, 1]} : vector<2x256xf32> to vector<2x64xf32>
    %77 = arith.mulf %74, %55 : vector<2x64xf32>
    %78 = arith.mulf %73, %75 : vector<2x64xf32>
    %79 = arith.addf %77, %78 : vector<2x64xf32>
    %80 = math.tanh %79 : vector<2x64xf32>
    %81 = arith.mulf %76, %80 : vector<2x64xf32>
    %82 = vector.extract_strided_slice %81 {offsets = [0, 0], sizes = [2, 32], strides = [1, 1]} : vector<2x64xf32> to vector<2x32xf32>
    %c2 = arith.constant 2 : index
    %c0_25 = arith.constant 0 : index
    %83 = vector.load %arg13[%c2, %c0_25] : memref<16x32xf32, #tpu.memory_space<vmem>>, vector<2x32xf32>
    tpu.vector_store %arg13[%c2, %c0_25], %82 {strides = array<i32>} : memref<16x32xf32, #tpu.memory_space<vmem>>, vector<2x32xf32>,
    %84 = vector.extract_strided_slice %81 {offsets = [0, 32], sizes = [2, 32], strides = [1, 1]} : vector<2x64xf32> to vector<2x32xf32>
    %c12 = arith.constant 12 : index
    %c0_26 = arith.constant 0 : index
    %85 = vector.load %arg14[%c12, %c0_26] : memref<16x32xf32, #tpu.memory_space<vmem>>, vector<2x32xf32>
    tpu.vector_store %arg14[%c12, %c0_26], %84 {strides = array<i32>} : memref<16x32xf32, #tpu.memory_space<vmem>>, vector<2x32xf32>,
    %86 = vector.extract_strided_slice %33 {offsets = [4, 0], sizes = [2, 256], strides = [1, 1]} : vector<16x256xf32> to vector<2x256xf32>
    %87 = vector.extract_strided_slice %33 {offsets = [10, 0], sizes = [2, 256], strides = [1, 1]} : vector<16x256xf32> to vector<2x256xf32>
    %88 = arith.select %18, %86, %87 : vector<2x256xi1>, vector<2x256xf32>
    %cst_27 = arith.constant dense<0.000000e+00> : vector<2x256xf32>
    %89 = tpu.matmul %81, %35, %cst_27 {dimension_numbers = #tpu.dot_dimension_numbers<[1], [0], [0], [1], [0, 0, 1, 1], [], []>} : vector<2x64xf32>, vector<64x256xf32>, vector<2x256xf32> -> vector<2x256xf32>
    %90 = arith.addf %88, %89 : vector<2x256xf32>
    %91 = arith.negf %90 : vector<2x256xf32>
    %92 = math.exp %91 : vector<2x256xf32>
    %cst_28 = arith.constant 1.000000e+00 : f32
    %93 = vector.broadcast %cst_28 : f32 to vector<2x256xf32>
    %94 = arith.addf %93, %92 : vector<2x256xf32>
    %95 = arith.divf %93, %94 : vector<2x256xf32>
    %96 = math.tanh %90 : vector<2x256xf32>
    %97 = vector.extract_strided_slice %95 {offsets = [0, 0], sizes = [2, 64], strides = [1, 1]} : vector<2x256xf32> to vector<2x64xf32>
    %98 = vector.extract_strided_slice %95 {offsets = [0, 64], sizes = [2, 64], strides = [1, 1]} : vector<2x256xf32> to vector<2x64xf32>
    %99 = vector.extract_strided_slice %96 {offsets = [0, 128], sizes = [2, 64], strides = [1, 1]} : vector<2x256xf32> to vector<2x64xf32>
    %100 = vector.extract_strided_slice %95 {offsets = [0, 192], sizes = [2, 64], strides = [1, 1]} : vector<2x256xf32> to vector<2x64xf32>
    %101 = arith.mulf %98, %79 : vector<2x64xf32>
    %102 = arith.mulf %97, %99 : vector<2x64xf32>
    %103 = arith.addf %101, %102 : vector<2x64xf32>
    %104 = math.tanh %103 : vector<2x64xf32>
    %105 = arith.mulf %100, %104 : vector<2x64xf32>
    %106 = vector.extract_strided_slice %105 {offsets = [0, 0], sizes = [2, 32], strides = [1, 1]} : vector<2x64xf32> to vector<2x32xf32>
    %c4 = arith.constant 4 : index
    %c0_29 = arith.constant 0 : index
    %107 = vector.load %arg13[%c4, %c0_29] : memref<16x32xf32, #tpu.memory_space<vmem>>, vector<2x32xf32>
    tpu.vector_store %arg13[%c4, %c0_29], %106 {strides = array<i32>} : memref<16x32xf32, #tpu.memory_space<vmem>>, vector<2x32xf32>,
    %108 = vector.extract_strided_slice %105 {offsets = [0, 32], sizes = [2, 32], strides = [1, 1]} : vector<2x64xf32> to vector<2x32xf32>
    %c10 = arith.constant 10 : index
    %c0_30 = arith.constant 0 : index
    %109 = vector.load %arg14[%c10, %c0_30] : memref<16x32xf32, #tpu.memory_space<vmem>>, vector<2x32xf32>
    tpu.vector_store %arg14[%c10, %c0_30], %108 {strides = array<i32>} : memref<16x32xf32, #tpu.memory_space<vmem>>, vector<2x32xf32>,
    %110 = vector.extract_strided_slice %33 {offsets = [6, 0], sizes = [2, 256], strides = [1, 1]} : vector<16x256xf32> to vector<2x256xf32>
    %111 = vector.extract_strided_slice %33 {offsets = [8, 0], sizes = [2, 256], strides = [1, 1]} : vector<16x256xf32> to vector<2x256xf32>
    %112 = arith.select %18, %110, %111 : vector<2x256xi1>, vector<2x256xf32>
    %cst_31 = arith.constant dense<0.000000e+00> : vector<2x256xf32>
    %113 = tpu.matmul %105, %35, %cst_31 {dimension_numbers = #tpu.dot_dimension_numbers<[1], [0], [0], [1], [0, 0, 1, 1], [], []>} : vector<2x64xf32>, vector<64x256xf32>, vector<2x256xf32> -> vector<2x256xf32>
    %114 = arith.addf %112, %113 : vector<2x256xf32>
    %115 = arith.negf %114 : vector<2x256xf32>
    %116 = math.exp %115 : vector<2x256xf32>
    %cst_32 = arith.constant 1.000000e+00 : f32
    %117 = vector.broadcast %cst_32 : f32 to vector<2x256xf32>
    %118 = arith.addf %117, %116 : vector<2x256xf32>
    %119 = arith.divf %117, %118 : vector<2x256xf32>
    %120 = math.tanh %114 : vector<2x256xf32>
    %121 = vector.extract_strided_slice %119 {offsets = [0, 0], sizes = [2, 64], strides = [1, 1]} : vector<2x256xf32> to vector<2x64xf32>
    %122 = vector.extract_strided_slice %119 {offsets = [0, 64], sizes = [2, 64], strides = [1, 1]} : vector<2x256xf32> to vector<2x64xf32>
    %123 = vector.extract_strided_slice %120 {offsets = [0, 128], sizes = [2, 64], strides = [1, 1]} : vector<2x256xf32> to vector<2x64xf32>
    %124 = vector.extract_strided_slice %119 {offsets = [0, 192], sizes = [2, 64], strides = [1, 1]} : vector<2x256xf32> to vector<2x64xf32>
    %125 = arith.mulf %122, %103 : vector<2x64xf32>
    %126 = arith.mulf %121, %123 : vector<2x64xf32>
    %127 = arith.addf %125, %126 : vector<2x64xf32>
    %128 = math.tanh %127 : vector<2x64xf32>
    %129 = arith.mulf %124, %128 : vector<2x64xf32>
    %130 = vector.extract_strided_slice %129 {offsets = [0, 0], sizes = [2, 32], strides = [1, 1]} : vector<2x64xf32> to vector<2x32xf32>
    %c6 = arith.constant 6 : index
    %c0_33 = arith.constant 0 : index
    %131 = vector.load %arg13[%c6, %c0_33] : memref<16x32xf32, #tpu.memory_space<vmem>>, vector<2x32xf32>
    tpu.vector_store %arg13[%c6, %c0_33], %130 {strides = array<i32>} : memref<16x32xf32, #tpu.memory_space<vmem>>, vector<2x32xf32>,
    %132 = vector.extract_strided_slice %129 {offsets = [0, 32], sizes = [2, 32], strides = [1, 1]} : vector<2x64xf32> to vector<2x32xf32>
    %c8 = arith.constant 8 : index
    %c0_34 = arith.constant 0 : index
    %133 = vector.load %arg14[%c8, %c0_34] : memref<16x32xf32, #tpu.memory_space<vmem>>, vector<2x32xf32>
    tpu.vector_store %arg14[%c8, %c0_34], %132 {strides = array<i32>} : memref<16x32xf32, #tpu.memory_space<vmem>>, vector<2x32xf32>,
    %134 = vector.extract_strided_slice %33 {offsets = [8, 0], sizes = [2, 256], strides = [1, 1]} : vector<16x256xf32> to vector<2x256xf32>
    %135 = vector.extract_strided_slice %33 {offsets = [6, 0], sizes = [2, 256], strides = [1, 1]} : vector<16x256xf32> to vector<2x256xf32>
    %136 = arith.select %18, %134, %135 : vector<2x256xi1>, vector<2x256xf32>
    %cst_35 = arith.constant dense<0.000000e+00> : vector<2x256xf32>
    %137 = tpu.matmul %129, %35, %cst_35 {dimension_numbers = #tpu.dot_dimension_numbers<[1], [0], [0], [1], [0, 0, 1, 1], [], []>} : vector<2x64xf32>, vector<64x256xf32>, vector<2x256xf32> -> vector<2x256xf32>
    %138 = arith.addf %136, %137 : vector<2x256xf32>
    %139 = arith.negf %138 : vector<2x256xf32>
    %140 = math.exp %139 : vector<2x256xf32>
    %cst_36 = arith.constant 1.000000e+00 : f32
    %141 = vector.broadcast %cst_36 : f32 to vector<2x256xf32>
    %142 = arith.addf %141, %140 : vector<2x256xf32>
    %143 = arith.divf %141, %142 : vector<2x256xf32>
    %144 = math.tanh %138 : vector<2x256xf32>
    %145 = vector.extract_strided_slice %143 {offsets = [0, 0], sizes = [2, 64], strides = [1, 1]} : vector<2x256xf32> to vector<2x64xf32>
    %146 = vector.extract_strided_slice %143 {offsets = [0, 64], sizes = [2, 64], strides = [1, 1]} : vector<2x256xf32> to vector<2x64xf32>
    %147 = vector.extract_strided_slice %144 {offsets = [0, 128], sizes = [2, 64], strides = [1, 1]} : vector<2x256xf32> to vector<2x64xf32>
    %148 = vector.extract_strided_slice %143 {offsets = [0, 192], sizes = [2, 64], strides = [1, 1]} : vector<2x256xf32> to vector<2x64xf32>
    %149 = arith.mulf %146, %127 : vector<2x64xf32>
    %150 = arith.mulf %145, %147 : vector<2x64xf32>
    %151 = arith.addf %149, %150 : vector<2x64xf32>
    %152 = math.tanh %151 : vector<2x64xf32>
    %153 = arith.mulf %148, %152 : vector<2x64xf32>
    %154 = vector.extract_strided_slice %153 {offsets = [0, 0], sizes = [2, 32], strides = [1, 1]} : vector<2x64xf32> to vector<2x32xf32>
    %c8_37 = arith.constant 8 : index
    %c0_38 = arith.constant 0 : index
    %155 = vector.load %arg13[%c8_37, %c0_38] : memref<16x32xf32, #tpu.memory_space<vmem>>, vector<2x32xf32>
    tpu.vector_store %arg13[%c8_37, %c0_38], %154 {strides = array<i32>} : memref<16x32xf32, #tpu.memory_space<vmem>>, vector<2x32xf32>,
    %156 = vector.extract_strided_slice %153 {offsets = [0, 32], sizes = [2, 32], strides = [1, 1]} : vector<2x64xf32> to vector<2x32xf32>
    %c6_39 = arith.constant 6 : index
    %c0_40 = arith.constant 0 : index
    %157 = vector.load %arg14[%c6_39, %c0_40] : memref<16x32xf32, #tpu.memory_space<vmem>>, vector<2x32xf32>
    tpu.vector_store %arg14[%c6_39, %c0_40], %156 {strides = array<i32>} : memref<16x32xf32, #tpu.memory_space<vmem>>, vector<2x32xf32>,
    %158 = vector.extract_strided_slice %33 {offsets = [10, 0], sizes = [2, 256], strides = [1, 1]} : vector<16x256xf32> to vector<2x256xf32>
    %159 = vector.extract_strided_slice %33 {offsets = [4, 0], sizes = [2, 256], strides = [1, 1]} : vector<16x256xf32> to vector<2x256xf32>
    %160 = arith.select %18, %158, %159 : vector<2x256xi1>, vector<2x256xf32>
    %cst_41 = arith.constant dense<0.000000e+00> : vector<2x256xf32>
    %161 = tpu.matmul %153, %35, %cst_41 {dimension_numbers = #tpu.dot_dimension_numbers<[1], [0], [0], [1], [0, 0, 1, 1], [], []>} : vector<2x64xf32>, vector<64x256xf32>, vector<2x256xf32> -> vector<2x256xf32>
    %162 = arith.addf %160, %161 : vector<2x256xf32>
    %163 = arith.negf %162 : vector<2x256xf32>
    %164 = math.exp %163 : vector<2x256xf32>
    %cst_42 = arith.constant 1.000000e+00 : f32
    %165 = vector.broadcast %cst_42 : f32 to vector<2x256xf32>
    %166 = arith.addf %165, %164 : vector<2x256xf32>
    %167 = arith.divf %165, %166 : vector<2x256xf32>
    %168 = math.tanh %162 : vector<2x256xf32>
    %169 = vector.extract_strided_slice %167 {offsets = [0, 0], sizes = [2, 64], strides = [1, 1]} : vector<2x256xf32> to vector<2x64xf32>
    %170 = vector.extract_strided_slice %167 {offsets = [0, 64], sizes = [2, 64], strides = [1, 1]} : vector<2x256xf32> to vector<2x64xf32>
    %171 = vector.extract_strided_slice %168 {offsets = [0, 128], sizes = [2, 64], strides = [1, 1]} : vector<2x256xf32> to vector<2x64xf32>
    %172 = vector.extract_strided_slice %167 {offsets = [0, 192], sizes = [2, 64], strides = [1, 1]} : vector<2x256xf32> to vector<2x64xf32>
    %173 = arith.mulf %170, %151 : vector<2x64xf32>
    %174 = arith.mulf %169, %171 : vector<2x64xf32>
    %175 = arith.addf %173, %174 : vector<2x64xf32>
    %176 = math.tanh %175 : vector<2x64xf32>
    %177 = arith.mulf %172, %176 : vector<2x64xf32>
    %178 = vector.extract_strided_slice %177 {offsets = [0, 0], sizes = [2, 32], strides = [1, 1]} : vector<2x64xf32> to vector<2x32xf32>
    %c10_43 = arith.constant 10 : index
    %c0_44 = arith.constant 0 : index
    %179 = vector.load %arg13[%c10_43, %c0_44] : memref<16x32xf32, #tpu.memory_space<vmem>>, vector<2x32xf32>
    tpu.vector_store %arg13[%c10_43, %c0_44], %178 {strides = array<i32>} : memref<16x32xf32, #tpu.memory_space<vmem>>, vector<2x32xf32>,
    %180 = vector.extract_strided_slice %177 {offsets = [0, 32], sizes = [2, 32], strides = [1, 1]} : vector<2x64xf32> to vector<2x32xf32>
    %c4_45 = arith.constant 4 : index
    %c0_46 = arith.constant 0 : index
    %181 = vector.load %arg14[%c4_45, %c0_46] : memref<16x32xf32, #tpu.memory_space<vmem>>, vector<2x32xf32>
    tpu.vector_store %arg14[%c4_45, %c0_46], %180 {strides = array<i32>} : memref<16x32xf32, #tpu.memory_space<vmem>>, vector<2x32xf32>,
    %182 = vector.extract_strided_slice %33 {offsets = [12, 0], sizes = [2, 256], strides = [1, 1]} : vector<16x256xf32> to vector<2x256xf32>
    %183 = vector.extract_strided_slice %33 {offsets = [2, 0], sizes = [2, 256], strides = [1, 1]} : vector<16x256xf32> to vector<2x256xf32>
    %184 = arith.select %18, %182, %183 : vector<2x256xi1>, vector<2x256xf32>
    %cst_47 = arith.constant dense<0.000000e+00> : vector<2x256xf32>
    %185 = tpu.matmul %177, %35, %cst_47 {dimension_numbers = #tpu.dot_dimension_numbers<[1], [0], [0], [1], [0, 0, 1, 1], [], []>} : vector<2x64xf32>, vector<64x256xf32>, vector<2x256xf32> -> vector<2x256xf32>
    %186 = arith.addf %184, %185 : vector<2x256xf32>
    %187 = arith.negf %186 : vector<2x256xf32>
    %188 = math.exp %187 : vector<2x256xf32>
    %cst_48 = arith.constant 1.000000e+00 : f32
    %189 = vector.broadcast %cst_48 : f32 to vector<2x256xf32>
    %190 = arith.addf %189, %188 : vector<2x256xf32>
    %191 = arith.divf %189, %190 : vector<2x256xf32>
    %192 = math.tanh %186 : vector<2x256xf32>
    %193 = vector.extract_strided_slice %191 {offsets = [0, 0], sizes = [2, 64], strides = [1, 1]} : vector<2x256xf32> to vector<2x64xf32>
    %194 = vector.extract_strided_slice %191 {offsets = [0, 64], sizes = [2, 64], strides = [1, 1]} : vector<2x256xf32> to vector<2x64xf32>
    %195 = vector.extract_strided_slice %192 {offsets = [0, 128], sizes = [2, 64], strides = [1, 1]} : vector<2x256xf32> to vector<2x64xf32>
    %196 = vector.extract_strided_slice %191 {offsets = [0, 192], sizes = [2, 64], strides = [1, 1]} : vector<2x256xf32> to vector<2x64xf32>
    %197 = arith.mulf %194, %175 : vector<2x64xf32>
    %198 = arith.mulf %193, %195 : vector<2x64xf32>
    %199 = arith.addf %197, %198 : vector<2x64xf32>
    %200 = math.tanh %199 : vector<2x64xf32>
    %201 = arith.mulf %196, %200 : vector<2x64xf32>
    %202 = vector.extract_strided_slice %201 {offsets = [0, 0], sizes = [2, 32], strides = [1, 1]} : vector<2x64xf32> to vector<2x32xf32>
    %c12_49 = arith.constant 12 : index
    %c0_50 = arith.constant 0 : index
    %203 = vector.load %arg13[%c12_49, %c0_50] : memref<16x32xf32, #tpu.memory_space<vmem>>, vector<2x32xf32>
    tpu.vector_store %arg13[%c12_49, %c0_50], %202 {strides = array<i32>} : memref<16x32xf32, #tpu.memory_space<vmem>>, vector<2x32xf32>,
    %204 = vector.extract_strided_slice %201 {offsets = [0, 32], sizes = [2, 32], strides = [1, 1]} : vector<2x64xf32> to vector<2x32xf32>
    %c2_51 = arith.constant 2 : index
    %c0_52 = arith.constant 0 : index
    %205 = vector.load %arg14[%c2_51, %c0_52] : memref<16x32xf32, #tpu.memory_space<vmem>>, vector<2x32xf32>
    tpu.vector_store %arg14[%c2_51, %c0_52], %204 {strides = array<i32>} : memref<16x32xf32, #tpu.memory_space<vmem>>, vector<2x32xf32>,
    %206 = vector.extract_strided_slice %33 {offsets = [14, 0], sizes = [2, 256], strides = [1, 1]} : vector<16x256xf32> to vector<2x256xf32>
    %207 = vector.extract_strided_slice %33 {offsets = [0, 0], sizes = [2, 256], strides = [1, 1]} : vector<16x256xf32> to vector<2x256xf32>
    %208 = arith.select %18, %206, %207 : vector<2x256xi1>, vector<2x256xf32>
    %cst_53 = arith.constant dense<0.000000e+00> : vector<2x256xf32>
    %209 = tpu.matmul %201, %35, %cst_53 {dimension_numbers = #tpu.dot_dimension_numbers<[1], [0], [0], [1], [0, 0, 1, 1], [], []>} : vector<2x64xf32>, vector<64x256xf32>, vector<2x256xf32> -> vector<2x256xf32>
    %210 = arith.addf %208, %209 : vector<2x256xf32>
    %211 = arith.negf %210 : vector<2x256xf32>
    %212 = math.exp %211 : vector<2x256xf32>
    %cst_54 = arith.constant 1.000000e+00 : f32
    %213 = vector.broadcast %cst_54 : f32 to vector<2x256xf32>
    %214 = arith.addf %213, %212 : vector<2x256xf32>
    %215 = arith.divf %213, %214 : vector<2x256xf32>
    %216 = math.tanh %210 : vector<2x256xf32>
    %217 = vector.extract_strided_slice %215 {offsets = [0, 0], sizes = [2, 64], strides = [1, 1]} : vector<2x256xf32> to vector<2x64xf32>
    %218 = vector.extract_strided_slice %215 {offsets = [0, 64], sizes = [2, 64], strides = [1, 1]} : vector<2x256xf32> to vector<2x64xf32>
    %219 = vector.extract_strided_slice %216 {offsets = [0, 128], sizes = [2, 64], strides = [1, 1]} : vector<2x256xf32> to vector<2x64xf32>
    %220 = vector.extract_strided_slice %215 {offsets = [0, 192], sizes = [2, 64], strides = [1, 1]} : vector<2x256xf32> to vector<2x64xf32>
    %221 = arith.mulf %218, %199 : vector<2x64xf32>
    %222 = arith.mulf %217, %219 : vector<2x64xf32>
    %223 = arith.addf %221, %222 : vector<2x64xf32>
    %224 = math.tanh %223 : vector<2x64xf32>
    %225 = arith.mulf %220, %224 : vector<2x64xf32>
    %226 = vector.extract_strided_slice %225 {offsets = [0, 0], sizes = [2, 32], strides = [1, 1]} : vector<2x64xf32> to vector<2x32xf32>
    %c14_55 = arith.constant 14 : index
    %c0_56 = arith.constant 0 : index
    %227 = vector.load %arg13[%c14_55, %c0_56] : memref<16x32xf32, #tpu.memory_space<vmem>>, vector<2x32xf32>
    tpu.vector_store %arg13[%c14_55, %c0_56], %226 {strides = array<i32>} : memref<16x32xf32, #tpu.memory_space<vmem>>, vector<2x32xf32>,
    %228 = vector.extract_strided_slice %225 {offsets = [0, 32], sizes = [2, 32], strides = [1, 1]} : vector<2x64xf32> to vector<2x32xf32>
    %c0_57 = arith.constant 0 : index
    %c0_58 = arith.constant 0 : index
    %229 = vector.load %arg14[%c0_57, %c0_58] : memref<16x32xf32, #tpu.memory_space<vmem>>, vector<2x32xf32>
    tpu.vector_store %arg14[%c0_57, %c0_58], %228 {strides = array<i32>} : memref<16x32xf32, #tpu.memory_space<vmem>>, vector<2x32xf32>,
    %c1 = arith.constant 1 : index
    %c0_59 = arith.constant 0 : index
    %c0_60 = arith.constant 0 : index
    %230 = vector.load %arg2[%c1, %c0_59, %c0_60] : memref<2x64x256xf32, #tpu.memory_space<vmem>>, vector<1x64x256xf32>
    %231 = vector.shape_cast %230 : vector<1x64x256xf32> to vector<64x256xf32>
    %c0_61 = arith.constant 0 : index
    %c0_62 = arith.constant 0 : index
    %232 = vector.load %arg13[%c0_61, %c0_62] : memref<16x32xf32, #tpu.memory_space<vmem>>, vector<16x32xf32>
    %233 = vector.extract_strided_slice %231 {offsets = [0, 0], sizes = [32, 256], strides = [1, 1]} : vector<64x256xf32> to vector<32x256xf32>
    %cst_63 = arith.constant dense<0.000000e+00> : vector<16x256xf32>
    %234 = tpu.matmul %232, %233, %cst_63 {dimension_numbers = #tpu.dot_dimension_numbers<[1], [0], [0], [1], [0, 0, 1, 1], [], []>} : vector<16x32xf32>, vector<32x256xf32>, vector<16x256xf32> -> vector<16x256xf32>
    %c0_64 = arith.constant 0 : index
    %c0_65 = arith.constant 0 : index
    %235 = vector.load %arg14[%c0_64, %c0_65] : memref<16x32xf32, #tpu.memory_space<vmem>>, vector<16x32xf32>
    %236 = vector.extract_strided_slice %231 {offsets = [32, 0], sizes = [32, 256], strides = [1, 1]} : vector<64x256xf32> to vector<32x256xf32>
    %cst_66 = arith.constant dense<0.000000e+00> : vector<16x256xf32>
    %237 = tpu.matmul %235, %236, %cst_66 {dimension_numbers = #tpu.dot_dimension_numbers<[1], [0], [0], [1], [0, 0, 1, 1], [], []>} : vector<16x32xf32>, vector<32x256xf32>, vector<16x256xf32> -> vector<16x256xf32>
    %238 = arith.addf %234, %237 : vector<16x256xf32>
    %c1_67 = arith.constant 1 : index
    %c0_68 = arith.constant 0 : index
    %c0_69 = arith.constant 0 : index
    %239 = vector.load %arg4[%c1_67, %c0_68, %c0_69] : memref<2x1x256xf32, #tpu.memory_space<vmem>>, vector<1x1x256xf32>
    %240 = vector.shape_cast %239 : vector<1x1x256xf32> to vector<1x256xf32>
    %241 = vector.broadcast %240 : vector<1x256xf32> to vector<16x256xf32>
    %242 = arith.addf %238, %241 : vector<16x256xf32>
    %c1_70 = arith.constant 1 : index
    %c0_71 = arith.constant 0 : index
    %c0_72 = arith.constant 0 : index
    %243 = vector.load %arg3[%c1_70, %c0_71, %c0_72] : memref<2x64x256xf32, #tpu.memory_space<vmem>>, vector<1x64x256xf32>
    %244 = vector.shape_cast %243 : vector<1x64x256xf32> to vector<64x256xf32>
    %cst_73 = arith.constant 0.000000e+00 : f32
    %245 = vector.broadcast %cst_73 : f32 to vector<2x64xf32>
    %cst_74 = arith.constant 0.000000e+00 : f32
    %246 = vector.broadcast %cst_74 : f32 to vector<2x64xf32>
    %247 = vector.extract_strided_slice %242 {offsets = [0, 0], sizes = [2, 256], strides = [1, 1]} : vector<16x256xf32> to vector<2x256xf32>
    %248 = vector.extract_strided_slice %242 {offsets = [14, 0], sizes = [2, 256], strides = [1, 1]} : vector<16x256xf32> to vector<2x256xf32>
    %249 = arith.select %18, %247, %248 : vector<2x256xi1>, vector<2x256xf32>
    %cst_75 = arith.constant dense<0.000000e+00> : vector<2x256xf32>
    %250 = tpu.matmul %245, %244, %cst_75 {dimension_numbers = #tpu.dot_dimension_numbers<[1], [0], [0], [1], [0, 0, 1, 1], [], []>} : vector<2x64xf32>, vector<64x256xf32>, vector<2x256xf32> -> vector<2x256xf32>
    %251 = arith.addf %249, %250 : vector<2x256xf32>
    %252 = arith.negf %251 : vector<2x256xf32>
    %253 = math.exp %252 : vector<2x256xf32>
    %cst_76 = arith.constant 1.000000e+00 : f32
    %254 = vector.broadcast %cst_76 : f32 to vector<2x256xf32>
    %255 = arith.addf %254, %253 : vector<2x256xf32>
    %256 = arith.divf %254, %255 : vector<2x256xf32>
    %257 = math.tanh %251 : vector<2x256xf32>
    %258 = vector.extract_strided_slice %256 {offsets = [0, 0], sizes = [2, 64], strides = [1, 1]} : vector<2x256xf32> to vector<2x64xf32>
    %259 = vector.extract_strided_slice %256 {offsets = [0, 64], sizes = [2, 64], strides = [1, 1]} : vector<2x256xf32> to vector<2x64xf32>
    %260 = vector.extract_strided_slice %257 {offsets = [0, 128], sizes = [2, 64], strides = [1, 1]} : vector<2x256xf32> to vector<2x64xf32>
    %261 = vector.extract_strided_slice %256 {offsets = [0, 192], sizes = [2, 64], strides = [1, 1]} : vector<2x256xf32> to vector<2x64xf32>
    %262 = arith.mulf %259, %246 : vector<2x64xf32>
    %263 = arith.mulf %258, %260 : vector<2x64xf32>
    %264 = arith.addf %262, %263 : vector<2x64xf32>
    %265 = math.tanh %264 : vector<2x64xf32>
    %266 = arith.mulf %261, %265 : vector<2x64xf32>
    %267 = vector.extract_strided_slice %266 {offsets = [0, 0], sizes = [2, 32], strides = [1, 1]} : vector<2x64xf32> to vector<2x32xf32>
    %c0_77 = arith.constant 0 : index
    %c0_78 = arith.constant 0 : index
    %268 = vector.load %arg15[%c0_77, %c0_78] : memref<16x32xf32, #tpu.memory_space<vmem>>, vector<2x32xf32>
    tpu.vector_store %arg15[%c0_77, %c0_78], %267 {strides = array<i32>} : memref<16x32xf32, #tpu.memory_space<vmem>>, vector<2x32xf32>,
    %269 = vector.extract_strided_slice %266 {offsets = [0, 32], sizes = [2, 32], strides = [1, 1]} : vector<2x64xf32> to vector<2x32xf32>
    %c14_79 = arith.constant 14 : index
    %c0_80 = arith.constant 0 : index
    %270 = vector.load %arg16[%c14_79, %c0_80] : memref<16x32xf32, #tpu.memory_space<vmem>>, vector<2x32xf32>
    tpu.vector_store %arg16[%c14_79, %c0_80], %269 {strides = array<i32>} : memref<16x32xf32, #tpu.memory_space<vmem>>, vector<2x32xf32>,
    %271 = vector.extract_strided_slice %242 {offsets = [2, 0], sizes = [2, 256], strides = [1, 1]} : vector<16x256xf32> to vector<2x256xf32>
    %272 = vector.extract_strided_slice %242 {offsets = [12, 0], sizes = [2, 256], strides = [1, 1]} : vector<16x256xf32> to vector<2x256xf32>
    %273 = arith.select %18, %271, %272 : vector<2x256xi1>, vector<2x256xf32>
    %cst_81 = arith.constant dense<0.000000e+00> : vector<2x256xf32>
    %274 = tpu.matmul %266, %244, %cst_81 {dimension_numbers = #tpu.dot_dimension_numbers<[1], [0], [0], [1], [0, 0, 1, 1], [], []>} : vector<2x64xf32>, vector<64x256xf32>, vector<2x256xf32> -> vector<2x256xf32>
    %275 = arith.addf %273, %274 : vector<2x256xf32>
    %276 = arith.negf %275 : vector<2x256xf32>
    %277 = math.exp %276 : vector<2x256xf32>
    %cst_82 = arith.constant 1.000000e+00 : f32
    %278 = vector.broadcast %cst_82 : f32 to vector<2x256xf32>
    %279 = arith.addf %278, %277 : vector<2x256xf32>
    %280 = arith.divf %278, %279 : vector<2x256xf32>
    %281 = math.tanh %275 : vector<2x256xf32>
    %282 = vector.extract_strided_slice %280 {offsets = [0, 0], sizes = [2, 64], strides = [1, 1]} : vector<2x256xf32> to vector<2x64xf32>
    %283 = vector.extract_strided_slice %280 {offsets = [0, 64], sizes = [2, 64], strides = [1, 1]} : vector<2x256xf32> to vector<2x64xf32>
    %284 = vector.extract_strided_slice %281 {offsets = [0, 128], sizes = [2, 64], strides = [1, 1]} : vector<2x256xf32> to vector<2x64xf32>
    %285 = vector.extract_strided_slice %280 {offsets = [0, 192], sizes = [2, 64], strides = [1, 1]} : vector<2x256xf32> to vector<2x64xf32>
    %286 = arith.mulf %283, %264 : vector<2x64xf32>
    %287 = arith.mulf %282, %284 : vector<2x64xf32>
    %288 = arith.addf %286, %287 : vector<2x64xf32>
    %289 = math.tanh %288 : vector<2x64xf32>
    %290 = arith.mulf %285, %289 : vector<2x64xf32>
    %291 = vector.extract_strided_slice %290 {offsets = [0, 0], sizes = [2, 32], strides = [1, 1]} : vector<2x64xf32> to vector<2x32xf32>
    %c2_83 = arith.constant 2 : index
    %c0_84 = arith.constant 0 : index
    %292 = vector.load %arg15[%c2_83, %c0_84] : memref<16x32xf32, #tpu.memory_space<vmem>>, vector<2x32xf32>
    tpu.vector_store %arg15[%c2_83, %c0_84], %291 {strides = array<i32>} : memref<16x32xf32, #tpu.memory_space<vmem>>, vector<2x32xf32>,
    %293 = vector.extract_strided_slice %290 {offsets = [0, 32], sizes = [2, 32], strides = [1, 1]} : vector<2x64xf32> to vector<2x32xf32>
    %c12_85 = arith.constant 12 : index
    %c0_86 = arith.constant 0 : index
    %294 = vector.load %arg16[%c12_85, %c0_86] : memref<16x32xf32, #tpu.memory_space<vmem>>, vector<2x32xf32>
    tpu.vector_store %arg16[%c12_85, %c0_86], %293 {strides = array<i32>} : memref<16x32xf32, #tpu.memory_space<vmem>>, vector<2x32xf32>,
    %295 = vector.extract_strided_slice %242 {offsets = [4, 0], sizes = [2, 256], strides = [1, 1]} : vector<16x256xf32> to vector<2x256xf32>
    %296 = vector.extract_strided_slice %242 {offsets = [10, 0], sizes = [2, 256], strides = [1, 1]} : vector<16x256xf32> to vector<2x256xf32>
    %297 = arith.select %18, %295, %296 : vector<2x256xi1>, vector<2x256xf32>
    %cst_87 = arith.constant dense<0.000000e+00> : vector<2x256xf32>
    %298 = tpu.matmul %290, %244, %cst_87 {dimension_numbers = #tpu.dot_dimension_numbers<[1], [0], [0], [1], [0, 0, 1, 1], [], []>} : vector<2x64xf32>, vector<64x256xf32>, vector<2x256xf32> -> vector<2x256xf32>
    %299 = arith.addf %297, %298 : vector<2x256xf32>
    %300 = arith.negf %299 : vector<2x256xf32>
    %301 = math.exp %300 : vector<2x256xf32>
    %cst_88 = arith.constant 1.000000e+00 : f32
    %302 = vector.broadcast %cst_88 : f32 to vector<2x256xf32>
    %303 = arith.addf %302, %301 : vector<2x256xf32>
    %304 = arith.divf %302, %303 : vector<2x256xf32>
    %305 = math.tanh %299 : vector<2x256xf32>
    %306 = vector.extract_strided_slice %304 {offsets = [0, 0], sizes = [2, 64], strides = [1, 1]} : vector<2x256xf32> to vector<2x64xf32>
    %307 = vector.extract_strided_slice %304 {offsets = [0, 64], sizes = [2, 64], strides = [1, 1]} : vector<2x256xf32> to vector<2x64xf32>
    %308 = vector.extract_strided_slice %305 {offsets = [0, 128], sizes = [2, 64], strides = [1, 1]} : vector<2x256xf32> to vector<2x64xf32>
    %309 = vector.extract_strided_slice %304 {offsets = [0, 192], sizes = [2, 64], strides = [1, 1]} : vector<2x256xf32> to vector<2x64xf32>
    %310 = arith.mulf %307, %288 : vector<2x64xf32>
    %311 = arith.mulf %306, %308 : vector<2x64xf32>
    %312 = arith.addf %310, %311 : vector<2x64xf32>
    %313 = math.tanh %312 : vector<2x64xf32>
    %314 = arith.mulf %309, %313 : vector<2x64xf32>
    %315 = vector.extract_strided_slice %314 {offsets = [0, 0], sizes = [2, 32], strides = [1, 1]} : vector<2x64xf32> to vector<2x32xf32>
    %c4_89 = arith.constant 4 : index
    %c0_90 = arith.constant 0 : index
    %316 = vector.load %arg15[%c4_89, %c0_90] : memref<16x32xf32, #tpu.memory_space<vmem>>, vector<2x32xf32>
    tpu.vector_store %arg15[%c4_89, %c0_90], %315 {strides = array<i32>} : memref<16x32xf32, #tpu.memory_space<vmem>>, vector<2x32xf32>,
    %317 = vector.extract_strided_slice %314 {offsets = [0, 32], sizes = [2, 32], strides = [1, 1]} : vector<2x64xf32> to vector<2x32xf32>
    %c10_91 = arith.constant 10 : index
    %c0_92 = arith.constant 0 : index
    %318 = vector.load %arg16[%c10_91, %c0_92] : memref<16x32xf32, #tpu.memory_space<vmem>>, vector<2x32xf32>
    tpu.vector_store %arg16[%c10_91, %c0_92], %317 {strides = array<i32>} : memref<16x32xf32, #tpu.memory_space<vmem>>, vector<2x32xf32>,
    %319 = vector.extract_strided_slice %242 {offsets = [6, 0], sizes = [2, 256], strides = [1, 1]} : vector<16x256xf32> to vector<2x256xf32>
    %320 = vector.extract_strided_slice %242 {offsets = [8, 0], sizes = [2, 256], strides = [1, 1]} : vector<16x256xf32> to vector<2x256xf32>
    %321 = arith.select %18, %319, %320 : vector<2x256xi1>, vector<2x256xf32>
    %cst_93 = arith.constant dense<0.000000e+00> : vector<2x256xf32>
    %322 = tpu.matmul %314, %244, %cst_93 {dimension_numbers = #tpu.dot_dimension_numbers<[1], [0], [0], [1], [0, 0, 1, 1], [], []>} : vector<2x64xf32>, vector<64x256xf32>, vector<2x256xf32> -> vector<2x256xf32>
    %323 = arith.addf %321, %322 : vector<2x256xf32>
    %324 = arith.negf %323 : vector<2x256xf32>
    %325 = math.exp %324 : vector<2x256xf32>
    %cst_94 = arith.constant 1.000000e+00 : f32
    %326 = vector.broadcast %cst_94 : f32 to vector<2x256xf32>
    %327 = arith.addf %326, %325 : vector<2x256xf32>
    %328 = arith.divf %326, %327 : vector<2x256xf32>
    %329 = math.tanh %323 : vector<2x256xf32>
    %330 = vector.extract_strided_slice %328 {offsets = [0, 0], sizes = [2, 64], strides = [1, 1]} : vector<2x256xf32> to vector<2x64xf32>
    %331 = vector.extract_strided_slice %328 {offsets = [0, 64], sizes = [2, 64], strides = [1, 1]} : vector<2x256xf32> to vector<2x64xf32>
    %332 = vector.extract_strided_slice %329 {offsets = [0, 128], sizes = [2, 64], strides = [1, 1]} : vector<2x256xf32> to vector<2x64xf32>
    %333 = vector.extract_strided_slice %328 {offsets = [0, 192], sizes = [2, 64], strides = [1, 1]} : vector<2x256xf32> to vector<2x64xf32>
    %334 = arith.mulf %331, %312 : vector<2x64xf32>
    %335 = arith.mulf %330, %332 : vector<2x64xf32>
    %336 = arith.addf %334, %335 : vector<2x64xf32>
    %337 = math.tanh %336 : vector<2x64xf32>
    %338 = arith.mulf %333, %337 : vector<2x64xf32>
    %339 = vector.extract_strided_slice %338 {offsets = [0, 0], sizes = [2, 32], strides = [1, 1]} : vector<2x64xf32> to vector<2x32xf32>
    %c6_95 = arith.constant 6 : index
    %c0_96 = arith.constant 0 : index
    %340 = vector.load %arg15[%c6_95, %c0_96] : memref<16x32xf32, #tpu.memory_space<vmem>>, vector<2x32xf32>
    tpu.vector_store %arg15[%c6_95, %c0_96], %339 {strides = array<i32>} : memref<16x32xf32, #tpu.memory_space<vmem>>, vector<2x32xf32>,
    %341 = vector.extract_strided_slice %338 {offsets = [0, 32], sizes = [2, 32], strides = [1, 1]} : vector<2x64xf32> to vector<2x32xf32>
    %c8_97 = arith.constant 8 : index
    %c0_98 = arith.constant 0 : index
    %342 = vector.load %arg16[%c8_97, %c0_98] : memref<16x32xf32, #tpu.memory_space<vmem>>, vector<2x32xf32>
    tpu.vector_store %arg16[%c8_97, %c0_98], %341 {strides = array<i32>} : memref<16x32xf32, #tpu.memory_space<vmem>>, vector<2x32xf32>,
    %343 = vector.extract_strided_slice %242 {offsets = [8, 0], sizes = [2, 256], strides = [1, 1]} : vector<16x256xf32> to vector<2x256xf32>
    %344 = vector.extract_strided_slice %242 {offsets = [6, 0], sizes = [2, 256], strides = [1, 1]} : vector<16x256xf32> to vector<2x256xf32>
    %345 = arith.select %18, %343, %344 : vector<2x256xi1>, vector<2x256xf32>
    %cst_99 = arith.constant dense<0.000000e+00> : vector<2x256xf32>
    %346 = tpu.matmul %338, %244, %cst_99 {dimension_numbers = #tpu.dot_dimension_numbers<[1], [0], [0], [1], [0, 0, 1, 1], [], []>} : vector<2x64xf32>, vector<64x256xf32>, vector<2x256xf32> -> vector<2x256xf32>
    %347 = arith.addf %345, %346 : vector<2x256xf32>
    %348 = arith.negf %347 : vector<2x256xf32>
    %349 = math.exp %348 : vector<2x256xf32>
    %cst_100 = arith.constant 1.000000e+00 : f32
    %350 = vector.broadcast %cst_100 : f32 to vector<2x256xf32>
    %351 = arith.addf %350, %349 : vector<2x256xf32>
    %352 = arith.divf %350, %351 : vector<2x256xf32>
    %353 = math.tanh %347 : vector<2x256xf32>
    %354 = vector.extract_strided_slice %352 {offsets = [0, 0], sizes = [2, 64], strides = [1, 1]} : vector<2x256xf32> to vector<2x64xf32>
    %355 = vector.extract_strided_slice %352 {offsets = [0, 64], sizes = [2, 64], strides = [1, 1]} : vector<2x256xf32> to vector<2x64xf32>
    %356 = vector.extract_strided_slice %353 {offsets = [0, 128], sizes = [2, 64], strides = [1, 1]} : vector<2x256xf32> to vector<2x64xf32>
    %357 = vector.extract_strided_slice %352 {offsets = [0, 192], sizes = [2, 64], strides = [1, 1]} : vector<2x256xf32> to vector<2x64xf32>
    %358 = arith.mulf %355, %336 : vector<2x64xf32>
    %359 = arith.mulf %354, %356 : vector<2x64xf32>
    %360 = arith.addf %358, %359 : vector<2x64xf32>
    %361 = math.tanh %360 : vector<2x64xf32>
    %362 = arith.mulf %357, %361 : vector<2x64xf32>
    %363 = vector.extract_strided_slice %362 {offsets = [0, 0], sizes = [2, 32], strides = [1, 1]} : vector<2x64xf32> to vector<2x32xf32>
    %c8_101 = arith.constant 8 : index
    %c0_102 = arith.constant 0 : index
    %364 = vector.load %arg15[%c8_101, %c0_102] : memref<16x32xf32, #tpu.memory_space<vmem>>, vector<2x32xf32>
    tpu.vector_store %arg15[%c8_101, %c0_102], %363 {strides = array<i32>} : memref<16x32xf32, #tpu.memory_space<vmem>>, vector<2x32xf32>,
    %365 = vector.extract_strided_slice %362 {offsets = [0, 32], sizes = [2, 32], strides = [1, 1]} : vector<2x64xf32> to vector<2x32xf32>
    %c6_103 = arith.constant 6 : index
    %c0_104 = arith.constant 0 : index
    %366 = vector.load %arg16[%c6_103, %c0_104] : memref<16x32xf32, #tpu.memory_space<vmem>>, vector<2x32xf32>
    tpu.vector_store %arg16[%c6_103, %c0_104], %365 {strides = array<i32>} : memref<16x32xf32, #tpu.memory_space<vmem>>, vector<2x32xf32>,
    %367 = vector.extract_strided_slice %242 {offsets = [10, 0], sizes = [2, 256], strides = [1, 1]} : vector<16x256xf32> to vector<2x256xf32>
    %368 = vector.extract_strided_slice %242 {offsets = [4, 0], sizes = [2, 256], strides = [1, 1]} : vector<16x256xf32> to vector<2x256xf32>
    %369 = arith.select %18, %367, %368 : vector<2x256xi1>, vector<2x256xf32>
    %cst_105 = arith.constant dense<0.000000e+00> : vector<2x256xf32>
    %370 = tpu.matmul %362, %244, %cst_105 {dimension_numbers = #tpu.dot_dimension_numbers<[1], [0], [0], [1], [0, 0, 1, 1], [], []>} : vector<2x64xf32>, vector<64x256xf32>, vector<2x256xf32> -> vector<2x256xf32>
    %371 = arith.addf %369, %370 : vector<2x256xf32>
    %372 = arith.negf %371 : vector<2x256xf32>
    %373 = math.exp %372 : vector<2x256xf32>
    %cst_106 = arith.constant 1.000000e+00 : f32
    %374 = vector.broadcast %cst_106 : f32 to vector<2x256xf32>
    %375 = arith.addf %374, %373 : vector<2x256xf32>
    %376 = arith.divf %374, %375 : vector<2x256xf32>
    %377 = math.tanh %371 : vector<2x256xf32>
    %378 = vector.extract_strided_slice %376 {offsets = [0, 0], sizes = [2, 64], strides = [1, 1]} : vector<2x256xf32> to vector<2x64xf32>
    %379 = vector.extract_strided_slice %376 {offsets = [0, 64], sizes = [2, 64], strides = [1, 1]} : vector<2x256xf32> to vector<2x64xf32>
    %380 = vector.extract_strided_slice %377 {offsets = [0, 128], sizes = [2, 64], strides = [1, 1]} : vector<2x256xf32> to vector<2x64xf32>
    %381 = vector.extract_strided_slice %376 {offsets = [0, 192], sizes = [2, 64], strides = [1, 1]} : vector<2x256xf32> to vector<2x64xf32>
    %382 = arith.mulf %379, %360 : vector<2x64xf32>
    %383 = arith.mulf %378, %380 : vector<2x64xf32>
    %384 = arith.addf %382, %383 : vector<2x64xf32>
    %385 = math.tanh %384 : vector<2x64xf32>
    %386 = arith.mulf %381, %385 : vector<2x64xf32>
    %387 = vector.extract_strided_slice %386 {offsets = [0, 0], sizes = [2, 32], strides = [1, 1]} : vector<2x64xf32> to vector<2x32xf32>
    %c10_107 = arith.constant 10 : index
    %c0_108 = arith.constant 0 : index
    %388 = vector.load %arg15[%c10_107, %c0_108] : memref<16x32xf32, #tpu.memory_space<vmem>>, vector<2x32xf32>
    tpu.vector_store %arg15[%c10_107, %c0_108], %387 {strides = array<i32>} : memref<16x32xf32, #tpu.memory_space<vmem>>, vector<2x32xf32>,
    %389 = vector.extract_strided_slice %386 {offsets = [0, 32], sizes = [2, 32], strides = [1, 1]} : vector<2x64xf32> to vector<2x32xf32>
    %c4_109 = arith.constant 4 : index
    %c0_110 = arith.constant 0 : index
    %390 = vector.load %arg16[%c4_109, %c0_110] : memref<16x32xf32, #tpu.memory_space<vmem>>, vector<2x32xf32>
    tpu.vector_store %arg16[%c4_109, %c0_110], %389 {strides = array<i32>} : memref<16x32xf32, #tpu.memory_space<vmem>>, vector<2x32xf32>,
    %391 = vector.extract_strided_slice %242 {offsets = [12, 0], sizes = [2, 256], strides = [1, 1]} : vector<16x256xf32> to vector<2x256xf32>
    %392 = vector.extract_strided_slice %242 {offsets = [2, 0], sizes = [2, 256], strides = [1, 1]} : vector<16x256xf32> to vector<2x256xf32>
    %393 = arith.select %18, %391, %392 : vector<2x256xi1>, vector<2x256xf32>
    %cst_111 = arith.constant dense<0.000000e+00> : vector<2x256xf32>
    %394 = tpu.matmul %386, %244, %cst_111 {dimension_numbers = #tpu.dot_dimension_numbers<[1], [0], [0], [1], [0, 0, 1, 1], [], []>} : vector<2x64xf32>, vector<64x256xf32>, vector<2x256xf32> -> vector<2x256xf32>
    %395 = arith.addf %393, %394 : vector<2x256xf32>
    %396 = arith.negf %395 : vector<2x256xf32>
    %397 = math.exp %396 : vector<2x256xf32>
    %cst_112 = arith.constant 1.000000e+00 : f32
    %398 = vector.broadcast %cst_112 : f32 to vector<2x256xf32>
    %399 = arith.addf %398, %397 : vector<2x256xf32>
    %400 = arith.divf %398, %399 : vector<2x256xf32>
    %401 = math.tanh %395 : vector<2x256xf32>
    %402 = vector.extract_strided_slice %400 {offsets = [0, 0], sizes = [2, 64], strides = [1, 1]} : vector<2x256xf32> to vector<2x64xf32>
    %403 = vector.extract_strided_slice %400 {offsets = [0, 64], sizes = [2, 64], strides = [1, 1]} : vector<2x256xf32> to vector<2x64xf32>
    %404 = vector.extract_strided_slice %401 {offsets = [0, 128], sizes = [2, 64], strides = [1, 1]} : vector<2x256xf32> to vector<2x64xf32>
    %405 = vector.extract_strided_slice %400 {offsets = [0, 192], sizes = [2, 64], strides = [1, 1]} : vector<2x256xf32> to vector<2x64xf32>
    %406 = arith.mulf %403, %384 : vector<2x64xf32>
    %407 = arith.mulf %402, %404 : vector<2x64xf32>
    %408 = arith.addf %406, %407 : vector<2x64xf32>
    %409 = math.tanh %408 : vector<2x64xf32>
    %410 = arith.mulf %405, %409 : vector<2x64xf32>
    %411 = vector.extract_strided_slice %410 {offsets = [0, 0], sizes = [2, 32], strides = [1, 1]} : vector<2x64xf32> to vector<2x32xf32>
    %c12_113 = arith.constant 12 : index
    %c0_114 = arith.constant 0 : index
    %412 = vector.load %arg15[%c12_113, %c0_114] : memref<16x32xf32, #tpu.memory_space<vmem>>, vector<2x32xf32>
    tpu.vector_store %arg15[%c12_113, %c0_114], %411 {strides = array<i32>} : memref<16x32xf32, #tpu.memory_space<vmem>>, vector<2x32xf32>,
    %413 = vector.extract_strided_slice %410 {offsets = [0, 32], sizes = [2, 32], strides = [1, 1]} : vector<2x64xf32> to vector<2x32xf32>
    %c2_115 = arith.constant 2 : index
    %c0_116 = arith.constant 0 : index
    %414 = vector.load %arg16[%c2_115, %c0_116] : memref<16x32xf32, #tpu.memory_space<vmem>>, vector<2x32xf32>
    tpu.vector_store %arg16[%c2_115, %c0_116], %413 {strides = array<i32>} : memref<16x32xf32, #tpu.memory_space<vmem>>, vector<2x32xf32>,
    %415 = vector.extract_strided_slice %242 {offsets = [14, 0], sizes = [2, 256], strides = [1, 1]} : vector<16x256xf32> to vector<2x256xf32>
    %416 = vector.extract_strided_slice %242 {offsets = [0, 0], sizes = [2, 256], strides = [1, 1]} : vector<16x256xf32> to vector<2x256xf32>
    %417 = arith.select %18, %415, %416 : vector<2x256xi1>, vector<2x256xf32>
    %cst_117 = arith.constant dense<0.000000e+00> : vector<2x256xf32>
    %418 = tpu.matmul %410, %244, %cst_117 {dimension_numbers = #tpu.dot_dimension_numbers<[1], [0], [0], [1], [0, 0, 1, 1], [], []>} : vector<2x64xf32>, vector<64x256xf32>, vector<2x256xf32> -> vector<2x256xf32>
    %419 = arith.addf %417, %418 : vector<2x256xf32>
    %420 = arith.negf %419 : vector<2x256xf32>
    %421 = math.exp %420 : vector<2x256xf32>
    %cst_118 = arith.constant 1.000000e+00 : f32
    %422 = vector.broadcast %cst_118 : f32 to vector<2x256xf32>
    %423 = arith.addf %422, %421 : vector<2x256xf32>
    %424 = arith.divf %422, %423 : vector<2x256xf32>
    %425 = math.tanh %419 : vector<2x256xf32>
    %426 = vector.extract_strided_slice %424 {offsets = [0, 0], sizes = [2, 64], strides = [1, 1]} : vector<2x256xf32> to vector<2x64xf32>
    %427 = vector.extract_strided_slice %424 {offsets = [0, 64], sizes = [2, 64], strides = [1, 1]} : vector<2x256xf32> to vector<2x64xf32>
    %428 = vector.extract_strided_slice %425 {offsets = [0, 128], sizes = [2, 64], strides = [1, 1]} : vector<2x256xf32> to vector<2x64xf32>
    %429 = vector.extract_strided_slice %424 {offsets = [0, 192], sizes = [2, 64], strides = [1, 1]} : vector<2x256xf32> to vector<2x64xf32>
    %430 = arith.mulf %427, %408 : vector<2x64xf32>
    %431 = arith.mulf %426, %428 : vector<2x64xf32>
    %432 = arith.addf %430, %431 : vector<2x64xf32>
    %433 = math.tanh %432 : vector<2x64xf32>
    %434 = arith.mulf %429, %433 : vector<2x64xf32>
    %435 = vector.extract_strided_slice %434 {offsets = [0, 0], sizes = [2, 32], strides = [1, 1]} : vector<2x64xf32> to vector<2x32xf32>
    %c14_119 = arith.constant 14 : index
    %c0_120 = arith.constant 0 : index
    %436 = vector.load %arg15[%c14_119, %c0_120] : memref<16x32xf32, #tpu.memory_space<vmem>>, vector<2x32xf32>
    tpu.vector_store %arg15[%c14_119, %c0_120], %435 {strides = array<i32>} : memref<16x32xf32, #tpu.memory_space<vmem>>, vector<2x32xf32>,
    %437 = vector.extract_strided_slice %434 {offsets = [0, 32], sizes = [2, 32], strides = [1, 1]} : vector<2x64xf32> to vector<2x32xf32>
    %c0_121 = arith.constant 0 : index
    %c0_122 = arith.constant 0 : index
    %438 = vector.load %arg16[%c0_121, %c0_122] : memref<16x32xf32, #tpu.memory_space<vmem>>, vector<2x32xf32>
    tpu.vector_store %arg16[%c0_121, %c0_122], %437 {strides = array<i32>} : memref<16x32xf32, #tpu.memory_space<vmem>>, vector<2x32xf32>,
    %c0_123 = arith.constant 0 : index
    %c0_124 = arith.constant 0 : index
    %439 = vector.load %arg15[%c0_123, %c0_124] : memref<16x32xf32, #tpu.memory_space<vmem>>, vector<16x32xf32>
    %c0_125 = arith.constant 0 : index
    %c0_126 = arith.constant 0 : index
    %440 = vector.load %arg16[%c0_125, %c0_126] : memref<16x32xf32, #tpu.memory_space<vmem>>, vector<16x32xf32>
    %c0_127 = arith.constant 0 : index
    %c0_128 = arith.constant 0 : index
    %441 = vector.load %arg5[%c0_127, %c0_128] : memref<64x64xf32, #tpu.memory_space<vmem>>, vector<64x64xf32>
    %cst_129 = arith.constant dense<0.000000e+00> : vector<2x64xf32>
    %442 = tpu.matmul %434, %441, %cst_129 {dimension_numbers = #tpu.dot_dimension_numbers<[1], [0], [0], [1], [0, 0, 1, 1], [], []>} : vector<2x64xf32>, vector<64x64xf32>, vector<2x64xf32> -> vector<2x64xf32>
    %c0_130 = arith.constant 0 : index
    %c0_131 = arith.constant 0 : index
    %443 = vector.load %arg6[%c0_130, %c0_131] : memref<1x64xf32, #tpu.memory_space<vmem>>, vector<1x64xf32>
    %444 = vector.broadcast %443 : vector<1x64xf32> to vector<2x64xf32>
    %445 = arith.addf %442, %444 : vector<2x64xf32>
    %c0_132 = arith.constant 0 : index
    %c0_133 = arith.constant 0 : index
    %446 = vector.load %arg7[%c0_132, %c0_133] : memref<64x64xf32, #tpu.memory_space<vmem>>, vector<64x64xf32>
    %447 = vector.extract_strided_slice %446 {offsets = [0, 0], sizes = [32, 64], strides = [1, 1]} : vector<64x64xf32> to vector<32x64xf32>
    %cst_134 = arith.constant dense<0.000000e+00> : vector<16x64xf32>
    %448 = tpu.matmul %439, %447, %cst_134 {dimension_numbers = #tpu.dot_dimension_numbers<[1], [0], [0], [1], [0, 0, 1, 1], [], []>} : vector<16x32xf32>, vector<32x64xf32>, vector<16x64xf32> -> vector<16x64xf32>
    %449 = vector.extract_strided_slice %446 {offsets = [32, 0], sizes = [32, 64], strides = [1, 1]} : vector<64x64xf32> to vector<32x64xf32>
    %cst_135 = arith.constant dense<0.000000e+00> : vector<16x64xf32>
    %450 = tpu.matmul %440, %449, %cst_135 {dimension_numbers = #tpu.dot_dimension_numbers<[1], [0], [0], [1], [0, 0, 1, 1], [], []>} : vector<16x32xf32>, vector<32x64xf32>, vector<16x64xf32> -> vector<16x64xf32>
    %451 = arith.addf %448, %450 : vector<16x64xf32>
    %c0_136 = arith.constant 0 : index
    %c0_137 = arith.constant 0 : index
    %452 = vector.load %arg8[%c0_136, %c0_137] : memref<1x64xf32, #tpu.memory_space<vmem>>, vector<1x64xf32>
    %453 = vector.broadcast %452 : vector<1x64xf32> to vector<16x64xf32>
    %454 = arith.addf %451, %453 : vector<16x64xf32>
    %455 = tpu.concatenate %445, %445, %445, %445, %445, %445, %445, %445 in 0 : vector<2x64xf32>, vector<2x64xf32>, vector<2x64xf32>, vector<2x64xf32>, vector<2x64xf32>, vector<2x64xf32>, vector<2x64xf32>, vector<2x64xf32> -> vector<16x64xf32>
    %456 = arith.addf %455, %454 : vector<16x64xf32>
    %457 = math.tanh %456 : vector<16x64xf32>
    %c0_138 = arith.constant 0 : index
    %c0_139 = arith.constant 0 : index
    %458 = vector.load %arg9[%c0_138, %c0_139] : memref<1x64xf32, #tpu.memory_space<vmem>>, vector<1x64xf32>
    %459 = vector.broadcast %458 : vector<1x64xf32> to vector<16x64xf32>
    %460 = arith.mulf %457, %459 : vector<16x64xf32>
    %cst_140 = arith.constant dense<0.000000e+00> : vector<16xf32>
    %461 = vector.multi_reduction <add>, %460, %cst_140 [1] : vector<16x64xf32> to vector<16xf32>
    %462 = vector.shape_cast %461 : vector<16xf32> to vector<16x1xf32>
    %463 = vector.extract_strided_slice %462 {offsets = [0, 0], sizes = [2, 1], strides = [1, 1]} : vector<16x1xf32> to vector<2x1xf32>
    %464 = vector.extract_strided_slice %462 {offsets = [2, 0], sizes = [2, 1], strides = [1, 1]} : vector<16x1xf32> to vector<2x1xf32>
    %465 = vector.extract_strided_slice %462 {offsets = [4, 0], sizes = [2, 1], strides = [1, 1]} : vector<16x1xf32> to vector<2x1xf32>
    %466 = vector.extract_strided_slice %462 {offsets = [6, 0], sizes = [2, 1], strides = [1, 1]} : vector<16x1xf32> to vector<2x1xf32>
    %467 = vector.extract_strided_slice %462 {offsets = [8, 0], sizes = [2, 1], strides = [1, 1]} : vector<16x1xf32> to vector<2x1xf32>
    %468 = vector.extract_strided_slice %462 {offsets = [10, 0], sizes = [2, 1], strides = [1, 1]} : vector<16x1xf32> to vector<2x1xf32>
    %469 = vector.extract_strided_slice %462 {offsets = [12, 0], sizes = [2, 1], strides = [1, 1]} : vector<16x1xf32> to vector<2x1xf32>
    %470 = vector.extract_strided_slice %462 {offsets = [14, 0], sizes = [2, 1], strides = [1, 1]} : vector<16x1xf32> to vector<2x1xf32>
    %471 = tpu.concatenate %463, %464, %465, %466, %467, %468, %469, %470 in 1 : vector<2x1xf32>, vector<2x1xf32>, vector<2x1xf32>, vector<2x1xf32>, vector<2x1xf32>, vector<2x1xf32>, vector<2x1xf32>, vector<2x1xf32> -> vector<2x8xf32>
    %cst_141 = arith.constant dense<0xFF800000> : vector<2xf32>
    %472 = vector.multi_reduction <maximumf>, %471, %cst_141 [1] : vector<2x8xf32> to vector<2xf32>
    %473 = vector.shape_cast %472 : vector<2xf32> to vector<2x1xf32>
    %474 = vector.broadcast %473 : vector<2x1xf32> to vector<2x8xf32>
    %475 = arith.subf %471, %474 : vector<2x8xf32>
    %476 = math.exp %475 : vector<2x8xf32>
    %cst_142 = arith.constant dense<0.000000e+00> : vector<2xf32>
    %477 = vector.multi_reduction <add>, %476, %cst_142 [1] : vector<2x8xf32> to vector<2xf32>
    %478 = vector.shape_cast %477 : vector<2xf32> to vector<2x1xf32>
    %479 = tpu.reciprocal %478 {approx = true} : vector<2x1xf32> -> vector<2x1xf32>
    %480 = vector.broadcast %479 : vector<2x1xf32> to vector<2x8xf32>
    %481 = arith.mulf %476, %480 : vector<2x8xf32>
    %cst_143 = arith.constant 0.000000e+00 : f32
    %482 = vector.broadcast %cst_143 : f32 to vector<2x32xf32>
    %cst_144 = arith.constant 0.000000e+00 : f32
    %483 = vector.broadcast %cst_144 : f32 to vector<2x32xf32>
    %484 = vector.extract_strided_slice %481 {offsets = [0, 0], sizes = [2, 1], strides = [1, 1]} : vector<2x8xf32> to vector<2x1xf32>
    %485 = vector.extract_strided_slice %439 {offsets = [0, 0], sizes = [2, 32], strides = [1, 1]} : vector<16x32xf32> to vector<2x32xf32>
    %486 = vector.broadcast %484 : vector<2x1xf32> to vector<2x32xf32>
    %487 = arith.mulf %486, %485 : vector<2x32xf32>
    %488 = arith.addf %482, %487 : vector<2x32xf32>
    %489 = vector.extract_strided_slice %440 {offsets = [0, 0], sizes = [2, 32], strides = [1, 1]} : vector<16x32xf32> to vector<2x32xf32>
    %490 = vector.broadcast %484 : vector<2x1xf32> to vector<2x32xf32>
    %491 = arith.mulf %490, %489 : vector<2x32xf32>
    %492 = arith.addf %483, %491 : vector<2x32xf32>
    %493 = vector.extract_strided_slice %481 {offsets = [0, 1], sizes = [2, 1], strides = [1, 1]} : vector<2x8xf32> to vector<2x1xf32>
    %494 = vector.extract_strided_slice %439 {offsets = [2, 0], sizes = [2, 32], strides = [1, 1]} : vector<16x32xf32> to vector<2x32xf32>
    %495 = vector.broadcast %493 : vector<2x1xf32> to vector<2x32xf32>
    %496 = arith.mulf %495, %494 : vector<2x32xf32>
    %497 = arith.addf %488, %496 : vector<2x32xf32>
    %498 = vector.extract_strided_slice %440 {offsets = [2, 0], sizes = [2, 32], strides = [1, 1]} : vector<16x32xf32> to vector<2x32xf32>
    %499 = vector.broadcast %493 : vector<2x1xf32> to vector<2x32xf32>
    %500 = arith.mulf %499, %498 : vector<2x32xf32>
    %501 = arith.addf %492, %500 : vector<2x32xf32>
    %502 = vector.extract_strided_slice %481 {offsets = [0, 2], sizes = [2, 1], strides = [1, 1]} : vector<2x8xf32> to vector<2x1xf32>
    %503 = vector.extract_strided_slice %439 {offsets = [4, 0], sizes = [2, 32], strides = [1, 1]} : vector<16x32xf32> to vector<2x32xf32>
    %504 = vector.broadcast %502 : vector<2x1xf32> to vector<2x32xf32>
    %505 = arith.mulf %504, %503 : vector<2x32xf32>
    %506 = arith.addf %497, %505 : vector<2x32xf32>
    %507 = vector.extract_strided_slice %440 {offsets = [4, 0], sizes = [2, 32], strides = [1, 1]} : vector<16x32xf32> to vector<2x32xf32>
    %508 = vector.broadcast %502 : vector<2x1xf32> to vector<2x32xf32>
    %509 = arith.mulf %508, %507 : vector<2x32xf32>
    %510 = arith.addf %501, %509 : vector<2x32xf32>
    %511 = vector.extract_strided_slice %481 {offsets = [0, 3], sizes = [2, 1], strides = [1, 1]} : vector<2x8xf32> to vector<2x1xf32>
    %512 = vector.extract_strided_slice %439 {offsets = [6, 0], sizes = [2, 32], strides = [1, 1]} : vector<16x32xf32> to vector<2x32xf32>
    %513 = vector.broadcast %511 : vector<2x1xf32> to vector<2x32xf32>
    %514 = arith.mulf %513, %512 : vector<2x32xf32>
    %515 = arith.addf %506, %514 : vector<2x32xf32>
    %516 = vector.extract_strided_slice %440 {offsets = [6, 0], sizes = [2, 32], strides = [1, 1]} : vector<16x32xf32> to vector<2x32xf32>
    %517 = vector.broadcast %511 : vector<2x1xf32> to vector<2x32xf32>
    %518 = arith.mulf %517, %516 : vector<2x32xf32>
    %519 = arith.addf %510, %518 : vector<2x32xf32>
    %520 = vector.extract_strided_slice %481 {offsets = [0, 4], sizes = [2, 1], strides = [1, 1]} : vector<2x8xf32> to vector<2x1xf32>
    %521 = vector.extract_strided_slice %439 {offsets = [8, 0], sizes = [2, 32], strides = [1, 1]} : vector<16x32xf32> to vector<2x32xf32>
    %522 = vector.broadcast %520 : vector<2x1xf32> to vector<2x32xf32>
    %523 = arith.mulf %522, %521 : vector<2x32xf32>
    %524 = arith.addf %515, %523 : vector<2x32xf32>
    %525 = vector.extract_strided_slice %440 {offsets = [8, 0], sizes = [2, 32], strides = [1, 1]} : vector<16x32xf32> to vector<2x32xf32>
    %526 = vector.broadcast %520 : vector<2x1xf32> to vector<2x32xf32>
    %527 = arith.mulf %526, %525 : vector<2x32xf32>
    %528 = arith.addf %519, %527 : vector<2x32xf32>
    %529 = vector.extract_strided_slice %481 {offsets = [0, 5], sizes = [2, 1], strides = [1, 1]} : vector<2x8xf32> to vector<2x1xf32>
    %530 = vector.extract_strided_slice %439 {offsets = [10, 0], sizes = [2, 32], strides = [1, 1]} : vector<16x32xf32> to vector<2x32xf32>
    %531 = vector.broadcast %529 : vector<2x1xf32> to vector<2x32xf32>
    %532 = arith.mulf %531, %530 : vector<2x32xf32>
    %533 = arith.addf %524, %532 : vector<2x32xf32>
    %534 = vector.extract_strided_slice %440 {offsets = [10, 0], sizes = [2, 32], strides = [1, 1]} : vector<16x32xf32> to vector<2x32xf32>
    %535 = vector.broadcast %529 : vector<2x1xf32> to vector<2x32xf32>
    %536 = arith.mulf %535, %534 : vector<2x32xf32>
    %537 = arith.addf %528, %536 : vector<2x32xf32>
    %538 = vector.extract_strided_slice %481 {offsets = [0, 6], sizes = [2, 1], strides = [1, 1]} : vector<2x8xf32> to vector<2x1xf32>
    %539 = vector.extract_strided_slice %439 {offsets = [12, 0], sizes = [2, 32], strides = [1, 1]} : vector<16x32xf32> to vector<2x32xf32>
    %540 = vector.broadcast %538 : vector<2x1xf32> to vector<2x32xf32>
    %541 = arith.mulf %540, %539 : vector<2x32xf32>
    %542 = arith.addf %533, %541 : vector<2x32xf32>
    %543 = vector.extract_strided_slice %440 {offsets = [12, 0], sizes = [2, 32], strides = [1, 1]} : vector<16x32xf32> to vector<2x32xf32>
    %544 = vector.broadcast %538 : vector<2x1xf32> to vector<2x32xf32>
    %545 = arith.mulf %544, %543 : vector<2x32xf32>
    %546 = arith.addf %537, %545 : vector<2x32xf32>
    %547 = vector.extract_strided_slice %481 {offsets = [0, 7], sizes = [2, 1], strides = [1, 1]} : vector<2x8xf32> to vector<2x1xf32>
    %548 = vector.extract_strided_slice %439 {offsets = [14, 0], sizes = [2, 32], strides = [1, 1]} : vector<16x32xf32> to vector<2x32xf32>
    %549 = vector.broadcast %547 : vector<2x1xf32> to vector<2x32xf32>
    %550 = arith.mulf %549, %548 : vector<2x32xf32>
    %551 = arith.addf %542, %550 : vector<2x32xf32>
    %552 = vector.extract_strided_slice %440 {offsets = [14, 0], sizes = [2, 32], strides = [1, 1]} : vector<16x32xf32> to vector<2x32xf32>
    %553 = vector.broadcast %547 : vector<2x1xf32> to vector<2x32xf32>
    %554 = arith.mulf %553, %552 : vector<2x32xf32>
    %555 = arith.addf %546, %554 : vector<2x32xf32>
    %c0_145 = arith.constant 0 : index
    %c0_146 = arith.constant 0 : index
    %556 = vector.load %arg10[%c0_145, %c0_146] : memref<64x8xf32, #tpu.memory_space<vmem>>, vector<64x8xf32>
    %557 = vector.extract_strided_slice %556 {offsets = [0, 0], sizes = [32, 8], strides = [1, 1]} : vector<64x8xf32> to vector<32x8xf32>
    %cst_147 = arith.constant dense<0.000000e+00> : vector<2x8xf32>
    %558 = tpu.matmul %551, %557, %cst_147 {dimension_numbers = #tpu.dot_dimension_numbers<[1], [0], [0], [1], [0, 0, 1, 1], [], []>} : vector<2x32xf32>, vector<32x8xf32>, vector<2x8xf32> -> vector<2x8xf32>
    %559 = vector.extract_strided_slice %556 {offsets = [32, 0], sizes = [32, 8], strides = [1, 1]} : vector<64x8xf32> to vector<32x8xf32>
    %cst_148 = arith.constant dense<0.000000e+00> : vector<2x8xf32>
    %560 = tpu.matmul %555, %559, %cst_148 {dimension_numbers = #tpu.dot_dimension_numbers<[1], [0], [0], [1], [0, 0, 1, 1], [], []>} : vector<2x32xf32>, vector<32x8xf32>, vector<2x8xf32> -> vector<2x8xf32>
    %561 = arith.addf %558, %560 : vector<2x8xf32>
    %c0_149 = arith.constant 0 : index
    %c0_150 = arith.constant 0 : index
    %562 = vector.load %arg11[%c0_149, %c0_150] : memref<1x8xf32, #tpu.memory_space<vmem>>, vector<1x8xf32>
    %563 = vector.broadcast %562 : vector<1x8xf32> to vector<2x8xf32>
    %564 = arith.addf %561, %563 : vector<2x8xf32>
    %c0_151 = arith.constant 0 : index
    %c0_152 = arith.constant 0 : index
    %565 = vector.load %arg12[%c0_151, %c0_152] : memref<2x8xf32, #tpu.memory_space<vmem>>, vector<2x8xf32>
    tpu.vector_store %arg12[%c0_151, %c0_152], %564 {strides = array<i32>} : memref<2x8xf32, #tpu.memory_space<vmem>>, vector<2x8xf32>,
    return
  }
}

</mosaic_0001>

<bundles_post_ra>
// kernel: attn_bilstm_classifier.1
= control target key start
LH: loop header
LB: loop body
LE: loop exit
PB: predicated region body
PF: predicated region fallthrough
CT: control target
= control target key end

     0   :  { %v3854_v2 = vmov 0   ;;  %v3855_v11 = vmov 0.0   ;;  %s4790_s0 = inlined_call_operand.vmem [shape: s32[16,1], index: 0, kind: input, shape index: {}]   ;;  %s4791_s1 = inlined_call_operand.vmem [shape: f32[64,64], index: 1, kind: input, shape index: {}]   ;;  %s4792_s2 = inlined_call_operand.vmem [shape: f32[2,64,256], index: 2, kind: input, shape index: {}]   ;;  %s4793_s3 = inlined_call_operand.vmem [shape: f32[2,64,256], index: 3, kind: input, shape index: {}]   ;;  %s4794_s4 = inlined_call_operand.vmem [shape: f32[2,1,256], index: 4, kind: input, shape index: {}]   ;;  %s4795_s5 = inlined_call_operand.vmem [shape: f32[64,64], index: 5, kind: input, shape index: {}]   ;;  %s4796_s6 = inlined_call_operand.vmem [shape: f32[1,64], index: 6, kind: input, shape index: {}]   ;;  %s4797_s7 = inlined_call_operand.vmem [shape: f32[64,64], index: 7, kind: input, shape index: {}]   ;;  %s4798_s8 = inlined_call_operand.vmem [shape: f32[1,64], index: 8, kind: input, shape index: {}]   ;;  %s4799_s9 = inlined_call_operand.vmem [shape: f32[1,64], index: 9, kind: input, shape index: {}]   ;;  %s4800_s10 = inlined_call_operand.vmem [shape: f32[64,8], index: 10, kind: input, shape index: {}]   ;;  %s4801_s11 = inlined_call_operand.vmem [shape: f32[1,8], index: 11, kind: input, shape index: {}]   ;;  %s4802_s12 = inlined_call_operand.hbm [shape: f32[2,8], index: 12, kind: output, shape index: {}]  }
   0x1   :  { %v71_v0 = vld [vmem:[%s4790_s0] sm:$0xff]  ;;  %3621 = vset.pattern.permute.xlu0 %v3854_v2  ;;  %v86_v3 = vld [vmem:[%s4791_s1 + $0x8] sm:$0xff]  ;;  %v87_v4 = vld [vmem:[%s4791_s1 + $0x10] sm:$0xff]  ;;  %273 = vmatprep.mubr.f32.mxu1 %v3855_v11 }
   0x2   :  { %v85_v1 = vld [vmem:[%s4791_s1] sm:$0xff]  ;;  %v88_v5 = vld [vmem:[%s4791_s1 + $0x18] sm:$0xff]  ;;  %74 = vperm.xlu0 %3621, %v71_v0   ;;  %v72_v6 = vld [vmem:[%s4790_s0 + $0x8] sm:$0xff] }
   0x3   :  { %v3257_v7 = vpack.c.bf16 %v86_v3, %v85_v1  ;;  %v3261_v8 = vpack.c.bf16 %v88_v5, %v87_v4  ;;  %v89_v9 = vld [vmem:[%s4791_s1 + $0x20] sm:$0xff]  ;;  %v90_v10 = vld [vmem:[%s4791_s1 + $0x28] sm:$0xff] }
   0x4   :  { %17 = vsyncpa [#allocation7], 0  ;;  %v3265_v12 = vpack.c.bf16 %v90_v10, %v89_v9  ;;  %v91_v13 = vld [vmem:[%s4791_s1 + $0x30] sm:$0xff]  ;;  %v92_v14 = vld [vmem:[%s4791_s1 + $0x38] sm:$0xff]  ;;  %v42_v43 = vlaneseq  ;;  %vm93_vm0 = vcmask 523264   ;;  %s3856_s28 = smov 64  }
   0x5   :  { %3258 = vmatprep.subr.bf16.mxu0 %v3257_v7  ;;  %v176_v15 = vld [vmem:[%s4792_s2 + $0x8] sm:$0xff]  ;;  %v178_v16 = vld [vmem:[%s4792_s2 + $0x18] sm:$0xff]  ;;  %v175_v17 = vld [vmem:[%s4792_s2] sm:$0xff]  ;;  %v3269_v22 = vpack.c.bf16 %v92_v14, %v91_v13  ;;  %vm412_vm5 = vcmask 254976   ;;  %s3857_s29 = smov 32   ;;  %vm653_vm6 = vcmask 259076  }
   0x6   :  { %3260 = vmatpush3.bf16.msra.mxu0 %v3257_v7  ;;  %77 = vperm.xlu0 %3621, %v72_v6   ;;  %v3273_v18 = vpack.c.bf16 %v178_v16, %v176_v15  ;;  %v177_v19 = vld [vmem:[%s4792_s2 + $0x10] sm:$0xff]  ;;  %v180_v20 = vld [vmem:[%s4792_s2 + $0x28] sm:$0xff]  ;;  %v182_v21 = vld [vmem:[%s4792_s2 + $0x38] sm:$0xff]  ;;  %v4023_v44 = vand.u32 127, %v42_v43  ;;  %v4119_v10 = vshrl.u32 %v42_v43, 7  ;;  %vm534_vm7 = vcmask 257026  }
   0x7   :  { %3262 = vmatprep.subr.bf16.mxu0 %v3261_v8  ;;  %v3275_v23 = vpack.c.bf16 %v177_v19, %v175_v17  ;;  %v3277_v24 = vpack.c.bf16 %v182_v21, %v180_v20  ;;  %v179_v25 = vld [vmem:[%s4792_s2 + $0x20] sm:$0xff]  ;;  %v181_v26 = vld [vmem:[%s4792_s2 + $0x30] sm:$0xff]  ;;  %v184_v27 = vld [vmem:[%s4792_s2 + $0x48] sm:$0xff]  ;;  %vm772_vm8 = vcmask 261126   ;;  %vm1276_vm9 = vcmask 261120   ;;  %s3867_s24 = smov [#allocation6]  }
   0x8   :  { %3274 = vmatprep.subr.bf16.mxu1 %v3273_v18  ;;  %v186_v28 = vld [vmem:[%s4792_s2 + $0x58] sm:$0xff]  ;;  %v287_v29 = vld [vmem:[%s4793_s3 + $0x8] sm:$0xff]  ;;  %v3279_v31 = vpack.c.bf16 %v181_v26, %v179_v25  ;;  %v183_v33 = vld [vmem:[%s4792_s2 + $0x40] sm:$0xff]  ;;  %v199_v14 = vsub.s32 1, %v4119_v10  ;;  %v44_v15 = vadd.s32 128, %v4023_v44  ;;  %v49_v18 = vand.u32 63, %v4023_v44 }
   0x9   :  { %v289_v30 = vld [vmem:[%s4793_s3 + $0x18] sm:$0xff]  ;;  %3276 = vmatpush1.bf16.msra.mxu1 %v3275_v23  ;;  %v3281_v32 = vpack.c.bf16 %v186_v28, %v184_v27  ;;  %v185_v34 = vld [vmem:[%s4792_s2 + $0x50] sm:$0xff]  ;;  %v188_v36 = vld [vmem:[%s4792_s2 + $0x68] sm:$0xff]  ;;  %vm3859_vm10 = vmmov 0   ;;  %vm2703_vm11 = vcmask 1041408   ;;  %vm2705_vm12 = vcmask 1043456  }
   0xa   :  { %3264 = vmatpush3.bf16.msra.mxu0 %v3261_v8  ;;  %3278 = vmatprep.subr.bf16.mxu1 %v3277_v24  ;;  %v4006_v35 = vpack.c.bf16 %v289_v30, %v287_v29  ;;  %v190_v37 = vld [vmem:[%s4792_s2 + $0x78] sm:$0xff]  ;;  %v3283_v38 = vpack.c.bf16 %v185_v34, %v183_v33  ;;  %v187_v40 = vld [vmem:[%s4792_s2 + $0x60] sm:$0xff]  ;;  %v189_v41 = vld [vmem:[%s4792_s2 + $0x70] sm:$0xff]  ;;  %v56_v20 = vand.u32 63, %v44_v15  ;;  %vm4132_vm3 = vcmp.lt.s32.totalorder %v49_v18, 32 }
   0xb   :  { %3266 = vmatprep.subr.bf16.mxu0 %v3265_v12  ;;  %v3285_v39 = vpack.c.bf16 %v190_v37, %v188_v36  ;;  %v3287_v42 = vpack.c.bf16 %v189_v41, %v187_v40  ;;  %v286_v46 = vld [vmem:[%s4793_s3] sm:$0xff]  ;;  %v288_v47 = vld [vmem:[%s4793_s3 + $0x10] sm:$0xff]  ;;  %v291_v49 = vld [vmem:[%s4793_s3 + $0x28] sm:$0xff]  ;;  %vm2707_vm13 = vcmask 1045504   ;;  %vm2742_vm14 = vcmask 7168  }
   0xc   :  { %v293_v50 = vld [vmem:[%s4793_s3 + $0x38] sm:$0xff]  ;;  %v4040_v52 = vpack.c.bf16 %v288_v47, %v286_v46  ;;  %v290_v54 = vld [vmem:[%s4793_s3 + $0x20] sm:$0xff]  ;;  %v292_v55 = vld [vmem:[%s4793_s3 + $0x30] sm:$0xff]  ;;  %vm4136_vm4 = vcmp.lt.s32.totalorder %v56_v20, 32  ;;  %vm2744_vm15 = vcmask 15360  }
   0xd   :  { %3280 = vmatpush1.bf16.msra.mxu1 %v3279_v31  ;;  %v4043_v53 = vpack.c.bf16 %v293_v50, %v291_v49  ;;  %v4054_v57 = vpack.c.bf16 %v292_v55, %v290_v54  ;;  %v295_v58 = vld [vmem:[%s4793_s3 + $0x48] sm:$0xff]  ;;  %v297_v59 = vld [vmem:[%s4793_s3 + $0x58] sm:$0xff]  ;;  %v294_v61 = vld [vmem:[%s4793_s3 + $0x40] sm:$0xff] }
   0xe   :  { %3268 = vmatpush3.bf16.msra.mxu0 %v3265_v12  ;;  %3282 = vmatprep.subr.bf16.mxu1 %v3281_v32  ;;  %v4065_v60 = vpack.c.bf16 %v297_v59, %v295_v58  ;;  %v296_v62 = vld [vmem:[%s4793_s3 + $0x50] sm:$0xff]  ;;  %v299_v0 = vld [vmem:[%s4793_s3 + $0x68] sm:$0xff]  ;;  %v301_v1 = vld [vmem:[%s4793_s3 + $0x78] sm:$0xff]  ;;  %v195_v12 = vsub.s32 0, %v4119_v10 }
   0xf   :  { %3270 = vmatprep.subr.bf16.mxu0 %v3269_v22  ;;  %v4073_v63 = vpack.c.bf16 %v296_v62, %v294_v61  ;;  %v4083_v2 = vpack.c.bf16 %v301_v1, %v299_v0  ;;  %v298_v3 = vld [vmem:[%s4793_s3 + $0x60] sm:$0xff]  ;;  %v300_v4 = vld [vmem:[%s4793_s3 + $0x70] sm:$0xff] }
  0x10   :  { %v4091_v5 = vpack.c.bf16 %v300_v4, %v298_v3  ;;  %v191_v13 = vld [vmem:[%s4794_s4] sm:$0x3] }
  0x11   :  { %3284 = vmatpush1.bf16.msra.mxu1 %v3283_v38  ;;  %v196_v16 = vrot.slane %v191_v13, %v195_v12  ;;  %v200_v17 = vrot.slane %v191_v13, %v199_v14 }
  0x12   :  { %3272 = vmatpush3.bf16.msra.mxu0 %v3269_v22  ;;  %3286 = vmatprep.subr.bf16.mxu1 %v3285_v39 }
  0x13   :  { %3290 = vmatprep.subr.bf16.mxu0 %v4006_v35 }
  0x15   :  { %3288 = vmatpush1.bf16.msra.mxu1 %v3287_v42 }
  0x16   :  { %3306 = vmatprep.subr.bf16.mxu1 %v4006_v35 }
  0x81   :  { %v75_v45 = vpop.permute.xlu0 %74 }
  0x82   :  { %vm79_vm1 = vcmp.eq.s32.totalorder %v4023_v44, %v75_v45 }
  0x83   :  { %v3034_v48 = vsel %vm79_vm1, 1.0, %v3855_v11  ;;  %vm2746_vm1 = vcmask 23552  }
  0x84   :  { %3191 = vmatprep.mubr.msk.f32.mxu0 %vm93_vm0, %v3034_v48 }
  0x85   :  { %v78_v51 = vpop.permute.xlu0 %77 }
  0x86   :  { %vm80_vm2 = vcmp.eq.s32.totalorder %v4023_v44, %v78_v51 }
  0x87   :  { %v3035_v56 = vsel %vm80_vm2, 1.0, %v3855_v11  ;;  %vm2748_vm2 = vcmask 31744  }
  0x88   :  { %3192 = vmatmul.mubr.msk.f32.vlgmr.msra.gmra.mrb[0].mxu0 %vm93_vm0, %v3035_v56 }
  0x89   :  { %3292 = vmatpush1.bf16.msra.mxu0 %v4040_v52  ;;  %377 = vmatprep.mubr.f32.mxu0 %v3855_v11 }
  0x8a   :  { %3294 = vmatprep.subr.bf16.mxu0 %v4043_v53 }
  0x8d   :  { %3296 = vmatpush1.bf16.msra.mxu0 %v4054_v57 }
  0x8e   :  { %3298 = vmatprep.subr.bf16.mxu0 %v4065_v60 }
  0x91   :  { %3300 = vmatpush1.bf16.msra.mxu0 %v4073_v63 }
  0x92   :  { %3302 = vmatprep.subr.bf16.mxu0 %v4083_v2 }
  0x95   :  { %3304 = vmatpush1.bf16.msra.mxu0 %v4091_v5 }
  0x96   :  { %3322 = vmatprep.subr.bf16.mxu0 %v4006_v35 }
  0x98   :  { %378 = vmatmul.mubr.f32.vlgmr.msra.gmra.mrb[2].mxu0 %v3855_v11 }
  0x99   :  { %3324 = vmatpush1.bf16.msra.mxu0 %v4040_v52  ;;  %609 = vmatprep.mubr.f32.mxu0 %v3855_v11 }
  0x9a   :  { %3326 = vmatprep.subr.bf16.mxu0 %v4043_v53 }
  0x9d   :  { %3328 = vmatpush1.bf16.msra.mxu0 %v4054_v57 }
  0x9e   :  { %3330 = vmatprep.subr.bf16.mxu0 %v4065_v60 }
  0xa1   :  { %3332 = vmatpush1.bf16.msra.mxu0 %v4073_v63 }
  0xa2   :  { %3334 = vmatprep.subr.bf16.mxu0 %v4083_v2 }
  0xa5   :  { %3336 = vmatpush1.bf16.msra.mxu0 %v4091_v5 }
  0xa6   :  { %3354 = vmatprep.subr.bf16.mxu0 %v4006_v35 }
 0x15b   :  { %v3193_v6 = vpop.f32.mrb[0].mxu0 }
 0x15c   :  { %v166_v7 = vpop.f32.mrb[1].mxu0 }
 0x15d   :  { %3038 = vmatmul.mubr.msk.f32.vlgmr.msra.gmra.mrb[0].mxu1 %vm93_vm0, %v166_v7 }
 0x15e   :  { %279 = vmatprep.mubr.f32.mxu1 %v3855_v11  ;;  %3308 = vmatpush1.bf16.msra.mxu1 %v4040_v52 }
 0x15f   :  { %3310 = vmatprep.subr.bf16.mxu1 %v4043_v53 }
 0x161   :  { %3039 = vmatmul.mubr.msk.f32.gmra.mrb[2].mxu1 %vm93_vm0, %v3193_v6 }
 0x162   :  { %3312 = vmatpush1.bf16.msra.mxu1 %v4054_v57  ;;  %490 = vmatprep.mubr.f32.mxu1 %v3855_v11 }
 0x163   :  { %3314 = vmatprep.subr.bf16.mxu1 %v4065_v60 }
 0x166   :  { %3316 = vmatpush1.bf16.msra.mxu1 %v4073_v63 }
 0x167   :  { %3318 = vmatprep.subr.bf16.mxu1 %v4083_v2 }
 0x16a   :  { %3320 = vmatpush1.bf16.msra.mxu1 %v4091_v5 }
 0x16b   :  { %3338 = vmatprep.subr.bf16.mxu1 %v4006_v35  ;;  %v379_v8 = vpop.f32.mrb[2].mxu0 }
 0x16c   :  { %v381_v9 = vpop.f32.mrb[3].mxu0 }
 0x230   :  { %v275_v19 = vpop.f32.mrb[0].mxu1 }
 0x231   :  { %v276_v21 = vadd.f32 %v275_v19, %v196_v16  ;;  %v277_v22 = vpop.f32.mrb[1].mxu1 }
 0x232   :  { %v278_v23 = vadd.f32 %v277_v22, %v200_v17 }
 0x233   :  { %v780_v29 = vrot.slane %v276_v21, 6  ;;  %v898_v30 = vrot.slane %v276_v21, 2 }
 0x234   :  { %v281_v25 = vpop.f32.mrb[2].mxu1  ;;  %v781_v32 = vrot.slane %v278_v23, 6  ;;  %v899_v33 = vrot.slane %v278_v23, 2 }
 0x235   :  { %v282_v26 = vadd.f32 %v281_v25, %v196_v16  ;;  %v283_v27 = vpop.f32.mrb[3].mxu1 }
 0x236   :  { %v284_v31 = vadd.f32 %v283_v27, %v200_v17 }
 0x237   :  { %v304_v34 = vrot.slane %v282_v26, 6  ;;  %v418_v36 = vrot.slane %v282_v26, 2  ;;  %v4142_v37 = vsel %vm4132_vm3, %v282_v26, %v780_v29  ;;  %v4146_v38 = vsel %vm4132_vm3, %v282_v26, %v898_v30 }
 0x238   :  { %v305_v39 = vrot.slane %v284_v31, 6  ;;  %v419_v40 = vrot.slane %v284_v31, 2  ;;  %v4150_v41 = vsel %vm4136_vm4, %v284_v31, %v781_v32  ;;  %v4154_v42 = vsel %vm4136_vm4, %v284_v31, %v899_v33 }
 0x239   :  { %v4158_v43 = vsel %vm4132_vm3, %v276_v21, %v304_v34  ;;  %v4162_v44 = vsel %vm4132_vm3, %v276_v21, %v418_v36 }
 0x23a   :  { %v384_v45 = vadd.f32 %v379_v8, %v4158_v43  ;;  %v4167_v46 = vsel %vm4136_vm4, %v278_v23, %v305_v39  ;;  %v4171_v47 = vsel %vm4136_vm4, %v278_v23, %v419_v40 }
 0x23b   :  { %v385_v49 = vadd.f32 %v381_v9, %v4167_v46 }
 0x23c   :  { %v3040_v48 = vmul.f32 -1.442695, %v384_v45 }
 0x23d   :  { %v3041_v58 = vmul.f32 -1.442695, %v385_v49 }
 0x23e   :  { %3630 = vpow2.f32 %v3040_v48 }
 0x23f   :  { %3632 = vtanh.f32 %v385_v49 }
 0x248   :  { %v3631_v50 = vpop.eup %3630 }
 0x249   :  { %v392_v51 = vadd.f32 1.0, %v3631_v50  ;;  %v3633_v54 = vpop.eup %3632 }
 0x24b   :  { %3634 = vrcp.f32 %v392_v51 }
 0x24c   :  { %3636 = vpow2.f32 %v3041_v58 }
 0x255   :  { %v3635_v55 = vpop.eup %3634 }
 0x256   :  { %v400_v56 = vmul.f32 %v3635_v55, %v3633_v54  ;;  %v3637_v59 = vpop.eup %3636  ;;  %v399_v62 = vmul.f32 0.0, %v3635_v55 }
 0x257   :  { %v393_v61 = vadd.f32 1.0, %v3637_v59 }
 0x258   :  { %402 = vrot.lane.b32.xlu1 %v400_v56, %s3856_s28 }
 0x259   :  { %3638 = vrcp.f32 %v393_v61 }
 0x263   :  { %v3639_v3 = vpop.eup %3638 }
 0x2ca   :  { %v403_v0 = vpop.permute.xlu1 %402 }
 0x2cb   :  { %v405_v1 = vadd.f32 %v403_v0, %v399_v62 }
 0x2cd   :  { %3640 = vtanh.f32 %v405_v1  ;;  %v519_v22 = vrot.slane %v405_v1, 6 }
 0x2d7   :  { %v3641_v4 = vpop.eup %3640 }
 0x2d8   :  { %v4175_v6 = vmul.f32 %v3641_v4, %v3639_v3 }
 0x2da   :  { %409 = vrot.lane.b32.xlu1 %v4175_v6, %s3856_s28 }
 0x34c   :  { %v410_v7 = vpop.permute.xlu1 %409 }
 0x34d   :  { %413 = vst.msk [vmem:[#allocation2] sm:$0x3] %vm412_vm5, %v410_v7  ;;  %3042 = vmatmul.mubr.msk.f32.vlgmr.msra.gmra.mrb[4].mxu1 %vm93_vm0, %v410_v7 }
 0x34e   :  { %3340 = vmatpush1.bf16.msra.mxu1 %v4040_v52  ;;  %728 = vmatprep.mubr.f32.mxu1 %v3855_v11 }
 0x34f   :  { %3342 = vmatprep.subr.bf16.mxu1 %v4043_v53 }
 0x352   :  { %3344 = vmatpush1.bf16.msra.mxu1 %v4054_v57 }
 0x353   :  { %3346 = vmatprep.subr.bf16.mxu1 %v4065_v60 }
 0x356   :  { %3348 = vmatpush1.bf16.msra.mxu1 %v4073_v63 }
 0x357   :  { %3350 = vmatprep.subr.bf16.mxu1 %v4083_v2 }
 0x35a   :  { %3352 = vmatpush1.bf16.msra.mxu1 %v4091_v5 }
 0x35b   :  { %3370 = vmatprep.subr.bf16.mxu1 %v4006_v35 }
 0x420   :  { %v492_v8 = vpop.f32.mrb[4].mxu1 }
 0x421   :  { %v499_v9 = vrot.slane %v492_v8, 6  ;;  %v494_v13 = vpop.f32.mrb[5].mxu1 }
 0x422   :  { %v500_v17 = vrot.slane %v494_v13, 6 }
 0x423   :  { %v503_v15 = vadd.f32 %v499_v9, %v4162_v44 }
 0x424   :  { %v504_v18 = vadd.f32 %v500_v17, %v4171_v47 }
 0x425   :  { %v3043_v16 = vmul.f32 -1.442695, %v503_v15 }
 0x426   :  { %v3044_v27 = vmul.f32 -1.442695, %v504_v18 }
 0x427   :  { %3642 = vpow2.f32 %v3043_v16 }
 0x428   :  { %3644 = vtanh.f32 %v504_v18 }
 0x431   :  { %v3643_v19 = vpop.eup %3642 }
 0x432   :  { %v511_v20 = vadd.f32 1.0, %v3643_v19  ;;  %v3645_v21 = vpop.eup %3644 }
 0x434   :  { %3646 = vrcp.f32 %v511_v20 }
 0x435   :  { %3648 = vpow2.f32 %v3044_v27 }
 0x43e   :  { %v3647_v23 = vpop.eup %3646 }
 0x43f   :  { %v522_v25 = vmul.f32 %v3647_v23, %v3645_v21  ;;  %v521_v26 = vmul.f32 %v3647_v23, %v519_v22  ;;  %v3649_v29 = vpop.eup %3648 }
 0x440   :  { %v512_v30 = vadd.f32 1.0, %v3649_v29 }
 0x441   :  { %524 = vrot.lane.b32.xlu0 %v522_v25, %s3856_s28 }
 0x442   :  { %3650 = vrcp.f32 %v512_v30 }
 0x44c   :  { %v3651_v33 = vpop.eup %3650 }
 0x4b3   :  { %v525_v31 = vpop.permute.xlu0 %524 }
 0x4b4   :  { %v527_v32 = vadd.f32 %v525_v31, %v521_v26 }
 0x4b6   :  { %3652 = vtanh.f32 %v527_v32  ;;  %v638_v61 = vrot.slane %v527_v32, 6 }
 0x4c0   :  { %v3653_v34 = vpop.eup %3652 }
 0x4c1   :  { %v4193_v36 = vmul.f32 %v3653_v34, %v3651_v33 }
 0x4c3   :  { %v540_v39 = vrot.slane %v4193_v36, 2 }
 0x4c5   :  { %541 = vrot.lane.b32.xlu1 %v540_v39, %s3856_s28 }
 0x537   :  { %v542_v40 = vpop.permute.xlu1 %541 }
 0x538   :  { %3045 = vmatmul.mubr.msk.f32.vlgmr.msra.gmra.mrb[4].mxu0 %vm93_vm0, %v542_v40 }
 0x539   :  { %3356 = vmatpush1.bf16.msra.mxu0 %v4040_v52  ;;  %855 = vmatprep.mubr.f32.mxu0 %v3855_v11 }
 0x53a   :  { %3358 = vmatprep.subr.bf16.mxu0 %v4043_v53 }
 0x53d   :  { %3360 = vmatpush1.bf16.msra.mxu0 %v4054_v57 }
 0x53e   :  { %3362 = vmatprep.subr.bf16.mxu0 %v4065_v60 }
 0x541   :  { %3364 = vmatpush1.bf16.msra.mxu0 %v4073_v63 }
 0x542   :  { %3366 = vmatprep.subr.bf16.mxu0 %v4083_v2 }
 0x545   :  { %3368 = vmatpush1.bf16.msra.mxu0 %v4091_v5 }
 0x546   :  { %3386 = vmatprep.subr.bf16.mxu0 %v4006_v35 }
 0x60b   :  { %v611_v45 = vpop.f32.mrb[4].mxu0 }
 0x60c   :  { %v618_v48 = vrot.slane %v611_v45, 4  ;;  %v613_v49 = vpop.f32.mrb[5].mxu0 }
 0x60d   :  { %v619_v54 = vrot.slane %v613_v49, 4 }
 0x60e   :  { %v622_v50 = vadd.f32 %v618_v48, %v4158_v43 }
 0x60f   :  { %v623_v55 = vadd.f32 %v619_v54, %v4167_v46 }
 0x610   :  { %v3046_v51 = vmul.f32 -1.442695, %v622_v50 }
 0x611   :  { %v3047_v3 = vmul.f32 -1.442695, %v623_v55 }
 0x612   :  { %3654 = vpow2.f32 %v3046_v51 }
 0x613   :  { %3656 = vtanh.f32 %v623_v55 }
 0x61c   :  { %v3655_v56 = vpop.eup %3654 }
 0x61d   :  { %v630_v58 = vadd.f32 1.0, %v3655_v56  ;;  %v3657_v59 = vpop.eup %3656 }
 0x61f   :  { %3658 = vrcp.f32 %v630_v58 }
 0x620   :  { %3660 = vpow2.f32 %v3047_v3 }
 0x629   :  { %v3659_v62 = vpop.eup %3658 }
 0x62a   :  { %v641_v0 = vmul.f32 %v3659_v62, %v3657_v59  ;;  %v640_v1 = vmul.f32 %v3659_v62, %v638_v61  ;;  %v3661_v4 = vpop.eup %3660 }
 0x62b   :  { %v631_v43 = vadd.f32 1.0, %v3661_v4 }
 0x62c   :  { %643 = vrot.lane.b32.xlu0 %v641_v0, %s3856_s28 }
 0x62d   :  { %3662 = vrcp.f32 %v631_v43 }
 0x637   :  { %v3663_v46 = vpop.eup %3662 }
 0x69e   :  { %v644_v7 = vpop.permute.xlu0 %643 }
 0x69f   :  { %v646_v8 = vadd.f32 %v644_v7, %v640_v1 }
 0x6a1   :  { %3664 = vtanh.f32 %v646_v8  ;;  %v757_v29 = vrot.slane %v646_v8, 6 }
 0x6ab   :  { %v3665_v9 = vpop.eup %3664 }
 0x6ac   :  { %v4210_v13 = vmul.f32 %v3665_v9, %v3663_v46 }
 0x6ae   :  { %v659_v15 = vrot.slane %v4210_v13, 4 }
 0x6b0   :  { %660 = vrot.lane.b32.xlu1 %v659_v15, %s3856_s28 }
 0x722   :  { %v661_v16 = vpop.permute.xlu1 %660 }
 0x723   :  { %3048 = vmatmul.mubr.msk.f32.vlgmr.msra.gmra.mrb[6].mxu1 %vm93_vm0, %v661_v16 }
 0x724   :  { %3372 = vmatpush1.bf16.msra.mxu1 %v4040_v52  ;;  %970 = vmatprep.mubr.f32.mxu1 %v3855_v11 }
 0x725   :  { %3374 = vmatprep.subr.bf16.mxu1 %v4043_v53 }
 0x728   :  { %3376 = vmatpush1.bf16.msra.mxu1 %v4054_v57 }
 0x729   :  { %3378 = vmatprep.subr.bf16.mxu1 %v4065_v60 }
 0x72c   :  { %3380 = vmatpush1.bf16.msra.mxu1 %v4073_v63 }
 0x72d   :  { %3382 = vmatprep.subr.bf16.mxu1 %v4083_v2 }
 0x730   :  { %3384 = vmatpush1.bf16.msra.mxu1 %v4091_v5 }
 0x731   :  { %3402 = vmatprep.subr.bf16.mxu1 %v4006_v35 }
 0x7f6   :  { %v730_v17 = vpop.f32.mrb[6].mxu1 }
 0x7f7   :  { %v737_v18 = vrot.slane %v730_v17, 2  ;;  %v732_v19 = vpop.f32.mrb[7].mxu1 }
 0x7f8   :  { %v738_v22 = vrot.slane %v732_v19, 2 }
 0x7f9   :  { %v741_v20 = vadd.f32 %v737_v18, %v4162_v44 }
 0x7fa   :  { %v742_v23 = vadd.f32 %v738_v22, %v4171_v47 }
 0x7fb   :  { %v3049_v21 = vmul.f32 -1.442695, %v741_v20 }
 0x7fc   :  { %v3050_v35 = vmul.f32 -1.442695, %v742_v23 }
 0x7fd   :  { %3666 = vpow2.f32 %v3049_v21 }
 0x7fe   :  { %3668 = vtanh.f32 %v742_v23 }
 0x807   :  { %v3667_v25 = vpop.eup %3666 }
 0x808   :  { %v749_v26 = vadd.f32 1.0, %v3667_v25  ;;  %v3669_v27 = vpop.eup %3668 }
 0x80a   :  { %3670 = vrcp.f32 %v749_v26 }
 0x80b   :  { %3672 = vpow2.f32 %v3050_v35 }
 0x814   :  { %v3671_v30 = vpop.eup %3670 }
 0x815   :  { %v760_v31 = vmul.f32 %v3671_v30, %v3669_v27  ;;  %v759_v32 = vmul.f32 %v3671_v30, %v757_v29  ;;  %v3673_v33 = vpop.eup %3672 }
 0x816   :  { %v750_v44 = vadd.f32 1.0, %v3673_v33 }
 0x817   :  { %762 = vrot.lane.b32.xlu0 %v760_v31, %s3856_s28 }
 0x818   :  { %3674 = vrcp.f32 %v750_v44 }
 0x822   :  { %v3675_v47 = vpop.eup %3674 }
 0x889   :  { %v763_v34 = vpop.permute.xlu0 %762 }
 0x88a   :  { %v765_v39 = vadd.f32 %v763_v34, %v759_v32 }
 0x88c   :  { %3676 = vtanh.f32 %v765_v39  ;;  %v878_v62 = vrot.slane %v765_v39, 6 }
 0x896   :  { %v3677_v40 = vpop.eup %3676 }
 0x897   :  { %v4227_v45 = vmul.f32 %v3677_v40, %v3675_v47 }
 0x899   :  { %v786_v48 = vrot.slane %v4227_v45, 6 }
 0x89b   :  { %787 = vrot.lane.b32.xlu1 %v786_v48, %s3856_s28 }
 0x90d   :  { %v788_v49 = vpop.permute.xlu1 %787 }
 0x90e   :  { %3051 = vmatmul.mubr.msk.f32.vlgmr.msra.gmra.mrb[6].mxu0 %vm93_vm0, %v788_v49 }
 0x90f   :  { %3388 = vmatpush1.bf16.msra.mxu0 %v4040_v52  ;;  %1088 = vmatprep.mubr.f32.mxu0 %v3855_v11 }
 0x910   :  { %3390 = vmatprep.subr.bf16.mxu0 %v4043_v53 }
 0x913   :  { %3392 = vmatpush1.bf16.msra.mxu0 %v4054_v57 }
 0x914   :  { %3394 = vmatprep.subr.bf16.mxu0 %v4065_v60 }
 0x917   :  { %3396 = vmatpush1.bf16.msra.mxu0 %v4073_v63 }
 0x918   :  { %3398 = vmatprep.subr.bf16.mxu0 %v4083_v2 }
 0x91b   :  { %3400 = vmatpush1.bf16.msra.mxu0 %v4091_v5 }
 0x9e1   :  { %v857_v50 = vpop.f32.mrb[6].mxu0 }
 0x9e2   :  { %v862_v51 = vadd.f32 %v857_v50, %v4142_v37  ;;  %v859_v54 = vpop.f32.mrb[7].mxu0 }
 0x9e3   :  { %v863_v56 = vadd.f32 %v859_v54, %v4150_v41 }
 0x9e4   :  { %v3052_v55 = vmul.f32 -1.442695, %v862_v51 }
 0x9e5   :  { %v3053_v4 = vmul.f32 -1.442695, %v863_v56 }
 0x9e6   :  { %3678 = vpow2.f32 %v3052_v55 }
 0x9e7   :  { %3680 = vtanh.f32 %v863_v56 }
 0x9f0   :  { %v3679_v58 = vpop.eup %3678 }
 0x9f1   :  { %v870_v59 = vadd.f32 1.0, %v3679_v58  ;;  %v3681_v61 = vpop.eup %3680 }
 0x9f3   :  { %3682 = vrcp.f32 %v870_v59 }
 0x9f4   :  { %3684 = vpow2.f32 %v3053_v4 }
 0x9fd   :  { %v3683_v0 = vpop.eup %3682 }
 0x9fe   :  { %v881_v1 = vmul.f32 %v3683_v0, %v3681_v61  ;;  %v880_v3 = vmul.f32 %v3683_v0, %v878_v62  ;;  %v3685_v43 = vpop.eup %3684 }
 0x9ff   :  { %v871_v7 = vadd.f32 1.0, %v3685_v43 }
 0xa00   :  { %883 = vrot.lane.b32.xlu0 %v881_v1, %s3856_s28 }
 0xa01   :  { %3686 = vrcp.f32 %v871_v7 }
 0xa0b   :  { %v3687_v9 = vpop.eup %3686 }
 0xa72   :  { %v884_v8 = vpop.permute.xlu0 %883 }
 0xa73   :  { %v886_v46 = vadd.f32 %v884_v8, %v880_v3 }
 0xa75   :  { %3688 = vtanh.f32 %v886_v46 }
 0xa7f   :  { %v3689_v15 = vpop.eup %3688 }
 0xa80   :  { %v4243_v16 = vmul.f32 %v3689_v15, %v3687_v9 }
 0xa82   :  { %890 = vrot.lane.b32.xlu1 %v4243_v16, %s3856_s28 }
 0xaf4   :  { %v891_v17 = vpop.permute.xlu1 %890 }
 0xaf5   :  { %893 = vst.msk [vmem:[#allocation2 + $0x8] sm:$0x3] %vm412_vm5, %v891_v17  ;;  %3054 = vmatmul.mubr.msk.f32.vlgmr.msra.gmra.mrb[8].mxu1 %vm93_vm0, %v891_v17 }
 0xaf6   :  { %3404 = vmatpush1.bf16.msra.mxu1 %v4040_v52  ;;  %1206 = vmatprep.mubr.f32.mxu1 %v3855_v11 }
 0xaf7   :  { %3406 = vmatprep.subr.bf16.mxu1 %v4043_v53 }
 0xafa   :  { %3408 = vmatpush1.bf16.msra.mxu1 %v4054_v57 }
 0xafb   :  { %3410 = vmatprep.subr.bf16.mxu1 %v4065_v60 }
 0xafe   :  { %3412 = vmatpush1.bf16.msra.mxu1 %v4073_v63  ;;  %v999_v63 = vrot.slane %v886_v46, 6 }
 0xaff   :  { %3414 = vmatprep.subr.bf16.mxu1 %v4083_v2 }
 0xb02   :  { %3416 = vmatpush1.bf16.msra.mxu1 %v4091_v5 }
 0xbc8   :  { %v972_v18 = vpop.f32.mrb[8].mxu1 }
 0xbc9   :  { %v979_v19 = vrot.slane %v972_v18, 6  ;;  %v974_v20 = vpop.f32.mrb[9].mxu1 }
 0xbca   :  { %v980_v22 = vrot.slane %v974_v20, 6 }
 0xbcb   :  { %v983_v21 = vadd.f32 %v979_v19, %v4146_v38 }
 0xbcc   :  { %v984_v53 = vadd.f32 %v980_v22, %v4154_v42 }
 0xbcd   :  { %v3055_v52 = vmul.f32 -1.442695, %v983_v21 }
 0xbce   :  { %v3056_v5 = vmul.f32 -1.442695, %v984_v53 }
 0xbcf   :  { %3690 = vpow2.f32 %v3055_v52 }
 0xbd0   :  { %3692 = vtanh.f32 %v984_v53 }
 0xbd9   :  { %v3691_v23 = vpop.eup %3690 }
 0xbda   :  { %v991_v57 = vadd.f32 1.0, %v3691_v23  ;;  %v3693_v60 = vpop.eup %3692 }
 0xbdc   :  { %3694 = vrcp.f32 %v991_v57 }
 0xbdd   :  { %3696 = vpow2.f32 %v3056_v5 }
 0xbe6   :  { %v3695_v25 = vpop.eup %3694 }
 0xbe7   :  { %v1002_v2 = vmul.f32 %v3695_v25, %v3693_v60  ;;  %v1001_v26 = vmul.f32 %v3695_v25, %v999_v63  ;;  %v3697_v27 = vpop.eup %3696 }
 0xbe8   :  { %v992_v29 = vadd.f32 1.0, %v3697_v27 }
 0xbe9   :  { %1004 = vrot.lane.b32.xlu0 %v1002_v2, %s3856_s28 }
 0xbea   :  { %3698 = vrcp.f32 %v992_v29 }
 0xbf4   :  { %v3699_v32 = vpop.eup %3698 }
 0xc5b   :  { %v1005_v30 = vpop.permute.xlu0 %1004 }
 0xc5c   :  { %v1007_v31 = vadd.f32 %v1005_v30, %v1001_v26 }
 0xc5e   :  { %3700 = vtanh.f32 %v1007_v31  ;;  %v1117_v58 = vrot.slane %v1007_v31, 6 }
 0xc68   :  { %v3701_v35 = vpop.eup %3700 }
 0xc69   :  { %v4260_v33 = vmul.f32 %v3701_v35, %v3699_v32 }
 0xc6b   :  { %v1019_v44 = vrot.slane %v4260_v33, 2 }
 0xc6d   :  { %1020 = vrot.lane.b32.xlu1 %v1019_v44, %s3856_s28 }
 0xcdf   :  { %v1021_v34 = vpop.permute.xlu1 %1020 }
 0xce0   :  { %3057 = vmatmul.mubr.msk.f32.vlgmr.msra.gmra.mrb[8].mxu0 %vm93_vm0, %v1021_v34 }
 0xce1   :  { %1347 = vmatprep.mubr.f32.mxu0 %v3855_v11 }
 0xdb3   :  { %v1090_v39 = vpop.f32.mrb[8].mxu0 }
 0xdb4   :  { %v1097_v47 = vrot.slane %v1090_v39, 4  ;;  %v1092_v40 = vpop.f32.mrb[9].mxu0  ;;  %v3076_v39 = vld [vmem:[%s4792_s2 + $0xe8] sm:$0xff] }
 0xdb5   :  { %v1098_v50 = vrot.slane %v1092_v40, 4 }
 0xdb6   :  { %v1101_v48 = vadd.f32 %v1097_v47, %v4142_v37  ;;  %v3078_v47 = vld [vmem:[%s4792_s2 + $0xf8] sm:$0xff] }
 0xdb7   :  { %v1102_v51 = vadd.f32 %v1098_v50, %v4150_v41  ;;  %v3077_v50 = vld [vmem:[%s4792_s2 + $0xf0] sm:$0xff] }
 0xdb8   :  { %v3058_v49 = vmul.f32 -1.442695, %v1101_v48  ;;  %v3421_v48 = vpack.c.bf16 %v3078_v47, %v3076_v39  ;;  %v3083_v39 = vld [vmem:[%s4794_s4 + $0x2] sm:$0x3] }
 0xdb9   :  { %v3059_v0 = vmul.f32 -1.442695, %v1102_v51  ;;  %v1449_v47 = vrot.slane %v3083_v39, %v195_v12 }
 0xdba   :  { %3702 = vpow2.f32 %v3058_v49  ;;  %v3075_v49 = vld [vmem:[%s4792_s2 + $0xe0] sm:$0xff] }
 0xdbb   :  { %3704 = vtanh.f32 %v1102_v51  ;;  %v3423_v51 = vpack.c.bf16 %v3077_v50, %v3075_v49 }
 0xdc4   :  { %v3703_v54 = vpop.eup %3702 }
 0xdc5   :  { %v1109_v55 = vadd.f32 1.0, %v3703_v54  ;;  %v3705_v56 = vpop.eup %3704  ;;  %v3064_v54 = vld [vmem:[%s4792_s2 + $0x88] sm:$0xff] }
 0xdc7   :  { %3706 = vrcp.f32 %v1109_v55  ;;  %v3066_v55 = vld [vmem:[%s4792_s2 + $0x98] sm:$0xff] }
 0xdc8   :  { %3708 = vpow2.f32 %v3059_v0  ;;  %v3084_v0 = vld [vmem:[%s4793_s3 + $0x80] sm:$0xff] }
 0xdd1   :  { %v3707_v59 = vpop.eup %3706 }
 0xdd2   :  { %v1120_v61 = vmul.f32 %v3707_v59, %v3705_v56  ;;  %v1119_v62 = vmul.f32 %v3707_v59, %v1117_v58  ;;  %v3709_v1 = vpop.eup %3708  ;;  %v3425_v58 = vpack.c.bf16 %v3066_v55, %v3064_v54  ;;  %v3085_v59 = vld [vmem:[%s4793_s3 + $0x88] sm:$0xff] }
 0xdd3   :  { %v1110_v37 = vadd.f32 1.0, %v3709_v1  ;;  %v3086_v1 = vld [vmem:[%s4793_s3 + $0x90] sm:$0xff] }
 0xdd4   :  { %1122 = vrot.lane.b32.xlu0 %v1120_v61, %s3856_s28  ;;  %v3087_v61 = vld [vmem:[%s4793_s3 + $0x98] sm:$0xff] }
 0xdd5   :  { %3710 = vrcp.f32 %v1110_v37  ;;  %v4347_v37 = vpack.c.bf16 %v3086_v1, %v3084_v0 }
 0xddf   :  { %v3711_v41 = vpop.eup %3710 }
 0xe46   :  { %v1123_v3 = vpop.permute.xlu0 %1122 }
 0xe47   :  { %v1125_v4 = vadd.f32 %v1123_v3, %v1119_v62  ;;  %v4338_v62 = vpack.c.bf16 %v3087_v61, %v3085_v59 }
 0xe49   :  { %3712 = vtanh.f32 %v1125_v4  ;;  %v1235_v2 = vrot.slane %v1125_v4, 6  ;;  %3434 = vmatprep.subr.bf16.mxu1 %v4338_v62 }
 0xe53   :  { %v3713_v43 = vpop.eup %3712 }
 0xe54   :  { %v1127_v7 = vmul.f32 %v3713_v43, %v3711_v41  ;;  %v3089_v41 = vld [vmem:[%s4793_s3 + $0xa8] sm:$0xff] }
 0xe56   :  { %v1137_v8 = vrot.slane %v1127_v7, 4 }
 0xe58   :  { %1138 = vrot.lane.b32.xlu1 %v1137_v8, %s3856_s28 }
 0xe5c   :  { %894 = vrot.lane.b32.xlu1 %v4243_v16, %s3857_s29 }
 0xe60   :  { %1133 = vrot.lane.b32.xlu1 %v1127_v7, %s3857_s29 }
 0xe64   :  { %414 = vrot.lane.b32.xlu1 %v4175_v6, %s3857_s29 }
 0xe68   :  { %655 = vrot.lane.b32.xlu1 %v4210_v13, %s3857_s29 }
 0xe6c   :  { %531 = vrot.lane.b32.xlu1 %v4193_v36, %s3856_s28 }
 0xe70   :  { %769 = vrot.lane.b32.xlu1 %v4227_v45, %s3856_s28 }
 0xe74   :  { %1129 = vrot.lane.b32.xlu1 %v1127_v7, %s3856_s28  ;;  %v3091_v7 = vld [vmem:[%s4793_s3 + $0xb8] sm:$0xff] }
 0xeca   :  { %v1139_v46 = vpop.permute.xlu1 %1138 }
 0xecb   :  { %3060 = vmatmul.mubr.msk.f32.vlgmr.msra.gmra.mrb[10].mxu1 %vm93_vm0, %v1139_v46  ;;  %v4357_v46 = vpack.c.bf16 %v3091_v7, %v3089_v41 }
 0xecc   :  { %1549 = vmatprep.mubr.f32.mxu1 %v3855_v11  ;;  %3436 = vmatpush1.bf16.msra.mxu1 %v4347_v37 }
 0xecd   :  { %3438 = vmatprep.subr.bf16.mxu1 %v4357_v46 }
 0xece   :  { %v895_v9 = vpop.permute.xlu1 %894 }
 0xecf   :  { %897 = vst.msk [vmem:[#allocation3 + $0x6] sm:$0x3] %vm412_vm5, %v895_v9  ;;  %v3088_v9 = vld [vmem:[%s4793_s3 + $0xa0] sm:$0xff] }
 0xed2   :  { %v1134_v6 = vpop.permute.xlu1 %1133 }
 0xed3   :  { %1136 = vst.msk [vmem:[#allocation3 - $0x2] sm:$0x30] %vm653_vm6, %v1134_v6  ;;  %v3090_v6 = vld [vmem:[%s4793_s3 + $0xb0] sm:$0xff] }
 0xed6   :  { %v415_v15 = vpop.permute.xlu1 %414 }
 0xed7   :  { %417 = vst.msk [vmem:[#allocation3 + $0xe] sm:$0x3] %vm412_vm5, %v415_v15  ;;  %v4365_v15 = vpack.c.bf16 %v3090_v6, %v3088_v9 }
 0xed9   :  { %3440 = vmatpush1.bf16.msra.mxu1 %v4365_v15 }
 0xeda   :  { %v656_v16 = vpop.permute.xlu1 %655 }
 0xedb   :  { %658 = vst.msk [vmem:[#allocation3 + $0x6] sm:$0x30] %vm653_vm6, %v656_v16  ;;  %v3093_v16 = vld [vmem:[%s4793_s3 + $0xc8] sm:$0xff] }
 0xede   :  { %v532_v17 = vpop.permute.xlu1 %531 }
 0xedf   :  { %535 = vst.msk [vmem:[#allocation2] sm:$0xc] %vm534_vm7, %v532_v17  ;;  %v3095_v17 = vld [vmem:[%s4793_s3 + $0xd8] sm:$0xff] }
 0xee2   :  { %v770_v18 = vpop.permute.xlu1 %769 }
 0xee3   :  { %773 = vst.msk [vmem:[#allocation2] sm:$0xc0] %vm772_vm8, %v770_v18  ;;  %v4376_v18 = vpack.c.bf16 %v3095_v17, %v3093_v16 }
 0xee5   :  { %3442 = vmatprep.subr.bf16.mxu1 %v4376_v18 }
 0xee6   :  { %v1130_v19 = vpop.permute.xlu1 %1129 }
 0xee7   :  { %1132 = vst.msk [vmem:[#allocation2 + $0x8] sm:$0x30] %vm653_vm6, %v1130_v19  ;;  %v3092_v19 = vld [vmem:[%s4793_s3 + $0xc0] sm:$0xff] }
 0xf9e   :  { %v1208_v20 = vpop.f32.mrb[10].mxu1 }
 0xf9f   :  { %v1215_v21 = vrot.slane %v1208_v20, 2  ;;  %v1210_v52 = vpop.f32.mrb[11].mxu1  ;;  %v3094_v20 = vld [vmem:[%s4793_s3 + $0xd0] sm:$0xff] }
 0xfa0   :  { %v1216_v23 = vrot.slane %v1210_v52, 2  ;;  %v3097_v52 = vld [vmem:[%s4793_s3 + $0xe8] sm:$0xff] }
 0xfa1   :  { %v1219_v22 = vadd.f32 %v1215_v21, %v4146_v38  ;;  %v3072_v38 = vld [vmem:[%s4792_s2 + $0xc8] sm:$0xff]  ;;  %v4384_v21 = vpack.c.bf16 %v3094_v20, %v3092_v19 }
 0xfa2   :  { %v1220_v57 = vadd.f32 %v1216_v23, %v4154_v42  ;;  %v3074_v42 = vld [vmem:[%s4792_s2 + $0xd8] sm:$0xff]  ;;  %v3096_v23 = vld [vmem:[%s4793_s3 + $0xe0] sm:$0xff] }
 0xfa3   :  { %v3061_v53 = vmul.f32 -1.442695, %v1219_v22  ;;  %v3417_v29 = vpack.c.bf16 %v3074_v42, %v3072_v38  ;;  %v3099_v22 = vld [vmem:[%s4793_s3 + $0xf8] sm:$0xff]  ;;  %3444 = vmatpush1.bf16.msra.mxu1 %v4384_v21  ;;  %v3067_v38 = vld [vmem:[%s4792_s2 + $0xa0] sm:$0xff]  ;;  %v3069_v42 = vld [vmem:[%s4792_s2 + $0xb0] sm:$0xff] }
 0xfa4   :  { %v3062_v30 = vmul.f32 -1.442695, %v1220_v57 }
 0xfa5   :  { %3714 = vpow2.f32 %v3061_v53  ;;  %3418 = vmatprep.subr.bf16.mxu0 %v3417_v29  ;;  %v4396_v53 = vpack.c.bf16 %v3099_v22, %v3097_v52 }
 0xfa6   :  { %3716 = vtanh.f32 %v1220_v57 }
 0xfa7   :  { %3446 = vmatprep.subr.bf16.mxu1 %v4396_v53 }
 0xfaf   :  { %v3715_v60 = vpop.eup %3714 }
 0xfb0   :  { %v1227_v63 = vadd.f32 1.0, %v3715_v60  ;;  %v3717_v25 = vpop.eup %3716  ;;  %v3063_v60 = vld [vmem:[%s4792_s2 + $0x80] sm:$0xff] }
 0xfb2   :  { %3718 = vrcp.f32 %v1227_v63  ;;  %v3065_v63 = vld [vmem:[%s4792_s2 + $0x90] sm:$0xff] }
 0xfb3   :  { %3720 = vpow2.f32 %v3062_v30 }
 0xfbc   :  { %v3719_v26 = vpop.eup %3718 }
 0xfbd   :  { %v1238_v5 = vmul.f32 %v3719_v26, %v3717_v25  ;;  %v1237_v27 = vmul.f32 %v3719_v26, %v1235_v2  ;;  %v3721_v31 = vpop.eup %3720  ;;  %v3068_v2 = vld [vmem:[%s4792_s2 + $0xa8] sm:$0xff]  ;;  %v3070_v26 = vld [vmem:[%s4792_s2 + $0xb8] sm:$0xff] }
 0xfbe   :  { %v1228_v32 = vadd.f32 1.0, %v3721_v31  ;;  %v3431_v31 = vpack.c.bf16 %v3069_v42, %v3067_v38 }
 0xfbf   :  { %1240 = vrot.lane.b32.xlu0 %v1238_v5, %s3856_s28  ;;  %v3427_v5 = vpack.c.bf16 %v3065_v63, %v3063_v60 }
 0xfc0   :  { %3722 = vrcp.f32 %v1228_v32 }
 0xfc3   :  { %1015 = vrot.lane.b32.xlu0 %v4260_v33, %s3857_s29 }
 0xfc7   :  { %536 = vrot.lane.b32.xlu0 %v4193_v36, %s3857_s29  ;;  %v3071_v36 = vld [vmem:[%s4792_s2 + $0xc0] sm:$0xff] }
 0xfca   :  { %v3723_v3 = vpop.eup %3722 }
 0xfcb   :  { %774 = vrot.lane.b32.xlu0 %v4227_v45, %s3857_s29  ;;  %v3073_v45 = vld [vmem:[%s4792_s2 + $0xd0] sm:$0xff] }
 0xfcc   :  { %v3419_v34 = vpack.c.bf16 %v3073_v45, %v3071_v36 }
 0xfce   :  { %3420 = vmatpush1.bf16.msra.mxu0 %v3419_v34 }
 0xfcf   :  { %3422 = vmatprep.subr.bf16.mxu0 %v3421_v48 }
 0xfd2   :  { %3424 = vmatpush1.bf16.msra.mxu0 %v3423_v51 }
 0xfd3   :  { %3426 = vmatprep.subr.bf16.mxu0 %v3425_v58 }
0x1031   :  { %v1241_v35 = vpop.permute.xlu0 %1240 }
0x1032   :  { %v1243_v44 = vadd.f32 %v1241_v35, %v1237_v27  ;;  %v3429_v27 = vpack.c.bf16 %v3070_v26, %v3068_v2 }
0x1034   :  { %3724 = vtanh.f32 %v1243_v44 }
0x1035   :  { %v1016_v40 = vpop.permute.xlu0 %1015 }
0x1036   :  { %1018 = vst.msk [vmem:[#allocation3 + $0x2] sm:$0xc] %vm534_vm7, %v1016_v40  ;;  %v1453_v40 = vrot.slane %v3083_v39, %v199_v14 }
0x1039   :  { %v537_v56 = vpop.permute.xlu0 %536 }
0x103a   :  { %539 = vst.msk [vmem:[#allocation3 + $0xa] sm:$0xc] %vm534_vm7, %v537_v56 }
0x103d   :  { %v775_v4 = vpop.permute.xlu0 %774 }
0x103e   :  { %v3725_v43 = vpop.eup %3724  ;;  %777 = vst.msk [vmem:[#allocation3 + $0x2] sm:$0xc0] %vm772_vm8, %v775_v4 }
0x103f   :  { %v1245_v8 = vmul.f32 %v3725_v43, %v3723_v3 }
0x1041   :  { %1251 = vrot.lane.b32.xlu0 %v1245_v8, %s3857_s29 }
0x1045   :  { %650 = vrot.lane.b32.xlu0 %v4210_v13, %s3856_s28  ;;  %v3098_v13 = vld [vmem:[%s4793_s3 + $0xf0] sm:$0xff]  ;;  %v1275_v35 = vld [vmem:[#allocation3 + $0x8] sm:$0xff] }
0x1046   :  { %v4404_v57 = vpack.c.bf16 %v3098_v13, %v3096_v23 }
0x1048   :  { %3448 = vmatpush1.bf16.msra.mxu1 %v4404_v57 }
0x1049   :  { %1011 = vrot.lane.b32.xlu0 %v4260_v33, %s3856_s28  ;;  %3466 = vmatprep.subr.bf16.mxu1 %v4338_v62 }
0x104b   :  { %1550 = vmatmul.mubr.f32.vlgmr.msra.gmra.mrb[12].mxu1 %v3855_v11 }
0x104c   :  { %3468 = vmatpush1.bf16.msra.mxu1 %v4347_v37  ;;  %1779 = vmatprep.mubr.f32.mxu1 %v3855_v11 }
0x104d   :  { %1247 = vrot.lane.b32.xlu0 %v1245_v8, %s3856_s28  ;;  %3470 = vmatprep.subr.bf16.mxu1 %v4357_v46 }
0x1050   :  { %3472 = vmatpush1.bf16.msra.mxu1 %v4365_v15 }
0x1051   :  { %3474 = vmatprep.subr.bf16.mxu1 %v4376_v18 }
0x1054   :  { %3476 = vmatpush1.bf16.msra.mxu1 %v4384_v21 }
0x1055   :  { %3478 = vmatprep.subr.bf16.mxu1 %v4396_v53 }
0x1058   :  { %3480 = vmatpush1.bf16.msra.mxu1 %v4404_v57 }
0x1059   :  { %3498 = vmatprep.subr.bf16.mxu1 %v4338_v62 }
0x10b3   :  { %v1252_v33 = vpop.permute.xlu0 %1251 }
0x10b4   :  { %1254 = vst.msk [vmem:[#allocation3 - $0x6] sm:$0xc0] %vm772_vm8, %v1252_v33 }
0x10b7   :  { %v651_v25 = vpop.permute.xlu0 %650 }
0x10b8   :  { %654 = vst.msk [vmem:[#allocation2] sm:$0x30] %vm653_vm6, %v651_v25 }
0x10bb   :  { %v1012_v29 = vpop.permute.xlu0 %1011  ;;  %v1274_v30 = vld [vmem:[#allocation3] sm:$0xff] }
0x10bc   :  { %1014 = vst.msk [vmem:[#allocation2 + $0x8] sm:$0xc] %vm534_vm7, %v1012_v29  ;;  %3079 = vmatmul.mubr.msk.f32.vlgmr.msra.gmra.mrb[10].mxu0 %vm1276_vm9, %v1274_v30 }
0x10bd   :  { %3428 = vmatpush1.bf16.msra.mxu0 %v3427_v5  ;;  %1353 = vmatprep.mubr.f32.mxu0 %v3855_v11 }
0x10be   :  { %3430 = vmatprep.subr.bf16.mxu0 %v3429_v27 }
0x10bf   :  { %v1248_v32 = vpop.permute.xlu0 %1247  ;;  %v1272_v44 = vld [vmem:[#allocation2] sm:$0xff] }
0x10c0   :  { %1250 = vst.msk [vmem:[#allocation2 + $0x8] sm:$0xc0] %vm772_vm8, %v1248_v32  ;;  %3080 = vmatmul.mubr.msk.f32.gmra.mrb[12].mxu0 %vm1276_vm9, %v1275_v35 }
0x10c1   :  { %3432 = vmatpush1.bf16.msra.mxu0 %v3431_v31  ;;  %1430 = vmatprep.mubr.f32.mxu0 %v3855_v11 }
0x10c2   :  { %3450 = vmatprep.subr.bf16.mxu0 %v4338_v62 }
0x10c4   :  { %3081 = vmatmul.mubr.msk.f32.vlgmr.msra.gmra.mrb[10].mxu0 %vm1276_vm9, %v1272_v44 }
0x10c5   :  { %1436 = vmatprep.mubr.f32.mxu0 %v3855_v11  ;;  %3452 = vmatpush1.bf16.msra.mxu0 %v4347_v37 }
0x10c6   :  { %3454 = vmatprep.subr.bf16.mxu0 %v4357_v46 }
0x10c7   :  { %v1273_v36 = vld [vmem:[#allocation2 + $0x8] sm:$0xff] }
0x10c8   :  { %3082 = vmatmul.mubr.msk.f32.gmra.mrb[12].mxu0 %vm1276_vm9, %v1273_v36 }
0x10c9   :  { %3456 = vmatpush1.bf16.msra.mxu0 %v4365_v15  ;;  %1661 = vmatprep.mubr.f32.mxu0 %v3855_v11 }
0x10ca   :  { %3458 = vmatprep.subr.bf16.mxu0 %v4376_v18 }
0x10cd   :  { %3460 = vmatpush1.bf16.msra.mxu0 %v4384_v21 }
0x10ce   :  { %3462 = vmatprep.subr.bf16.mxu0 %v4396_v53 }
0x10d1   :  { %3464 = vmatpush1.bf16.msra.mxu0 %v4404_v57 }
0x10d2   :  { %3482 = vmatprep.subr.bf16.mxu0 %v4338_v62 }
0x111e   :  { %v1551_v45 = vpop.f32.mrb[12].mxu1 }
0x111f   :  { %v1553_v34 = vpop.f32.mrb[13].mxu1 }
0x1197   :  { %v1432_v48 = vpop.f32.mrb[10].mxu0 }
0x1198   :  { %v1456_v49 = vadd.f32 %v1449_v47, %v1432_v48  ;;  %v1434_v50 = vpop.f32.mrb[11].mxu0 }
0x1199   :  { %v1457_v51 = vadd.f32 %v1453_v40, %v1434_v50 }
0x119a   :  { %v1948_v58 = vrot.slane %v1456_v49, 6  ;;  %v2066_v59 = vrot.slane %v1456_v49, 2 }
0x119b   :  { %v1438_v54 = vpop.f32.mrb[12].mxu0  ;;  %v1949_v0 = vrot.slane %v1457_v51, 6  ;;  %v2067_v1 = vrot.slane %v1457_v51, 2 }
0x119c   :  { %v1458_v55 = vadd.f32 %v1449_v47, %v1438_v54  ;;  %v1440_v56 = vpop.f32.mrb[13].mxu0 }
0x119d   :  { %v1459_v61 = vadd.f32 %v1453_v40, %v1440_v56 }
0x119e   :  { %v1479_v3 = vrot.slane %v1458_v55, 6  ;;  %v1589_v4 = vrot.slane %v1458_v55, 2  ;;  %v4470_v12 = vsel %vm4132_vm3, %v1458_v55, %v1948_v58  ;;  %v4474_v10 = vsel %vm4132_vm3, %v1458_v55, %v2066_v59 }
0x119f   :  { %v1480_v14 = vrot.slane %v1459_v61, 6  ;;  %v1590_v41 = vrot.slane %v1459_v61, 2  ;;  %v4478_v43 = vsel %vm4136_vm4, %v1459_v61, %v1949_v0  ;;  %v4482_v7 = vsel %vm4136_vm4, %v1459_v61, %v2067_v1 }
0x11a0   :  { %v4486_v8 = vsel %vm4132_vm3, %v1456_v49, %v1479_v3  ;;  %v4490_v9 = vsel %vm4132_vm3, %v1456_v49, %v1589_v4  ;;  %vm2750_vm3 = vcmask 39936  }
0x11a1   :  { %v1556_v6 = vadd.f32 %v1551_v45, %v4486_v8  ;;  %v4495_v16 = vsel %vm4136_vm4, %v1457_v51, %v1480_v14  ;;  %v4499_v17 = vsel %vm4136_vm4, %v1457_v51, %v1590_v41  ;;  %vm2752_vm4 = vcmask 48128  }
0x11a2   :  { %v1557_v20 = vadd.f32 %v1553_v34, %v4495_v16 }
0x11a3   :  { %v3100_v19 = vmul.f32 -1.442695, %v1556_v6 }
0x11a4   :  { %v3101_v33 = vmul.f32 -1.442695, %v1557_v20 }
0x11a5   :  { %3726 = vpow2.f32 %v3100_v19 }
0x11a6   :  { %3728 = vtanh.f32 %v1557_v20 }
0x11af   :  { %v3727_v52 = vpop.eup %3726 }
0x11b0   :  { %v1564_v22 = vadd.f32 1.0, %v3727_v52  ;;  %v3729_v24 = vpop.eup %3728 }
0x11b2   :  { %3730 = vrcp.f32 %v1564_v22 }
0x11b3   :  { %3732 = vpow2.f32 %v3101_v33 }
0x11bc   :  { %v3731_v23 = vpop.eup %3730 }
0x11bd   :  { %v1572_v13 = vmul.f32 %v3731_v23, %v3729_v24  ;;  %v3733_v60 = vpop.eup %3732  ;;  %v1571_v28 = vmul.f32 0.0, %v3731_v23 }
0x11be   :  { %v1565_v63 = vadd.f32 1.0, %v3733_v60 }
0x11bf   :  { %1574 = vrot.lane.b32.xlu1 %v1572_v13, %s3856_s28 }
0x11c0   :  { %3734 = vrcp.f32 %v1565_v63 }
0x11ca   :  { %v3735_v26 = vpop.eup %3734 }
0x1231   :  { %v1575_v25 = vpop.permute.xlu1 %1574 }
0x1232   :  { %v1577_v2 = vadd.f32 %v1575_v25, %v1571_v28 }
0x1234   :  { %3736 = vtanh.f32 %v1577_v2  ;;  %v1690_v39 = vrot.slane %v1577_v2, 6 }
0x123e   :  { %v3737_v5 = vpop.eup %3736 }
0x123f   :  { %v4503_v27 = vmul.f32 %v3737_v5, %v3735_v26 }
0x1241   :  { %1581 = vrot.lane.b32.xlu0 %v4503_v27, %s3856_s28 }
0x12b3   :  { %v1582_v38 = vpop.permute.xlu0 %1581 }
0x12b4   :  { %1584 = vst.msk [vmem:[#allocation4] sm:$0x3] %vm412_vm5, %v1582_v38  ;;  %3102 = vmatmul.mubr.msk.f32.vlgmr.msra.gmra.mrb[14].mxu0 %vm93_vm0, %v1582_v38 }
0x12b5   :  { %3484 = vmatpush1.bf16.msra.mxu0 %v4347_v37  ;;  %1897 = vmatprep.mubr.f32.mxu0 %v3855_v11 }
0x12b6   :  { %3486 = vmatprep.subr.bf16.mxu0 %v4357_v46 }
0x12b9   :  { %3488 = vmatpush1.bf16.msra.mxu0 %v4365_v15 }
0x12ba   :  { %3490 = vmatprep.subr.bf16.mxu0 %v4376_v18 }
0x12bd   :  { %3492 = vmatpush1.bf16.msra.mxu0 %v4384_v21 }
0x12be   :  { %3494 = vmatprep.subr.bf16.mxu0 %v4396_v53 }
0x12c1   :  { %3496 = vmatpush1.bf16.msra.mxu0 %v4404_v57 }
0x12c2   :  { %3514 = vmatprep.subr.bf16.mxu0 %v4338_v62 }
0x1387   :  { %v1663_v42 = vpop.f32.mrb[14].mxu0 }
0x1388   :  { %v1670_v29 = vrot.slane %v1663_v42, 6  ;;  %v1665_v30 = vpop.f32.mrb[15].mxu0 }
0x1389   :  { %v1671_v35 = vrot.slane %v1665_v30, 6 }
0x138a   :  { %v1674_v31 = vadd.f32 %v1670_v29, %v4490_v9 }
0x138b   :  { %v1675_v44 = vadd.f32 %v1671_v35, %v4499_v17 }
0x138c   :  { %v3103_v32 = vmul.f32 -1.442695, %v1674_v31 }
0x138d   :  { %v3104_v49 = vmul.f32 -1.442695, %v1675_v44 }
0x138e   :  { %3738 = vpow2.f32 %v3103_v32 }
0x138f   :  { %3740 = vtanh.f32 %v1675_v44 }
0x1398   :  { %v3739_v36 = vpop.eup %3738 }
0x1399   :  { %v1682_v45 = vadd.f32 1.0, %v3739_v36  ;;  %v3741_v34 = vpop.eup %3740 }
0x139b   :  { %3742 = vrcp.f32 %v1682_v45 }
0x139c   :  { %3744 = vpow2.f32 %v3104_v49 }
0x13a5   :  { %v3743_v47 = vpop.eup %3742 }
0x13a6   :  { %v1693_v40 = vmul.f32 %v3743_v47, %v3741_v34  ;;  %v1692_v48 = vmul.f32 %v3743_v47, %v1690_v39  ;;  %v3745_v50 = vpop.eup %3744 }
0x13a7   :  { %v1683_v51 = vadd.f32 1.0, %v3745_v50 }
0x13a8   :  { %1695 = vrot.lane.b32.xlu1 %v1693_v40, %s3856_s28 }
0x13a9   :  { %3746 = vrcp.f32 %v1683_v51 }
0x13b3   :  { %v3747_v56 = vpop.eup %3746 }
0x141a   :  { %v1696_v54 = vpop.permute.xlu1 %1695 }
0x141b   :  { %v1698_v55 = vadd.f32 %v1696_v54, %v1692_v48 }
0x141d   :  { %3748 = vtanh.f32 %v1698_v55  ;;  %v1808_v24 = vrot.slane %v1698_v55, 6 }
0x1427   :  { %v3749_v58 = vpop.eup %3748 }
0x1428   :  { %v4521_v59 = vmul.f32 %v3749_v58, %v3747_v56 }
0x142a   :  { %v1710_v61 = vrot.slane %v4521_v59, 2 }
0x142c   :  { %1711 = vrot.lane.b32.xlu0 %v1710_v61, %s3856_s28 }
0x149e   :  { %v1712_v0 = vpop.permute.xlu0 %1711 }
0x149f   :  { %3105 = vmatmul.mubr.msk.f32.vlgmr.msra.gmra.mrb[14].mxu1 %vm93_vm0, %v1712_v0 }
0x14a0   :  { %3500 = vmatpush1.bf16.msra.mxu1 %v4347_v37  ;;  %2023 = vmatprep.mubr.f32.mxu1 %v3855_v11 }
0x14a1   :  { %3502 = vmatprep.subr.bf16.mxu1 %v4357_v46 }
0x14a4   :  { %3504 = vmatpush1.bf16.msra.mxu1 %v4365_v15 }
0x14a5   :  { %3506 = vmatprep.subr.bf16.mxu1 %v4376_v18 }
0x14a8   :  { %3508 = vmatpush1.bf16.msra.mxu1 %v4384_v21 }
0x14a9   :  { %3510 = vmatprep.subr.bf16.mxu1 %v4396_v53 }
0x14ac   :  { %3512 = vmatpush1.bf16.msra.mxu1 %v4404_v57 }
0x14ad   :  { %3530 = vmatprep.subr.bf16.mxu1 %v4338_v62 }
0x1572   :  { %v1781_v1 = vpop.f32.mrb[14].mxu1 }
0x1573   :  { %v1788_v3 = vrot.slane %v1781_v1, 4  ;;  %v1783_v4 = vpop.f32.mrb[15].mxu1 }
0x1574   :  { %v1789_v6 = vrot.slane %v1783_v4, 4 }
0x1575   :  { %v1792_v14 = vadd.f32 %v1788_v3, %v4486_v8 }
0x1576   :  { %v1793_v19 = vadd.f32 %v1789_v6, %v4495_v16 }
0x1577   :  { %v3106_v41 = vmul.f32 -1.442695, %v1792_v14 }
0x1578   :  { %v3107_v60 = vmul.f32 -1.442695, %v1793_v19 }
0x1579   :  { %3750 = vpow2.f32 %v3106_v41 }
0x157a   :  { %3752 = vtanh.f32 %v1793_v19 }
0x1583   :  { %v3751_v20 = vpop.eup %3750 }
0x1584   :  { %v1800_v52 = vadd.f32 1.0, %v3751_v20  ;;  %v3753_v22 = vpop.eup %3752 }
0x1586   :  { %3754 = vrcp.f32 %v1800_v52 }
0x1587   :  { %3756 = vpow2.f32 %v3107_v60 }
0x1590   :  { %v3755_v23 = vpop.eup %3754 }
0x1591   :  { %v1811_v13 = vmul.f32 %v3755_v23, %v3753_v22  ;;  %v1810_v33 = vmul.f32 %v3755_v23, %v1808_v24  ;;  %v3757_v63 = vpop.eup %3756 }
0x1592   :  { %v1801_v8 = vadd.f32 1.0, %v3757_v63 }
0x1593   :  { %1813 = vrot.lane.b32.xlu1 %v1811_v13, %s3856_s28 }
0x1594   :  { %3758 = vrcp.f32 %v1801_v8 }
0x159e   :  { %v3759_v16 = vpop.eup %3758 }
0x1605   :  { %v1814_v28 = vpop.permute.xlu1 %1813 }
0x1606   :  { %v1816_v25 = vadd.f32 %v1814_v28, %v1810_v33 }
0x1608   :  { %3760 = vtanh.f32 %v1816_v25  ;;  %v1926_v39 = vrot.slane %v1816_v25, 6 }
0x1612   :  { %v3761_v2 = vpop.eup %3760 }
0x1613   :  { %v4538_v26 = vmul.f32 %v3761_v2, %v3759_v16 }
0x1615   :  { %v1828_v5 = vrot.slane %v4538_v26, 4 }
0x1617   :  { %1829 = vrot.lane.b32.xlu0 %v1828_v5, %s3856_s28 }
0x1689   :  { %v1830_v38 = vpop.permute.xlu0 %1829 }
0x168a   :  { %3108 = vmatmul.mubr.msk.f32.vlgmr.msra.gmra.mrb[16].mxu0 %vm93_vm0, %v1830_v38 }
0x168b   :  { %3516 = vmatpush1.bf16.msra.mxu0 %v4347_v37  ;;  %2138 = vmatprep.mubr.f32.mxu0 %v3855_v11 }
0x168c   :  { %3518 = vmatprep.subr.bf16.mxu0 %v4357_v46 }
0x168f   :  { %3520 = vmatpush1.bf16.msra.mxu0 %v4365_v15 }
0x1690   :  { %3522 = vmatprep.subr.bf16.mxu0 %v4376_v18 }
0x1693   :  { %3524 = vmatpush1.bf16.msra.mxu0 %v4384_v21 }
0x1694   :  { %3526 = vmatprep.subr.bf16.mxu0 %v4396_v53 }
0x1697   :  { %3528 = vmatpush1.bf16.msra.mxu0 %v4404_v57 }
0x1698   :  { %3546 = vmatprep.subr.bf16.mxu0 %v4338_v62 }
0x175d   :  { %v1899_v42 = vpop.f32.mrb[16].mxu0 }
0x175e   :  { %v1906_v29 = vrot.slane %v1899_v42, 2  ;;  %v1901_v30 = vpop.f32.mrb[17].mxu0 }
0x175f   :  { %v1907_v35 = vrot.slane %v1901_v30, 2 }
0x1760   :  { %v1910_v31 = vadd.f32 %v1906_v29, %v4490_v9 }
0x1761   :  { %v1911_v44 = vadd.f32 %v1907_v35, %v4499_v17 }
0x1762   :  { %v3109_v32 = vmul.f32 -1.442695, %v1910_v31 }
0x1763   :  { %v3110_v62 = vmul.f32 -1.442695, %v1911_v44 }
0x1764   :  { %3762 = vpow2.f32 %v3109_v32 }
0x1765   :  { %3764 = vtanh.f32 %v1911_v44 }
0x176e   :  { %v3763_v36 = vpop.eup %3762 }
0x176f   :  { %v1918_v45 = vadd.f32 1.0, %v3763_v36  ;;  %v3765_v34 = vpop.eup %3764 }
0x1771   :  { %3766 = vrcp.f32 %v1918_v45 }
0x1772   :  { %3768 = vpow2.f32 %v3110_v62 }
0x177b   :  { %v3767_v47 = vpop.eup %3766 }
0x177c   :  { %v1929_v40 = vmul.f32 %v3767_v47, %v3765_v34  ;;  %v1928_v48 = vmul.f32 %v3767_v47, %v1926_v39  ;;  %v3769_v49 = vpop.eup %3768 }
0x177d   :  { %v1919_v9 = vadd.f32 1.0, %v3769_v49 }
0x177e   :  { %1931 = vrot.lane.b32.xlu1 %v1929_v40, %s3856_s28 }
0x177f   :  { %3770 = vrcp.f32 %v1919_v9 }
0x1789   :  { %v3771_v17 = vpop.eup %3770 }
0x17f0   :  { %v1932_v50 = vpop.permute.xlu1 %1931 }
0x17f1   :  { %v1934_v51 = vadd.f32 %v1932_v50, %v1928_v48 }
0x17f3   :  { %3772 = vtanh.f32 %v1934_v51  ;;  %v2046_v19 = vrot.slane %v1934_v51, 6 }
0x17fd   :  { %v3773_v54 = vpop.eup %3772 }
0x17fe   :  { %v4555_v55 = vmul.f32 %v3773_v54, %v3771_v17 }
0x1800   :  { %v1954_v56 = vrot.slane %v4555_v55, 6 }
0x1802   :  { %1955 = vrot.lane.b32.xlu0 %v1954_v56, %s3856_s28 }
0x1874   :  { %v1956_v58 = vpop.permute.xlu0 %1955 }
0x1875   :  { %3111 = vmatmul.mubr.msk.f32.vlgmr.msra.gmra.mrb[16].mxu1 %vm93_vm0, %v1956_v58 }
0x1876   :  { %3532 = vmatpush1.bf16.msra.mxu1 %v4347_v37  ;;  %2256 = vmatprep.mubr.f32.mxu1 %v3855_v11 }
0x1877   :  { %3534 = vmatprep.subr.bf16.mxu1 %v4357_v46 }
0x187a   :  { %3536 = vmatpush1.bf16.msra.mxu1 %v4365_v15 }
0x187b   :  { %3538 = vmatprep.subr.bf16.mxu1 %v4376_v18 }
0x187e   :  { %3540 = vmatpush1.bf16.msra.mxu1 %v4384_v21 }
0x187f   :  { %3542 = vmatprep.subr.bf16.mxu1 %v4396_v53 }
0x1882   :  { %3544 = vmatpush1.bf16.msra.mxu1 %v4404_v57 }
0x1948   :  { %v2025_v61 = vpop.f32.mrb[16].mxu1 }
0x1949   :  { %v2030_v0 = vadd.f32 %v2025_v61, %v4470_v12  ;;  %v2027_v1 = vpop.f32.mrb[17].mxu1 }
0x194a   :  { %v2031_v4 = vadd.f32 %v2027_v1, %v4478_v43 }
0x194b   :  { %v3112_v3 = vmul.f32 -1.442695, %v2030_v0 }
0x194c   :  { %v3113_v24 = vmul.f32 -1.442695, %v2031_v4 }
0x194d   :  { %3774 = vpow2.f32 %v3112_v3 }
0x194e   :  { %3776 = vtanh.f32 %v2031_v4 }
0x1957   :  { %v3775_v14 = vpop.eup %3774 }
0x1958   :  { %v2038_v41 = vadd.f32 1.0, %v3775_v14  ;;  %v3777_v6 = vpop.eup %3776 }
0x195a   :  { %3778 = vrcp.f32 %v2038_v41 }
0x195b   :  { %3780 = vpow2.f32 %v3113_v24 }
0x1964   :  { %v3779_v20 = vpop.eup %3778 }
0x1965   :  { %v2049_v52 = vmul.f32 %v3779_v20, %v3777_v6  ;;  %v2048_v22 = vmul.f32 %v3779_v20, %v2046_v19  ;;  %v3781_v23 = vpop.eup %3780 }
0x1966   :  { %v2039_v13 = vadd.f32 1.0, %v3781_v23 }
0x1967   :  { %2051 = vrot.lane.b32.xlu1 %v2049_v52, %s3856_s28 }
0x1968   :  { %3782 = vrcp.f32 %v2039_v13 }
0x1972   :  { %v3783_v63 = vpop.eup %3782 }
0x19d9   :  { %v2052_v33 = vpop.permute.xlu1 %2051 }
0x19da   :  { %v2054_v60 = vadd.f32 %v2052_v33, %v2048_v22 }
0x19dc   :  { %3784 = vtanh.f32 %v2054_v60 }
0x19e6   :  { %v3785_v8 = vpop.eup %3784 }
0x19e7   :  { %v4571_v28 = vmul.f32 %v3785_v8, %v3783_v63 }
0x19e9   :  { %2058 = vrot.lane.b32.xlu0 %v4571_v28, %s3856_s28 }
0x1a5b   :  { %v2059_v25 = vpop.permute.xlu0 %2058 }
0x1a5c   :  { %2061 = vst.msk [vmem:[#allocation4 + $0x8] sm:$0x3] %vm412_vm5, %v2059_v25  ;;  %3114 = vmatmul.mubr.msk.f32.vlgmr.msra.gmra.mrb[18].mxu0 %vm93_vm0, %v2059_v25 }
0x1a5d   :  { %3548 = vmatpush1.bf16.msra.mxu0 %v4347_v37  ;;  %2374 = vmatprep.mubr.f32.mxu0 %v3855_v11 }
0x1a5e   :  { %3550 = vmatprep.subr.bf16.mxu0 %v4357_v46 }
0x1a61   :  { %3552 = vmatpush1.bf16.msra.mxu0 %v4365_v15 }
0x1a62   :  { %3554 = vmatprep.subr.bf16.mxu0 %v4376_v18 }
0x1a65   :  { %3556 = vmatpush1.bf16.msra.mxu0 %v4384_v21  ;;  %v2167_v21 = vrot.slane %v2054_v60, 6 }
0x1a66   :  { %3558 = vmatprep.subr.bf16.mxu0 %v4396_v53 }
0x1a69   :  { %3560 = vmatpush1.bf16.msra.mxu0 %v4404_v57 }
0x1b2f   :  { %v2140_v16 = vpop.f32.mrb[18].mxu0 }
0x1b30   :  { %v2147_v2 = vrot.slane %v2140_v16, 6  ;;  %v2142_v5 = vpop.f32.mrb[19].mxu0 }
0x1b31   :  { %v2148_v42 = vrot.slane %v2142_v5, 6 }
0x1b32   :  { %v2151_v38 = vadd.f32 %v2147_v2, %v4474_v10 }
0x1b33   :  { %v2152_v46 = vadd.f32 %v2148_v42, %v4482_v7 }
0x1b34   :  { %v3115_v37 = vmul.f32 -1.442695, %v2151_v38 }
0x1b35   :  { %v3116_v57 = vmul.f32 -1.442695, %v2152_v46 }
0x1b36   :  { %3786 = vpow2.f32 %v3115_v37 }
0x1b37   :  { %3788 = vtanh.f32 %v2152_v46 }
0x1b40   :  { %v3787_v29 = vpop.eup %3786 }
0x1b41   :  { %v2159_v15 = vadd.f32 1.0, %v3787_v29  ;;  %v3789_v18 = vpop.eup %3788 }
0x1b43   :  { %3790 = vrcp.f32 %v2159_v15 }
0x1b44   :  { %3792 = vpow2.f32 %v3116_v57  ;;  %v2431_v57 = vld [vmem:[%s4795_s5 + $0x20] sm:$0xff] }
0x1b4d   :  { %v3791_v30 = vpop.eup %3790 }
0x1b4e   :  { %v2170_v53 = vmul.f32 %v3791_v30, %v3789_v18  ;;  %v2169_v31 = vmul.f32 %v3791_v30, %v2167_v21  ;;  %v3793_v32 = vpop.eup %3792  ;;  %v2429_v30 = vld [vmem:[%s4795_s5 + $0x10] sm:$0xff] }
0x1b4f   :  { %v2160_v35 = vadd.f32 1.0, %v3793_v32  ;;  %v2432_v32 = vld [vmem:[%s4795_s5 + $0x28] sm:$0xff] }
0x1b50   :  { %2172 = vrot.lane.b32.xlu1 %v2170_v53, %s3856_s28  ;;  %v3858_v53 = vmov 0.0|0.0  }
0x1b51   :  { %3794 = vrcp.f32 %v2160_v35  ;;  %3561 = vmatprep.subr.bf16.mxu1 %v3858_v53  ;;  %v3568_v35 = vpack.c.bf16 %v2432_v32, %v2431_v57 }
0x1b5b   :  { %v3795_v45 = vpop.eup %3794 }
0x1bc2   :  { %v2173_v44 = vpop.permute.xlu1 %2172 }
0x1bc3   :  { %v2175_v36 = vadd.f32 %v2173_v44, %v2169_v31  ;;  %v2433_v44 = vld [vmem:[%s4795_s5 + $0x30] sm:$0xff] }
0x1bc5   :  { %3796 = vtanh.f32 %v2175_v36  ;;  %v2285_v61 = vrot.slane %v2175_v36, 6  ;;  %v2434_v36 = vld [vmem:[%s4795_s5 + $0x38] sm:$0xff] }
0x1bcf   :  { %v3797_v34 = vpop.eup %3796 }
0x1bd0   :  { %v4588_v39 = vmul.f32 %v3797_v34, %v3795_v45  ;;  %v3571_v45 = vpack.c.bf16 %v2434_v36, %v2433_v44 }
0x1bd2   :  { %v2187_v47 = vrot.slane %v4588_v39, 2 }
0x1bd4   :  { %2188 = vrot.lane.b32.xlu0 %v2187_v47, %s3856_s28 }
0x1c46   :  { %v2189_v40 = vpop.permute.xlu0 %2188 }
0x1c47   :  { %3117 = vmatmul.mubr.msk.f32.vlgmr.msra.gmra.mrb[18].mxu1 %vm93_vm0, %v2189_v40 }
0x1c48   :  { %3210 = vmatprep.mubr.msk.f32.mxu1 %vm3859_vm10, %v3855_v11 }
0x1d1a   :  { %v2258_v48 = vpop.f32.mrb[18].mxu1 }
0x1d1b   :  { %v2265_v62 = vrot.slane %v2258_v48, 4  ;;  %v2260_v49 = vpop.f32.mrb[19].mxu1 }
0x1d1c   :  { %v2266_v51 = vrot.slane %v2260_v49, 4  ;;  %v2521_v49 = vld [vmem:[%s4797_s7 + $0x20] sm:$0xff] }
0x1d1d   :  { %v2269_v9 = vadd.f32 %v2265_v62, %v4470_v12 }
0x1d1e   :  { %v2270_v17 = vadd.f32 %v2266_v51, %v4478_v43 }
0x1d1f   :  { %v3118_v50 = vmul.f32 -1.442695, %v2269_v9  ;;  %v2522_v9 = vld [vmem:[%s4797_s7 + $0x28] sm:$0xff] }
0x1d20   :  { %v3119_v4 = vmul.f32 -1.442695, %v2270_v17 }
0x1d21   :  { %3798 = vpow2.f32 %v3118_v50  ;;  %v3573_v50 = vpack.c.bf16 %v2522_v9, %v2521_v49 }
0x1d22   :  { %3800 = vtanh.f32 %v2270_v17  ;;  %v2523_v17 = vld [vmem:[%s4797_s7 + $0x30] sm:$0xff] }
0x1d23   :  { %3574 = vmatprep.subr.bf16.mxu0 %v3573_v50 }
0x1d2b   :  { %v3799_v54 = vpop.eup %3798 }
0x1d2c   :  { %v2277_v56 = vadd.f32 1.0, %v3799_v54  ;;  %v3801_v58 = vpop.eup %3800  ;;  %v2524_v54 = vld [vmem:[%s4797_s7 + $0x38] sm:$0xff] }
0x1d2e   :  { %3802 = vrcp.f32 %v2277_v56  ;;  %v3577_v56 = vpack.c.bf16 %v2524_v54, %v2523_v17 }
0x1d2f   :  { %3804 = vpow2.f32 %v3119_v4 }
0x1d38   :  { %v3803_v0 = vpop.eup %3802 }
0x1d39   :  { %v2288_v1 = vmul.f32 %v3803_v0, %v3801_v58  ;;  %v2287_v3 = vmul.f32 %v3803_v0, %v2285_v61  ;;  %v3805_v14 = vpop.eup %3804 }
0x1d3a   :  { %v2278_v12 = vadd.f32 1.0, %v3805_v14 }
0x1d3b   :  { %2290 = vrot.lane.b32.xlu1 %v2288_v1, %s3856_s28  ;;  %v2517_v1 = vld [vmem:[%s4797_s7] sm:$0xff] }
0x1d3c   :  { %3806 = vrcp.f32 %v2278_v12 }
0x1d46   :  { %v3807_v43 = vpop.eup %3806 }
0x1dad   :  { %v2291_v41 = vpop.permute.xlu1 %2290 }
0x1dae   :  { %v2293_v6 = vadd.f32 %v2291_v41, %v2287_v3  ;;  %v2518_v3 = vld [vmem:[%s4797_s7 + $0x8] sm:$0xff] }
0x1daf   :  { %v3581_v14 = vpack.c.bf16 %v2518_v3, %v2517_v1  ;;  %v3860_v3 = vmov 1  }
0x1db0   :  { %3808 = vtanh.f32 %v2293_v6  ;;  %v2403_v29 = vrot.slane %v2293_v6, 6  ;;  %3622 = vset.pattern.permute.xlu1 %v3860_v3 }
0x1dba   :  { %v3809_v19 = vpop.eup %3808 }
0x1dbb   :  { %v2295_v20 = vmul.f32 %v3809_v19, %v3807_v43 }
0x1dbd   :  { %v2305_v52 = vrot.slane %v2295_v20, 4 }
0x1dbf   :  { %2306 = vrot.lane.b32.xlu0 %v2305_v52, %s3856_s28 }
0x1dc3   :  { %2062 = vrot.lane.b32.xlu0 %v4571_v28, %s3857_s29 }
0x1dc7   :  { %2301 = vrot.lane.b32.xlu0 %v2295_v20, %s3857_s29 }
0x1dcb   :  { %1585 = vrot.lane.b32.xlu0 %v4503_v27, %s3857_s29 }
0x1dcf   :  { %1824 = vrot.lane.b32.xlu0 %v4538_v26, %s3857_s29 }
0x1dd3   :  { %1702 = vrot.lane.b32.xlu0 %v4521_v59, %s3856_s28 }
0x1dd7   :  { %1938 = vrot.lane.b32.xlu0 %v4555_v55, %s3856_s28 }
0x1ddb   :  { %2297 = vrot.lane.b32.xlu0 %v2295_v20, %s3856_s28 }
0x1e31   :  { %v2307_v22 = vpop.permute.xlu0 %2306 }
0x1e32   :  { %3120 = vmatmul.mubr.msk.f32.vlgmr.msra.gmra.mrb[20].mxu0 %vm93_vm0, %v2307_v22 }
0x1e33   :  { %3576 = vmatpush3.bf16.msra.mxu0 %v3573_v50 }
0x1e34   :  { %3578 = vmatprep.subr.bf16.mxu0 %v3577_v56 }
0x1e35   :  { %v2063_v24 = vpop.permute.xlu0 %2062 }
0x1e36   :  { %2065 = vst.msk [vmem:[#allocation5 + $0x6] sm:$0x3] %vm412_vm5, %v2063_v24 }
0x1e37   :  { %3580 = vmatpush3.bf16.msra.mxu0 %v3577_v56 }
0x1e38   :  { %3582 = vmatprep.subr.bf16.mxu0 %v3581_v14 }
0x1e39   :  { %v2302_v23 = vpop.permute.xlu0 %2301 }
0x1e3a   :  { %2304 = vst.msk [vmem:[#allocation5 - $0x2] sm:$0x30] %vm653_vm6, %v2302_v23 }
0x1e3d   :  { %v1586_v27 = vpop.permute.xlu0 %1585 }
0x1e3e   :  { %1588 = vst.msk [vmem:[#allocation5 + $0xe] sm:$0x3] %vm412_vm5, %v1586_v27  ;;  %vm2754_vm5 = vcmask 56320  }
0x1e41   :  { %v1825_v13 = vpop.permute.xlu0 %1824 }
0x1e42   :  { %1827 = vst.msk [vmem:[#allocation5 + $0x6] sm:$0x30] %vm653_vm6, %v1825_v13 }
0x1e45   :  { %v1703_v33 = vpop.permute.xlu0 %1702 }
0x1e46   :  { %1705 = vst.msk [vmem:[#allocation4] sm:$0xc] %vm534_vm7, %v1703_v33 }
0x1e49   :  { %v1939_v60 = vpop.permute.xlu0 %1938 }
0x1e4a   :  { %1941 = vst.msk [vmem:[#allocation4] sm:$0xc0] %vm772_vm8, %v1939_v60 }
0x1e4d   :  { %v2298_v63 = vpop.permute.xlu0 %2297 }
0x1e4e   :  { %2300 = vst.msk [vmem:[#allocation4 + $0x8] sm:$0x30] %vm653_vm6, %v2298_v63  ;;  %v3123_v63 = vld [vmem:[%s4796_s6] ss:$0 sm:$0xff] }
0x1f05   :  { %v2376_v8 = vpop.f32.mrb[20].mxu0 }
0x1f06   :  { %v2383_v28 = vrot.slane %v2376_v8, 2  ;;  %v2378_v25 = vpop.f32.mrb[21].mxu0 }
0x1f07   :  { %v2384_v5 = vrot.slane %v2378_v25, 2 }
0x1f08   :  { %v2387_v16 = vadd.f32 %v2383_v28, %v4474_v10  ;;  %v2427_v10 = vld [vmem:[%s4795_s5] sm:$0xff] }
0x1f09   :  { %v2388_v38 = vadd.f32 %v2384_v5, %v4482_v7  ;;  %v2428_v7 = vld [vmem:[%s4795_s5 + $0x8] sm:$0xff] }
0x1f0a   :  { %v3121_v2 = vmul.f32 -1.442695, %v2387_v16  ;;  %v3562_v31 = vpack.c.bf16 %v2428_v7, %v2427_v10  ;;  %v3130_v10 = vld [vmem:[%s4799_s9] ss:$0 sm:$0xff] }
0x1f0b   :  { %v3122_v34 = vmul.f32 -1.442695, %v2388_v38 }
0x1f0c   :  { %3810 = vpow2.f32 %v3121_v2  ;;  %3563 = vmatpush3.bf16.msra.mxu1 %v3562_v31  ;;  %v3129_v2 = vld [vmem:[%s4798_s8] ss:$0 sm:$0xff] }
0x1f0d   :  { %3812 = vtanh.f32 %v2388_v38  ;;  %3564 = vmatprep.subr.bf16.mxu1 %v3858_v53 }
0x1f16   :  { %v3811_v37 = vpop.eup %3810 }
0x1f17   :  { %v2395_v42 = vadd.f32 1.0, %v3811_v37  ;;  %v3813_v46 = vpop.eup %3812 }
0x1f19   :  { %3814 = vrcp.f32 %v2395_v42 }
0x1f1a   :  { %3816 = vpow2.f32 %v3122_v34 }
0x1f23   :  { %v3815_v15 = vpop.eup %3814 }
0x1f24   :  { %v2406_v18 = vmul.f32 %v3815_v15, %v3813_v46  ;;  %v2405_v21 = vmul.f32 %v3815_v15, %v2403_v29  ;;  %v3817_v47 = vpop.eup %3816 }
0x1f25   :  { %v2396_v40 = vadd.f32 1.0, %v3817_v47 }
0x1f26   :  { %2408 = vrot.lane.b32.xlu1 %v2406_v18, %s3856_s28 }
0x1f27   :  { %3818 = vrcp.f32 %v2396_v40 }
0x1f2a   :  { %2183 = vrot.lane.b32.xlu1 %v4588_v39, %s3857_s29 }
0x1f2e   :  { %1706 = vrot.lane.b32.xlu1 %v4521_v59, %s3857_s29  ;;  %v2430_v59 = vld [vmem:[%s4795_s5 + $0x18] sm:$0xff] }
0x1f31   :  { %v3819_v61 = vpop.eup %3818 }
0x1f32   :  { %1942 = vrot.lane.b32.xlu1 %v4555_v55, %s3857_s29  ;;  %v3565_v55 = vpack.c.bf16 %v2430_v59, %v2429_v30 }
0x1f34   :  { %3566 = vmatpush3.bf16.msra.mxu1 %v3565_v55 }
0x1f35   :  { %3567 = vmatprep.subr.bf16.mxu1 %v3858_v53 }
0x1f38   :  { %3569 = vmatpush3.bf16.msra.mxu1 %v3568_v35 }
0x1f39   :  { %3570 = vmatprep.subr.bf16.mxu1 %v3858_v53 }
0x1f3c   :  { %3572 = vmatpush3.bf16.msra.mxu1 %v3571_v45 }
0x1f3d   :  { %3589 = vmatprep.subr.bf16.mxu1 %v3858_v53 }
0x1f98   :  { %v2409_v48 = vpop.permute.xlu1 %2408 }
0x1f99   :  { %v2411_v62 = vadd.f32 %v2409_v48, %v2405_v21 }
0x1f9b   :  { %3820 = vtanh.f32 %v2411_v62 }
0x1f9c   :  { %v2184_v51 = vpop.permute.xlu1 %2183 }
0x1f9d   :  { %2186 = vst.msk [vmem:[#allocation5 + $0x2] sm:$0xc] %vm534_vm7, %v2184_v51 }
0x1fa0   :  { %v1707_v58 = vpop.permute.xlu1 %1706 }
0x1fa1   :  { %1709 = vst.msk [vmem:[#allocation5 + $0xa] sm:$0xc] %vm534_vm7, %v1707_v58 }
0x1fa4   :  { %v1943_v0 = vpop.permute.xlu1 %1942 }
0x1fa5   :  { %v3821_v4 = vpop.eup %3820  ;;  %1945 = vst.msk [vmem:[#allocation5 + $0x2] sm:$0xc0] %vm772_vm8, %v1943_v0 }
0x1fa6   :  { %v2413_v12 = vmul.f32 %v3821_v4, %v3819_v61 }
0x1fa8   :  { %2419 = vrot.lane.b32.xlu1 %v2413_v12, %s3857_s29  ;;  %v2442_v41 = vrot.slane %v2413_v12, 6  ;;  %s3026_s29 = sshll.u32 %s3867_s24, 4  ;;  %s3027_s29 = int_to_ptr.vmem [resolvable:$true] %s3026_s29 }
0x1fa9   :  { %s3830_s25 = scalar_lea.vmem %s3027_s29, 32  ;;  %p3835_p1 = scmp.lt.s32.totalorder %s3027_s29, %s3027_s29 }
0x1faa   :  { %2443 = vrot.lane.b32.xlu0 %v2442_v41, %s3856_s28  ;;  %v3861_v41 = vmov 2   ;;  %p3831_p0 = scmp.ne.s32.totalorder %s3027_s29, %s3830_s25  ;;  %p3836_p2 = scmp.lt.s32.totalorder %s3830_s25, %s3830_s25 }
0x1fac   :  { %1820 = vrot.lane.b32.xlu1 %v4538_v26, %s3856_s28  ;;  %v2519_v26 = vld [vmem:[%s4797_s7 + $0x10] sm:$0xff]  ;;  %v4701_v24 = vld [vmem:[#allocation5 + $0x8] sm:$0xff]  ;;  %p3837_p3 = por %p3836_p2, %p3835_p1 }
0x1fae   :  { %p3838_p4 = pnand %p3837_p3, %p3831_p0 }
0x1fb0   :  { %2179 = vrot.lane.b32.xlu1 %v4588_v39, %s3856_s28  ;;  %v2520_v39 = vld [vmem:[%s4797_s7 + $0x18] sm:$0xff] }
0x1fb1   :  { %v3585_v22 = vpack.c.bf16 %v2520_v39, %v2519_v26  ;;  %v2861_v26 = vld [vmem:[%s4800_s10 + $0x20] sm:$0xff]  ;;  %v2862_v39 = vld [vmem:[%s4800_s10 + $0x28] sm:$0xff] }
0x1fb4   :  { %2415 = vrot.lane.b32.xlu1 %v2413_v12, %s3856_s28 }
0x201a   :  { %v2420_v6 = vpop.permute.xlu1 %2419 }
0x201b   :  { %2422 = vst.msk [vmem:[#allocation5 - $0x6] sm:$0xc0] %vm772_vm8, %v2420_v6  ;;  %v3862_v6 = vmov 3  }
0x201c   :  { %v2444_v43 = vpop.permute.xlu0 %2443 }
0x201d   :  { %3211 = vmatmul.mubr.msk.f32.vlgmr.msra.gmra.mrb[20].mxu1 %vm93_vm0, %v2444_v43  ;;  %v3863_v43 = vmov 4  }
0x201e   :  { %v1821_v19 = vpop.permute.xlu1 %1820  ;;  %3243 = vmatprep.mubr.msk.f32.mxu1 %vm3859_vm10, %v3855_v11 }
0x201f   :  { %1823 = vst.msk [vmem:[#allocation4] sm:$0x30] %vm653_vm6, %v1821_v19  ;;  %v3864_v19 = vmov 6  }
0x2022   :  { %v2180_v20 = vpop.permute.xlu1 %2179  ;;  %v4696_v52 = vld [vmem:[#allocation5] sm:$0xff] }
0x2023   :  { %2182 = vst.msk [vmem:[#allocation4 + $0x8] sm:$0xc] %vm534_vm7, %v2180_v20  ;;  %3221 = vmatprep.mubr.msk.f32.mxu0 %vm1276_vm9, %v4696_v52  ;;  %v3865_v20 = vmov 5  }
0x2024   :  { %3222 = vmatmul.mubr.msk.f32.vlgmr.msra.gmra.mrb[22].mxu0 %vm1276_vm9, %v4701_v24 }
0x2025   :  { %3584 = vmatpush3.bf16.msra.mxu0 %v3581_v14 }
0x2026   :  { %v2416_v23 = vpop.permute.xlu1 %2415  ;;  %v4705_v27 = vld [vmem:[#allocation4] sm:$0xff]  ;;  %3586 = vmatprep.subr.bf16.mxu0 %v3585_v22 }
0x2027   :  { %2418 = vst.msk [vmem:[#allocation4 + $0x8] sm:$0xc0] %vm772_vm8, %v2416_v23  ;;  %3232 = vmatprep.mubr.msk.f32.mxu0 %vm1276_vm9, %v4705_v27  ;;  %v3866_v23 = vmov 7  }
0x2029   :  { %3588 = vmatpush3.bf16.msra.mxu0 %v3585_v22  ;;  %v3590_v22 = vpack.c.bf16 %v2862_v39, %v2861_v26 }
0x202b   :  { %3591 = vmatpush3.bf16.msra.mxu1 %v3590_v22 }
0x202c   :  { %3592 = vmatprep.subr.bf16.mxu1 %v3858_v53 }
0x202e   :  { %v4710_v13 = vld [vmem:[#allocation4 + $0x8] sm:$0xff] }
0x202f   :  { %3233 = vmatmul.mubr.msk.f32.vlgmr.msra.gmra.mrb[22].mxu0 %vm1276_vm9, %v4710_v13 }
0x20f0   :  { %v2513_v33 = vpop.f32.mrb[20].mxu1 }
0x20f1   :  { %v3212_v60 = vpop.f32.mrb[21].mxu1  ;;  %v2514_v8 = vadd.f32 %v3123_v63, %v2513_v33  ;;  %v2863_v33 = vld [vmem:[%s4800_s10 + $0x30] sm:$0xff] }
0x20f2   :  { %v2864_v60 = vld [vmem:[%s4800_s10 + $0x38] sm:$0xff] }
0x20f3   :  { %v2697_v28 = vrot.slane %v2514_v8, 6  ;;  %v2699_v25 = vrot.slane %v2514_v8, 4  ;;  %v2701_v37 = vrot.slane %v2514_v8, 2  ;;  %v3593_v63 = vpack.c.bf16 %v2864_v60, %v2863_v33 }
0x20f5   :  { %v2704_v16 = vsel %vm2703_vm11, %v2514_v8, %v2697_v28  ;;  %3594 = vmatpush3.bf16.msra.mxu1 %v3593_v63  ;;  %v2785_v8 = vrot.slane %v4696_v52, 2 }
0x20f6   :  { %v2706_v5 = vsel %vm2705_vm12, %v2704_v16, %v2699_v25  ;;  %3595 = vmatprep.subr.bf16.mxu1 %v3858_v53 }
0x20f7   :  { %v2708_v29 = vsel %vm2707_vm13, %v2706_v5, %v2701_v37  ;;  %v2797_v5 = vrot.slane %v4696_v52, 4 }
0x2102   :  { %v3234_v38 = vpop.f32.mrb[22].mxu0 }
0x2103   :  { %v2695_v42 = vadd.f32 %v3234_v38, %v3129_v2  ;;  %v2678_v46 = vpop.f32.mrb[23].mxu0  ;;  %v2781_v38 = vrot.slane %v4705_v27, 2 }
0x2104   :  { %v2694_v15 = vadd.f32 %v3129_v2, %v2678_v46 }
0x2105   :  { %v2710_v18 = vadd.f32 %v2708_v29, %v2695_v42 }
0x2106   :  { %v2709_v21 = vadd.f32 %v2708_v29, %v2694_v15 }
0x2107   :  { %3822 = vtanh.f32 %v2710_v18  ;;  %v2793_v18 = vrot.slane %v4705_v27, 4 }
0x2108   :  { %3824 = vtanh.f32 %v2709_v21 }
0x2111   :  { %v3823_v7 = vpop.eup %3822 }
0x2112   :  { %v3825_v30 = vpop.eup %3824  ;;  %v2721_v31 = vmul.f32 %v3823_v7, %v3130_v10  ;;  %v2809_v7 = vrot.slane %v4696_v52, 6 }
0x2113   :  { %v2720_v59 = vmul.f32 %v3825_v30, %v3130_v10 }
0x2114   :  { %v2725_v55 = vsel %vm93_vm0, %v2721_v31, 0.0 }
0x2115   :  { %2726 = vadd.xlane.f32.xlu0 %v2725_v55  ;;  %v2722_v57 = vsel %vm93_vm0, %v2720_v59, 0.0  ;;  %vm2756_vm0 = vcmask 58368  }
0x2116   :  { %2723 = vadd.xlane.f32.xlu1 %v2722_v57 }
0x21a2   :  { %v2727_v36 = vpop.xlane.xlu0 %2726 }
0x21a3   :  { %v2724_v32 = vpop.xlane.xlu1 %2723  ;;  %v2736_v40 = vrot.slane %v2727_v36, 2  ;;  %v2738_v62 = vrot.slane %v2727_v36, 4  ;;  %v2740_v9 = vrot.slane %v2727_v36, 6 }
0x21a4   :  { %v2729_v35 = vrot.slane %v2724_v32, 2  ;;  %v2731_v44 = vrot.slane %v2724_v32, 4  ;;  %v2733_v45 = vrot.slane %v2724_v32, 6 }
0x21a6   :  { %v2743_v34 = vsel %vm2742_vm14, %v2724_v32, %v2729_v35 }
0x21a7   :  { %v2745_v47 = vsel %vm2744_vm15, %v2743_v34, %v2731_v44  ;;  %v2805_v44 = vrot.slane %v4705_v27, 6 }
0x21a8   :  { %v2747_v48 = vsel %vm2746_vm1, %v2745_v47, %v2733_v45 }
0x21a9   :  { %v2749_v49 = vsel %vm2748_vm2, %v2747_v48, %v2727_v36  ;;  %v2829_v36 = vrot.slane %v4701_v24, 2  ;;  %v2841_v48 = vrot.slane %v4701_v24, 4 }
0x21aa   :  { %v2751_v50 = vsel %vm2750_vm3, %v2749_v49, %v2736_v40 }
0x21ab   :  { %v2753_v51 = vsel %vm2752_vm4, %v2751_v50, %v2738_v62 }
0x21ac   :  { %v2755_v17 = vsel %vm2754_vm5, %v2753_v51, %v2740_v9  ;;  %v2825_v9 = vrot.slane %v4710_v13, 2 }
0x21ad   :  { %v2757_v54 = vsel %vm2756_vm0, %v2755_v17, -inf }
0x21ae   :  { %2758 = vmax.xlane.f32.xlu0 %v2757_v54  ;;  %v2853_v54 = vrot.slane %v4701_v24, 6 }
0x223b   :  { %v2759_v56 = vpop.xlane.xlu0 %2758 }
0x223c   :  { %v2760_v58 = vsub.f32 %v2755_v17, %v2759_v56  ;;  %v2858_v56 = vld [vmem:[%s4800_s10 + $0x8] sm:$0xff] }
0x223e   :  { %v2761_v61 = vmul.f32 1.442695, %v2760_v58 }
0x2240   :  { %3826 = vpow2.f32 %v2761_v61 }
0x224a   :  { %v3827_v0 = vpop.eup %3826 }
0x224b   :  { %v2763_v1 = vsel %vm2756_vm0, %v3827_v0, 0.0 }
0x224c   :  { %2764 = vadd.xlane.f32.xlu1 %v2763_v1 }
0x22d9   :  { %v2765_v4 = vpop.xlane.xlu1 %2764 }
0x22da   :  { %3828 = vrcp.f32 %v2765_v4  ;;  %v2837_v4 = vrot.slane %v4710_v13, 4 }
0x22e4   :  { %v3829_v14 = vpop.eup %3828 }
0x22e5   :  { %v2767_v12 = vmul.f32 %v3829_v14, %v3827_v0 }
0x22e7   :  { %2778 = vperm.xlu1 %3622, %v2767_v12   ;;  %2770 = vperm.xlu0 %3621, %v2767_v12  }
0x22eb   :  { %3623 = vset.pattern.permute.xlu1 %v3861_v41  ;;  %3624 = vset.pattern.permute.xlu0 %v3862_v6  ;;  %v2860_v41 = vld [vmem:[%s4800_s10 + $0x18] sm:$0xff] }
0x22ec   :  { %2790 = vperm.xlu1 %3623, %v2767_v12   ;;  %2802 = vperm.xlu0 %3624, %v2767_v12  }
0x22f0   :  { %3625 = vset.pattern.permute.xlu1 %v3863_v43  ;;  %3627 = vset.pattern.permute.xlu0 %v3864_v19  ;;  %v2849_v43 = vrot.slane %v4710_v13, 6 }
0x22f1   :  { %2814 = vperm.xlu1 %3625, %v2767_v12   ;;  %2834 = vperm.xlu0 %3627, %v2767_v12  }
0x22f5   :  { %3626 = vset.pattern.permute.xlu1 %v3865_v20  ;;  %3629 = vset.pattern.permute.xlu0 %v3866_v23 }
0x22f6   :  { %2822 = vperm.xlu1 %3626, %v2767_v12  }
0x22fa   :  { %3628 = vset.pattern.permute.xlu1 %v3866_v23 }
0x22fb   :  { %2846 = vperm.xlu1 %3628, %v2767_v12  }
0x2366   :  { %v2779_v28 = vpop.permute.xlu1 %2778  ;;  %v2771_v25 = vpop.permute.xlu0 %2770 }
0x2367   :  { %v2787_v16 = vmul.f32 %v2785_v8, %v2779_v28  ;;  %v2775_v2 = vmul.f32 %v2771_v25, %v4696_v52  ;;  %v2783_v29 = vmul.f32 %v2781_v38, %v2779_v28  ;;  %v2773_v15 = vmul.f32 %v2771_v25, %v4705_v27  ;;  %v2857_v27 = vld [vmem:[%s4800_s10] sm:$0xff] }
0x2368   :  { %v3596_v3 = vpack.c.bf16 %v2858_v56, %v2857_v27 }
0x2369   :  { %v2788_v42 = vadd.f32 %v2787_v16, %v2775_v2  ;;  %v2784_v55 = vadd.f32 %v2783_v29, %v2773_v15 }
0x236b   :  { %v2791_v37 = vpop.permute.xlu1 %2790  ;;  %v2803_v21 = vpop.permute.xlu0 %2802 }
0x236c   :  { %v2799_v46 = vmul.f32 %v2797_v5, %v2791_v37  ;;  %v2795_v30 = vmul.f32 %v2793_v18, %v2791_v37  ;;  %v2811_v31 = vmul.f32 %v2809_v7, %v2803_v21  ;;  %v2807_v45 = vmul.f32 %v2805_v44, %v2803_v21 }
0x236e   :  { %v2800_v10 = vadd.f32 %v2799_v46, %v2788_v42  ;;  %v2796_v35 = vadd.f32 %v2795_v30, %v2784_v55 }
0x2370   :  { %v2815_v59 = vpop.permute.xlu1 %2814  ;;  %v2812_v57 = vadd.f32 %v2811_v31, %v2800_v10  ;;  %v2835_v34 = vpop.permute.xlu0 %2834  ;;  %v2808_v52 = vadd.f32 %v2807_v45, %v2796_v35 }
0x2371   :  { %v2819_v32 = vmul.f32 %v2815_v59, %v4701_v24  ;;  %v2817_v49 = vmul.f32 %v2815_v59, %v4710_v13  ;;  %v2843_v50 = vmul.f32 %v2841_v48, %v2835_v34  ;;  %v2859_v24 = vld [vmem:[%s4800_s10 + $0x10] sm:$0xff]  ;;  %v2839_v6 = vmul.f32 %v2837_v4, %v2835_v34  ;;  %v3133_v13 = vld [vmem:[%s4801_s11] ss:$0 sm:$0xff] }
0x2372   :  { %v3599_v19 = vpack.c.bf16 %v2860_v41, %v2859_v24 }
0x2373   :  { %v2820_v40 = vadd.f32 %v2819_v32, %v2812_v57  ;;  %v2818_v0 = vadd.f32 %v2817_v49, %v2808_v52 }
0x2375   :  { %v2823_v47 = vpop.permute.xlu1 %2822 }
0x2376   :  { %v2831_v62 = vmul.f32 %v2829_v36, %v2823_v47  ;;  %v2827_v17 = vmul.f32 %v2825_v9, %v2823_v47 }
0x2378   :  { %v2832_v51 = vadd.f32 %v2831_v62, %v2820_v40  ;;  %v2828_v14 = vadd.f32 %v2827_v17, %v2818_v0 }
0x237a   :  { %v2847_v58 = vpop.permute.xlu1 %2846  ;;  %v2844_v61 = vadd.f32 %v2843_v50, %v2832_v51  ;;  %v2840_v26 = vadd.f32 %v2839_v6, %v2828_v14 }
0x237b   :  { %v2855_v1 = vmul.f32 %v2853_v54, %v2847_v58  ;;  %v2851_v39 = vmul.f32 %v2849_v43, %v2847_v58 }
0x237d   :  { %v2856_v12 = vadd.f32 %v2855_v1, %v2844_v61  ;;  %v2852_v20 = vadd.f32 %v2851_v39, %v2840_v26 }
0x237f   :  { %3244 = vmatmul.mubr.msk.f32.vlgmr.msra.gmra.mrb[22].mxu1 %vm1276_vm9, %v2856_v12 }
0x2380   :  { %3597 = vmatpush3.bf16.msra.mxu1 %v3596_v3  ;;  %3254 = vmatprep.mubr.msk.f32.mxu1 %vm3859_vm10, %v3855_v11 }
0x2381   :  { %3598 = vmatprep.subr.bf16.mxu1 %v3858_v53 }
0x2384   :  { %3600 = vmatpush3.bf16.msra.mxu1 %v3599_v19 }
0x2387   :  { %3255 = vmatmul.mubr.msk.f32.vlgmr.msra.gmra.mrb[24].mxu1 %vm1276_vm9, %v2852_v20 }
0x2452   :  { %v2934_v22 = vpop.f32.mrb[22].mxu1 }
0x2453   :  { %v3245_v23 = vpop.f32.mrb[23].mxu1 }
0x245a   :  { %v3007_v33 = vpop.f32.mrb[24].mxu1 }
0x245b   :  { %v3008_v60 = vadd.f32 %v3007_v33, %v2934_v22  ;;  %v3256_v63 = vpop.f32.mrb[25].mxu1 }
0x245d   :  { %v3018_v11 = vadd.f32 %v3133_v13, %v3008_v60 }
0x245f   :  { %3019 = vst.msk [vmem:[#allocation6] sm:$0x3] %vm2756_vm0, %v3018_v11 }
0x2460   :  { %3841 = shalt.err (!%p3838_p4)
}
0x2461   :  { %s3842_s7 = scalar_lea.hbm %s4802_s12, 32 }
0x2462   :  { %p3843_p5 = scmp.ne.s32.totalorder %s4802_s12, %s3842_s7  ;;  %p3846_p6 = scmp.lt.u32.totalorder %s3842_s7, %s4802_s12 }
0x2464   :  { %p3848_p7 = pnand %p3846_p6, %p3843_p5 }
0x2466   :  { %3851 = shalt.err (!%p3848_p7)
}
0x2467   :  { %3029 = dma.vmem_to_hbm [thread:$0]  %s3027_s29, 32, %s4802_s12, [#allocation7]  }
0x2468   :  { %3852 = dma.done.wait [#allocation7], 32  }
0x2469   :  { %3853 = vsyncadd [#allocation7], 4294967264 }
0x246a   :  { %3033 = vsyncpa [#allocation7], 1 }

</bundles_post_ra>
